<compile_context>
chip_gen: v5e
topology: v5e:2x2
jax: 0.10.0
libtpu: 0.0.40
codegen_flags: <defaults>
</compile_context>

<pallas_src>
import functools

import jax
import jax.numpy as jnp
from jax import lax
from jax.experimental import pallas as pl
from jax.experimental.pallas import tpu as pltpu

CAPACITY = 4      # original default: 32 (kept small for the test)
LATENT = 10       # latent_dims
KSIZE = 4         # conv kernel size
STRIDE = 2        # conv stride
PAD = 1           # conv padding
BN_EPS = 1e-5


def _round_up(x, m):
    return (x + m - 1) // m * m


# ---------------------------------------------------------------------------
# Fused, tiled Pallas matmul kernel:
#   out = act2( act1(X @ W + b) * scale + shift )
#   act1 = ReLU (optional), act2 = Sigmoid (optional)
# Grid = (M/tm, N/tn, K/tk); K axis is an "arbitrary" reduction with an f32
# VMEM accumulator; bf16 MXU inputs, f32 epilogue.
# ---------------------------------------------------------------------------
def _fused_matmul_kernel(x_ref, w_ref, b_ref, s_ref, t_ref, o_ref, acc_ref,
                         *, relu, sigmoid):
    @pl.when(pl.program_id(2) == 0)
    def _():
        acc_ref[...] = jnp.zeros_like(acc_ref)

    acc_ref[...] += jnp.dot(x_ref[...], w_ref[...],
                            preferred_element_type=jnp.float32)

    @pl.when(pl.program_id(2) == pl.num_programs(2) - 1)
    def _():
        y = acc_ref[...] + b_ref[...]
        if relu:
            y = jnp.maximum(y, 0.0)
        y = y * s_ref[...] + t_ref[...]
        if sigmoid:
            y = jax.nn.sigmoid(y)
        o_ref[...] = y.astype(o_ref.dtype)


def fused_matmul(x, w, b, scale, shift, *, relu=False, sigmoid=False,
                 out_dtype=jnp.float32, tm_max=256, tn_max=512, tk_max=256):
    m, k = x.shape
    kw, n = w.shape
    assert kw == k
    # Tiles: M in sublane-of-16 units (bf16 packing), N/K lane multiples of 128.
    tm = min(tm_max, _round_up(m, 16))
    tn = min(tn_max, _round_up(n, 128))
    tk = min(tk_max, _round_up(k, 128))
    mp, kp, np_ = _round_up(m, tm), _round_up(k, tk), _round_up(n, tn)

    xp = jnp.pad(x.astype(jnp.bfloat16), ((0, mp - m), (0, kp - k)))
    wp = jnp.pad(w.astype(jnp.bfloat16), ((0, kp - k), (0, np_ - n)))
    bp = jnp.pad(b.astype(jnp.float32).reshape(1, n), ((0, 0), (0, np_ - n)))
    sp = jnp.pad(scale.astype(jnp.float32).reshape(1, n), ((0, 0), (0, np_ - n)))
    tp = jnp.pad(shift.astype(jnp.float32).reshape(1, n), ((0, 0), (0, np_ - n)))

    grid = (mp // tm, np_ // tn, kp // tk)
    kern = functools.partial(_fused_matmul_kernel, relu=relu, sigmoid=sigmoid)
    out = pl.pallas_call(
        kern,
        out_shape=jax.ShapeDtypeStruct((mp, np_), out_dtype),
        grid_spec=pltpu.PrefetchScalarGridSpec(
            num_scalar_prefetch=0,
            grid=grid,
            in_specs=[
                pl.BlockSpec((tm, tk), lambda i, j, kk: (i, kk)),
                pl.BlockSpec((tk, tn), lambda i, j, kk: (kk, j)),
                pl.BlockSpec((1, tn), lambda i, j, kk: (0, j)),
                pl.BlockSpec((1, tn), lambda i, j, kk: (0, j)),
                pl.BlockSpec((1, tn), lambda i, j, kk: (0, j)),
            ],
            out_specs=pl.BlockSpec((tm, tn), lambda i, j, kk: (i, j)),
            scratch_shapes=[pltpu.VMEM((tm, tn), jnp.float32)],
        ),
        compiler_params=pltpu.CompilerParams(
            dimension_semantics=("parallel", "parallel", "arbitrary"),
        ),
    )(xp, wp, bp, sp, tp)
    return out[:m, :n]


# ---------------------------------------------------------------------------
# Conv lowering (NHWC activations throughout).
# ---------------------------------------------------------------------------
def im2col_nhwc(x, k, stride, pad):
    n, h, w, c = x.shape
    xp = jnp.pad(x, ((0, 0), (pad, pad), (pad, pad), (0, 0)))
    ho = (h + 2 * pad - k) // stride + 1
    wo = (w + 2 * pad - k) // stride + 1
    cols = []
    for i in range(k):
        for j in range(k):
            cols.append(xp[:, i:i + stride * ho:stride, j:j + stride * wo:stride, :])
    col = jnp.concatenate(cols, axis=-1)          # (n, ho, wo, k*k*c)
    return col.reshape(n * ho * wo, k * k * c), ho, wo


def conv2d_fused(x, weight, bias, bn_scale, bn_shift, *, relu,
                 out_dtype=jnp.bfloat16):
    # weight: (Cout, Cin, K, K) — nn.Conv2d layout; x is NHWC.
    cout, cin, k, _ = weight.shape
    n = x.shape[0]
    col, ho, wo = im2col_nhwc(x, k, STRIDE, PAD)
    wmat = weight.transpose(2, 3, 1, 0).reshape(k * k * cin, cout)
    y = fused_matmul(col, wmat, bias, bn_scale, bn_shift,
                     relu=relu, out_dtype=out_dtype)
    return y.reshape(n, ho, wo, cout)             # stays NHWC — no transpose


def conv_transpose2d_fused(x, weight, bias, bn_scale, bn_shift, *, relu,
                           sigmoid=False, out_dtype=jnp.bfloat16):
    # weight: (Cin, Cout, 4, 4) — nn.ConvTranspose2d layout; stride 2, pad 1.
    # Output pixel (2q+r, 2u+t) only sees input pixels in the 3x3 window
    # centred at (q, u): iy = (2q + r + 1 - ky)/2 (exact), so
    #   r=0: (dy=0, ky=3), (dy=1, ky=1)   |   r=1: (dy=1, ky=2), (dy=2, ky=0)
    # with dy = iy - (q - 1) (same for t / dx / kx).  We therefore build ONE
    # 3x3 stride-1 im2col and embed all 4 phase kernels along N -> a single
    # matmul per ConvTranspose.
    cin, cout, k, _ = weight.shape
    n, h, w, _ = x.shape
    xp = jnp.pad(x, ((0, 0), (1, 1), (1, 1), (0, 0)))
    cols = []
    for dy in range(3):
        for dx in range(3):
            cols.append(xp[:, dy:dy + h, dx:dx + w, :])
    col = jnp.concatenate(cols, axis=-1).reshape(n * h * w, 9 * cin)

    taps = {0: ((0, 3), (1, 1)), 1: ((1, 2), (2, 0))}   # r -> ((dy, ky), ...)
    w9 = jnp.zeros((3, 3, cin, 2, 2, cout), weight.dtype)
    for r in (0, 1):
        for (dy, ky) in taps[r]:
            for t in (0, 1):
                for (dx, kx) in taps[t]:
                    w9 = w9.at[dy, dx, :, r, t, :].set(weight[:, :, ky, kx])
    wmat = w9.reshape(9 * cin, 4 * cout)                 # N order: (r, t, cout)

    y = fused_matmul(col, wmat, jnp.tile(bias, 4), jnp.tile(bn_scale, 4),
                     jnp.tile(bn_shift, 4), relu=relu, sigmoid=sigmoid,
                     out_dtype=out_dtype)
    y = y.reshape(n, h, w, 2, 2, cout)                   # (n, q, u, r, t, c)
    y = y.transpose(0, 1, 3, 2, 4, 5)                    # (n, q, r, u, t, c)
    return y.reshape(n, 2 * h, 2 * w, cout)


def bn_affine(gamma, beta):
    # eval-mode BatchNorm with fresh-module running stats (mean=0, var=1).
    mean = jnp.zeros_like(gamma)
    var = jnp.ones_like(gamma)
    scale = gamma * jax.lax.rsqrt(var + BN_EPS)
    shift = beta - mean * scale
    return scale, shift


# ---------------------------------------------------------------------------
# Parameters (deterministic init) and forward pass.
# NOTE: fc weights are stored in NHWC-flatten order (a fixed host-side
# permutation of PyTorch's NCHW-flatten weights would be needed to load a
# checkpoint).
# ---------------------------------------------------------------------------
def init_params(key, enc_hw):
    c = CAPACITY
    feat = 2 * c * enc_hw            # analogue of 2*capacity*100*80
    ks = jax.random.split(key, 22)

    def nrm(k_, shape, scale=0.05):
        return scale * jax.random.normal(k_, shape, jnp.float32)

    p = {
        "conv1_w": nrm(ks[0], (c, 1, KSIZE, KSIZE)),   "conv1_b": nrm(ks[1], (c,)),
        "bn1_g": 1.0 + nrm(ks[2], (c,)),               "bn1_b": nrm(ks[3], (c,)),
        "conv2_w": nrm(ks[4], (2 * c, c, KSIZE, KSIZE)), "conv2_b": nrm(ks[5], (2 * c,)),
        "bn2_g": 1.0 + nrm(ks[6], (2 * c,)),           "bn2_b": nrm(ks[7], (2 * c,)),
        "fc_mu_w": nrm(ks[8], (feat, LATENT)),         "fc_mu_b": nrm(ks[9], (LATENT,)),
        "fc_lv_w": nrm(ks[10], (feat, LATENT)),        "fc_lv_b": nrm(ks[11], (LATENT,)),
        "fc_z_w": nrm(ks[12], (LATENT, feat)),         "fc_z_b": nrm(ks[13], (feat,)),
        "bn3_g": 1.0 + nrm(ks[14], (2 * c,)),          "bn3_b": nrm(ks[15], (2 * c,)),
        "convT1_w": nrm(ks[16], (2 * c, c, KSIZE, KSIZE)), "convT1_b": nrm(ks[17], (c,)),
        "bn4_g": 1.0 + nrm(ks[18], (c,)),              "bn4_b": nrm(ks[19], (c,)),
        "convT2_w": nrm(ks[20], (c, 4, KSIZE, KSIZE)), "convT2_b": nrm(ks[21], (4,)),
    }
    return p


def vae_forward(params, x_nchw):
    c = CAPACITY
    n = x_nchw.shape[0]
    x = x_nchw.transpose(0, 2, 3, 1)               # NHWC inside the model

    # ---- encoder: Conv -> ReLU -> BN, Conv -> ReLU -> BN, Flatten ----
    s1, t1 = bn_affine(params["bn1_g"], params["bn1_b"])
    h1 = conv2d_fused(x, params["conv1_w"], params["conv1_b"], s1, t1, relu=True)
    s2, t2 = bn_affine(params["bn2_g"], params["bn2_b"])
    h2 = conv2d_fused(h1, params["conv2_w"], params["conv2_b"], s2, t2, relu=True)
    he, we = h2.shape[1], h2.shape[2]
    flat = h2.reshape(n, -1)                       # NHWC flatten

    # fc_mu + fc_logvar merged into one matmul (flat is read once).
    w_heads = jnp.concatenate([params["fc_mu_w"], params["fc_lv_w"]], axis=1)
    b_heads = jnp.concatenate([params["fc_mu_b"], params["fc_lv_b"]])
    ones2l = jnp.ones((2 * LATENT,), jnp.float32)
    zeros2l = jnp.zeros((2 * LATENT,), jnp.float32)
    heads = fused_matmul(flat, w_heads, b_heads, ones2l, zeros2l,
                         out_dtype=jnp.float32)
    mu, logvar = heads[:, :LATENT], heads[:, LATENT:]

    # ---- decoder: fc_z (with BN3 folded in) -> ConvT -> ReLU -> BN -> ConvT -> Sigmoid
    # (forward() decodes mu directly; no sampling)
    s3, t3 = bn_affine(params["bn3_g"], params["bn3_b"])
    s3f = jnp.tile(s3, he * we)                    # NHWC-flat: channel fastest
    t3f = jnp.tile(t3, he * we)
    wz = params["fc_z_w"] * s3f[None, :]           # fold BN3 (no ReLU between)
    bz = params["fc_z_b"] * s3f + t3f
    feat = wz.shape[1]
    z = fused_matmul(mu, wz, bz, jnp.ones((feat,), jnp.float32),
                     jnp.zeros((feat,), jnp.float32), out_dtype=jnp.bfloat16)
    z_img = z.reshape(n, he, we, 2 * c)

    s4, t4 = bn_affine(params["bn4_g"], params["bn4_b"])
    d1 = conv_transpose2d_fused(z_img, params["convT1_w"], params["convT1_b"],
                                s4, t4, relu=True)
    x_hat = conv_transpose2d_fused(d1, params["convT2_w"], params["convT2_b"],
                                   jnp.ones((4,), jnp.float32),
                                   jnp.zeros((4,), jnp.float32),
                                   relu=False, sigmoid=True,
                                   out_dtype=jnp.float32)
    return x_hat.transpose(0, 3, 1, 2), mu, logvar   # back to NCHW at boundary


# ---------------------------------------------------------------------------
# Pure-JAX f32 reference (lax convs) — correctness check only.
# ---------------------------------------------------------------------------
def _ref_forward(params, x_nchw):
    c = CAPACITY
    n = x_nchw.shape[0]
    dn = ("NCHW", "OIHW", "NCHW")

    def bn_nchw(y, g, b):
        s, t = bn_affine(g, b)
        return y * s.reshape(1, -1, 1, 1) + t.reshape(1, -1, 1, 1)

    h = lax.conv_general_dilated(x_nchw, params["conv1_w"], (2, 2),
                                 ((1, 1), (1, 1)), dimension_numbers=dn)
    h = jnp.maximum(h + params["conv1_b"].reshape(1, -1, 1, 1), 0.0)
    h = bn_nchw(h, params["bn1_g"], params["bn1_b"])
    h = lax.conv_general_dilated(h, params["conv2_w"], (2, 2),
                                 ((1, 1), (1, 1)), dimension_numbers=dn)
    h = jnp.maximum(h + params["conv2_b"].reshape(1, -1, 1, 1), 0.0)
    h = bn_nchw(h, params["bn2_g"], params["bn2_b"])
    he, we = h.shape[2], h.shape[3]
    flat = h.transpose(0, 2, 3, 1).reshape(n, -1)          # NHWC-flat layout
    mu = flat @ params["fc_mu_w"] + params["fc_mu_b"]
    logvar = flat @ params["fc_lv_w"] + params["fc_lv_b"]
    z = mu @ params["fc_z_w"] + params["fc_z_b"]
    zi = z.reshape(n, he, we, 2 * c).transpose(0, 3, 1, 2)
    zi = bn_nchw(zi, params["bn3_g"], params["bn3_b"])
    wT1 = jnp.flip(params["convT1_w"], (2, 3)).transpose(1, 0, 2, 3)
    d = lax.conv_general_dilated(zi, wT1, (1, 1), ((2, 2), (2, 2)),
                                 lhs_dilation=(2, 2), dimension_numbers=dn)
    d = jnp.maximum(d + params["convT1_b"].reshape(1, -1, 1, 1), 0.0)
    d = bn_nchw(d, params["bn4_g"], params["bn4_b"])
    wT2 = jnp.flip(params["convT2_w"], (2, 3)).transpose(1, 0, 2, 3)
    xh = lax.conv_general_dilated(d, wT2, (1, 1), ((2, 2), (2, 2)),
                                  lhs_dilation=(2, 2), dimension_numbers=dn)
    xh = jax.nn.sigmoid(xh + params["convT2_b"].reshape(1, -1, 1, 1))
    return xh, mu, logvar


if __name__ == "__main__":
    key = jax.random.PRNGKey(0)
    pkey, xkey = jax.random.split(key)

    H = W = 32                                     # encoder output spatial: 8x8
    enc_hw = (H // 4) * (W // 4)
    params = init_params(pkey, enc_hw)
    x = jax.random.uniform(xkey, (2, 1, H, W), jnp.float32)

    fwd = jax.jit(functools.partial(vae_forward, params))
    x_hat, mu, logvar = fwd(x)
    jax.block_until_ready((x_hat, mu, logvar))

    assert x_hat.shape == (2, 4, H, W)
    assert mu.shape == (2, LATENT) and logvar.shape == (2, LATENT)
    assert bool(jnp.all(jnp.isfinite(x_hat)))
    assert bool(jnp.all((x_hat >= 0.0) & (x_hat <= 1.0)))

    # Cross-check against the pure-JAX f32 reference (bf16 MXU inputs ->
    # generous tolerance).
    xr, mr, lr = jax.jit(functools.partial(_ref_forward, params))(x)
    assert bool(jnp.allclose(mu, mr, atol=5e-2, rtol=5e-2))
    assert bool(jnp.allclose(logvar, lr, atol=5e-2, rtol=5e-2))
    assert bool(jnp.allclose(x_hat, xr, atol=5e-2, rtol=5e-2))

    print("KERNEL_OK")
</pallas_src>

<mosaic_0001>
module attributes {stable_mosaic.version = 11 : i64} {
  func.func @_fused_matmul_kernel(%arg0: i32, %arg1: i32, %arg2: i32, %arg3: memref<256x128xbf16, #tpu.memory_space<vmem>>, %arg4: memref<128x128xbf16, #tpu.memory_space<vmem>>, %arg5: memref<1x128xf32, #tpu.memory_space<vmem>>, %arg6: memref<1x128xf32, #tpu.memory_space<vmem>>, %arg7: memref<1x128xf32, #tpu.memory_space<vmem>>, %arg8: memref<256x128xbf16, #tpu.memory_space<vmem>>, %arg9: memref<256x128xf32, #tpu.memory_space<vmem>>) attributes {dimension_semantics = [#tpu.dimension_semantics<parallel>, #tpu.dimension_semantics<parallel>, #tpu.dimension_semantics<arbitrary>], iteration_bounds = array<i64: 2, 1, 1>, scalar_prefetch = 0 : i64, scratch_operands = 1 : i64, tpu.core_type = #tpu.core_type<tc>, window_params = [{transform_indices = @transform_0, window_bounds = array<i64: 256, 128>}, {transform_indices = @transform_1, window_bounds = array<i64: 128, 128>}, {transform_indices = @transform_2, window_bounds = array<i64: 1, 128>}, {transform_indices = @transform_3, window_bounds = array<i64: 1, 128>}, {transform_indices = @transform_4, window_bounds = array<i64: 1, 128>}, {transform_indices = @transform_5, window_bounds = array<i64: 256, 128>}]} {
    %c0_i32 = arith.constant 0 : i32
    %0 = arith.cmpi eq, %arg2, %c0_i32 : i32
    %1 = arith.extui %0 : i1 to i32
    %c0_i32_0 = arith.constant 0 : i32
    %2 = arith.cmpi ne, %1, %c0_i32_0 : i32
    scf.if %2 {
      %cst_10 = arith.constant 0.000000e+00 : f32
      %12 = vector.broadcast %cst_10 : f32 to vector<256x128xf32>
      %c0_11 = arith.constant 0 : index
      %c0_12 = arith.constant 0 : index
      %13 = vector.load %arg9[%c0_11, %c0_12] : memref<256x128xf32, #tpu.memory_space<vmem>>, vector<256x128xf32>
      tpu.vector_store %arg9[%c0_11, %c0_12], %12 {strides = array<i32>} : memref<256x128xf32, #tpu.memory_space<vmem>>, vector<256x128xf32>,
    } else {
    }
    %c0 = arith.constant 0 : index
    %c0_1 = arith.constant 0 : index
    %3 = vector.load %arg9[%c0, %c0_1] : memref<256x128xf32, #tpu.memory_space<vmem>>, vector<256x128xf32>
    %c0_2 = arith.constant 0 : index
    %c0_3 = arith.constant 0 : index
    %4 = vector.load %arg3[%c0_2, %c0_3] : memref<256x128xbf16, #tpu.memory_space<vmem>>, vector<256x128xbf16>
    %c0_4 = arith.constant 0 : index
    %c0_5 = arith.constant 0 : index
    %5 = vector.load %arg4[%c0_4, %c0_5] : memref<128x128xbf16, #tpu.memory_space<vmem>>, vector<128x128xbf16>
    %cst = arith.constant dense<0.000000e+00> : vector<256x128xf32>
    %6 = tpu.matmul %4, %5, %cst {dimension_numbers = #tpu.dot_dimension_numbers<[1], [0], [0], [1], [0, 0, 1, 1], [], []>} : vector<256x128xbf16>, vector<128x128xbf16>, vector<256x128xf32> -> vector<256x128xf32>
    %7 = arith.addf %3, %6 : vector<256x128xf32>
    %c0_6 = arith.constant 0 : index
    %c0_7 = arith.constant 0 : index
    %8 = vector.load %arg9[%c0_6, %c0_7] : memref<256x128xf32, #tpu.memory_space<vmem>>, vector<256x128xf32>
    tpu.vector_store %arg9[%c0_6, %c0_7], %7 {strides = array<i32>} : memref<256x128xf32, #tpu.memory_space<vmem>>, vector<256x128xf32>,
    %c0_i32_8 = arith.constant 0 : i32
    %9 = arith.cmpi eq, %arg2, %c0_i32_8 : i32
    %10 = arith.extui %9 : i1 to i32
    %c0_i32_9 = arith.constant 0 : i32
    %11 = arith.cmpi ne, %10, %c0_i32_9 : i32
    scf.if %11 {
      %c0_10 = arith.constant 0 : index
      %c0_11 = arith.constant 0 : index
      %12 = vector.load %arg9[%c0_10, %c0_11] : memref<256x128xf32, #tpu.memory_space<vmem>>, vector<256x128xf32>
      %c0_12 = arith.constant 0 : index
      %c0_13 = arith.constant 0 : index
      %13 = vector.load %arg5[%c0_12, %c0_13] : memref<1x128xf32, #tpu.memory_space<vmem>>, vector<1x128xf32>
      %14 = vector.broadcast %13 : vector<1x128xf32> to vector<256x128xf32>
      %15 = arith.addf %12, %14 : vector<256x128xf32>
      %cst_14 = arith.constant 0.000000e+00 : f32
      %16 = vector.broadcast %cst_14 : f32 to vector<256x128xf32>
      %17 = arith.maximumf %15, %16 : vector<256x128xf32>
      %c0_15 = arith.constant 0 : index
      %c0_16 = arith.constant 0 : index
      %18 = vector.load %arg6[%c0_15, %c0_16] : memref<1x128xf32, #tpu.memory_space<vmem>>, vector<1x128xf32>
      %19 = vector.broadcast %18 : vector<1x128xf32> to vector<256x128xf32>
      %20 = arith.mulf %17, %19 : vector<256x128xf32>
      %c0_17 = arith.constant 0 : index
      %c0_18 = arith.constant 0 : index
      %21 = vector.load %arg7[%c0_17, %c0_18] : memref<1x128xf32, #tpu.memory_space<vmem>>, vector<1x128xf32>
      %22 = vector.broadcast %21 : vector<1x128xf32> to vector<256x128xf32>
      %23 = arith.addf %20, %22 : vector<256x128xf32>
      %24 = arith.truncf %23 : vector<256x128xf32> to vector<256x128xbf16>
      %c0_19 = arith.constant 0 : index
      %c0_20 = arith.constant 0 : index
      %25 = vector.load %arg8[%c0_19, %c0_20] : memref<256x128xbf16, #tpu.memory_space<vmem>>, vector<256x128xbf16>
      tpu.vector_store %arg8[%c0_19, %c0_20], %24 {strides = array<i32>} : memref<256x128xbf16, #tpu.memory_space<vmem>>, vector<256x128xbf16>,
    } else {
    }
    return
  }
  func.func @transform_0(%arg0: i32, %arg1: i32, %arg2: i32) -> (i32, i32) {
    %c0_i32 = arith.constant 0 : i32
    return %arg0, %arg2 : i32, i32
  }
  func.func @transform_1(%arg0: i32, %arg1: i32, %arg2: i32) -> (i32, i32) {
    %c0_i32 = arith.constant 0 : i32
    return %arg2, %arg1 : i32, i32
  }
  func.func @transform_2(%arg0: i32, %arg1: i32, %arg2: i32) -> (i32, i32) {
    %c0_i32 = arith.constant 0 : i32
    %c0_i32_0 = arith.constant 0 : i32
    return %c0_i32, %arg1 : i32, i32
  }
  func.func @transform_3(%arg0: i32, %arg1: i32, %arg2: i32) -> (i32, i32) {
    %c0_i32 = arith.constant 0 : i32
    %c0_i32_0 = arith.constant 0 : i32
    return %c0_i32, %arg1 : i32, i32
  }
  func.func @transform_4(%arg0: i32, %arg1: i32, %arg2: i32) -> (i32, i32) {
    %c0_i32 = arith.constant 0 : i32
    %c0_i32_0 = arith.constant 0 : i32
    return %c0_i32, %arg1 : i32, i32
  }
  func.func @transform_5(%arg0: i32, %arg1: i32, %arg2: i32) -> (i32, i32) {
    %c0_i32 = arith.constant 0 : i32
    return %arg0, %arg1 : i32, i32
  }
}

module attributes {stable_mosaic.version = 11 : i64} {
  func.func @_fused_matmul_kernel(%arg0: i32, %arg1: i32, %arg2: i32, %arg3: memref<128x128xbf16, #tpu.memory_space<vmem>>, %arg4: memref<128x128xbf16, #tpu.memory_space<vmem>>, %arg5: memref<1x128xf32, #tpu.memory_space<vmem>>, %arg6: memref<1x128xf32, #tpu.memory_space<vmem>>, %arg7: memref<1x128xf32, #tpu.memory_space<vmem>>, %arg8: memref<128x128xbf16, #tpu.memory_space<vmem>>, %arg9: memref<128x128xf32, #tpu.memory_space<vmem>>) attributes {dimension_semantics = [#tpu.dimension_semantics<parallel>, #tpu.dimension_semantics<parallel>, #tpu.dimension_semantics<arbitrary>], iteration_bounds = array<i64: 1, 1, 1>, scalar_prefetch = 0 : i64, scratch_operands = 1 : i64, tpu.core_type = #tpu.core_type<tc>, window_params = [{transform_indices = @transform_0, window_bounds = array<i64: 128, 128>}, {transform_indices = @transform_1, window_bounds = array<i64: 128, 128>}, {transform_indices = @transform_2, window_bounds = array<i64: 1, 128>}, {transform_indices = @transform_3, window_bounds = array<i64: 1, 128>}, {transform_indices = @transform_4, window_bounds = array<i64: 1, 128>}, {transform_indices = @transform_5, window_bounds = array<i64: 128, 128>}]} {
    %c0_i32 = arith.constant 0 : i32
    %0 = arith.cmpi eq, %arg2, %c0_i32 : i32
    %1 = arith.extui %0 : i1 to i32
    %c0_i32_0 = arith.constant 0 : i32
    %2 = arith.cmpi ne, %1, %c0_i32_0 : i32
    scf.if %2 {
      %cst_10 = arith.constant 0.000000e+00 : f32
      %12 = vector.broadcast %cst_10 : f32 to vector<128x128xf32>
      %c0_11 = arith.constant 0 : index
      %c0_12 = arith.constant 0 : index
      %13 = vector.load %arg9[%c0_11, %c0_12] : memref<128x128xf32, #tpu.memory_space<vmem>>, vector<128x128xf32>
      tpu.vector_store %arg9[%c0_11, %c0_12], %12 {strides = array<i32>} : memref<128x128xf32, #tpu.memory_space<vmem>>, vector<128x128xf32>,
    } else {
    }
    %c0 = arith.constant 0 : index
    %c0_1 = arith.constant 0 : index
    %3 = vector.load %arg9[%c0, %c0_1] : memref<128x128xf32, #tpu.memory_space<vmem>>, vector<128x128xf32>
    %c0_2 = arith.constant 0 : index
    %c0_3 = arith.constant 0 : index
    %4 = vector.load %arg3[%c0_2, %c0_3] : memref<128x128xbf16, #tpu.memory_space<vmem>>, vector<128x128xbf16>
    %c0_4 = arith.constant 0 : index
    %c0_5 = arith.constant 0 : index
    %5 = vector.load %arg4[%c0_4, %c0_5] : memref<128x128xbf16, #tpu.memory_space<vmem>>, vector<128x128xbf16>
    %cst = arith.constant dense<0.000000e+00> : vector<128x128xf32>
    %6 = tpu.matmul %4, %5, %cst {dimension_numbers = #tpu.dot_dimension_numbers<[1], [0], [0], [1], [0, 0, 1, 1], [], []>} : vector<128x128xbf16>, vector<128x128xbf16>, vector<128x128xf32> -> vector<128x128xf32>
    %7 = arith.addf %3, %6 : vector<128x128xf32>
    %c0_6 = arith.constant 0 : index
    %c0_7 = arith.constant 0 : index
    %8 = vector.load %arg9[%c0_6, %c0_7] : memref<128x128xf32, #tpu.memory_space<vmem>>, vector<128x128xf32>
    tpu.vector_store %arg9[%c0_6, %c0_7], %7 {strides = array<i32>} : memref<128x128xf32, #tpu.memory_space<vmem>>, vector<128x128xf32>,
    %c0_i32_8 = arith.constant 0 : i32
    %9 = arith.cmpi eq, %arg2, %c0_i32_8 : i32
    %10 = arith.extui %9 : i1 to i32
    %c0_i32_9 = arith.constant 0 : i32
    %11 = arith.cmpi ne, %10, %c0_i32_9 : i32
    scf.if %11 {
      %c0_10 = arith.constant 0 : index
      %c0_11 = arith.constant 0 : index
      %12 = vector.load %arg9[%c0_10, %c0_11] : memref<128x128xf32, #tpu.memory_space<vmem>>, vector<128x128xf32>
      %c0_12 = arith.constant 0 : index
      %c0_13 = arith.constant 0 : index
      %13 = vector.load %arg5[%c0_12, %c0_13] : memref<1x128xf32, #tpu.memory_space<vmem>>, vector<1x128xf32>
      %14 = vector.broadcast %13 : vector<1x128xf32> to vector<128x128xf32>
      %15 = arith.addf %12, %14 : vector<128x128xf32>
      %cst_14 = arith.constant 0.000000e+00 : f32
      %16 = vector.broadcast %cst_14 : f32 to vector<128x128xf32>
      %17 = arith.maximumf %15, %16 : vector<128x128xf32>
      %c0_15 = arith.constant 0 : index
      %c0_16 = arith.constant 0 : index
      %18 = vector.load %arg6[%c0_15, %c0_16] : memref<1x128xf32, #tpu.memory_space<vmem>>, vector<1x128xf32>
      %19 = vector.broadcast %18 : vector<1x128xf32> to vector<128x128xf32>
      %20 = arith.mulf %17, %19 : vector<128x128xf32>
      %c0_17 = arith.constant 0 : index
      %c0_18 = arith.constant 0 : index
      %21 = vector.load %arg7[%c0_17, %c0_18] : memref<1x128xf32, #tpu.memory_space<vmem>>, vector<1x128xf32>
      %22 = vector.broadcast %21 : vector<1x128xf32> to vector<128x128xf32>
      %23 = arith.addf %20, %22 : vector<128x128xf32>
      %24 = arith.truncf %23 : vector<128x128xf32> to vector<128x128xbf16>
      %c0_19 = arith.constant 0 : index
      %c0_20 = arith.constant 0 : index
      %25 = vector.load %arg8[%c0_19, %c0_20] : memref<128x128xbf16, #tpu.memory_space<vmem>>, vector<128x128xbf16>
      tpu.vector_store %arg8[%c0_19, %c0_20], %24 {strides = array<i32>} : memref<128x128xbf16, #tpu.memory_space<vmem>>, vector<128x128xbf16>,
    } else {
    }
    return
  }
  func.func @transform_0(%arg0: i32, %arg1: i32, %arg2: i32) -> (i32, i32) {
    %c0_i32 = arith.constant 0 : i32
    return %arg0, %arg2 : i32, i32
  }
  func.func @transform_1(%arg0: i32, %arg1: i32, %arg2: i32) -> (i32, i32) {
    %c0_i32 = arith.constant 0 : i32
    return %arg2, %arg1 : i32, i32
  }
  func.func @transform_2(%arg0: i32, %arg1: i32, %arg2: i32) -> (i32, i32) {
    %c0_i32 = arith.constant 0 : i32
    %c0_i32_0 = arith.constant 0 : i32
    return %c0_i32, %arg1 : i32, i32
  }
  func.func @transform_3(%arg0: i32, %arg1: i32, %arg2: i32) -> (i32, i32) {
    %c0_i32 = arith.constant 0 : i32
    %c0_i32_0 = arith.constant 0 : i32
    return %c0_i32, %arg1 : i32, i32
  }
  func.func @transform_4(%arg0: i32, %arg1: i32, %arg2: i32) -> (i32, i32) {
    %c0_i32 = arith.constant 0 : i32
    %c0_i32_0 = arith.constant 0 : i32
    return %c0_i32, %arg1 : i32, i32
  }
  func.func @transform_5(%arg0: i32, %arg1: i32, %arg2: i32) -> (i32, i32) {
    %c0_i32 = arith.constant 0 : i32
    return %arg0, %arg1 : i32, i32
  }
}

module attributes {stable_mosaic.version = 11 : i64} {
  func.func @_fused_matmul_kernel(%arg0: i32, %arg1: i32, %arg2: i32, %arg3: memref<16x256xbf16, #tpu.memory_space<vmem>>, %arg4: memref<256x128xbf16, #tpu.memory_space<vmem>>, %arg5: memref<1x128xf32, #tpu.memory_space<vmem>>, %arg6: memref<1x128xf32, #tpu.memory_space<vmem>>, %arg7: memref<1x128xf32, #tpu.memory_space<vmem>>, %arg8: memref<16x128xf32, #tpu.memory_space<vmem>>, %arg9: memref<16x128xf32, #tpu.memory_space<vmem>>) attributes {dimension_semantics = [#tpu.dimension_semantics<parallel>, #tpu.dimension_semantics<parallel>, #tpu.dimension_semantics<arbitrary>], iteration_bounds = array<i64: 1, 1, 2>, scalar_prefetch = 0 : i64, scratch_operands = 1 : i64, tpu.core_type = #tpu.core_type<tc>, window_params = [{transform_indices = @transform_0, window_bounds = array<i64: 16, 256>}, {transform_indices = @transform_1, window_bounds = array<i64: 256, 128>}, {transform_indices = @transform_2, window_bounds = array<i64: 1, 128>}, {transform_indices = @transform_3, window_bounds = array<i64: 1, 128>}, {transform_indices = @transform_4, window_bounds = array<i64: 1, 128>}, {transform_indices = @transform_5, window_bounds = array<i64: 16, 128>}]} {
    %c0_i32 = arith.constant 0 : i32
    %0 = arith.cmpi eq, %arg2, %c0_i32 : i32
    %1 = arith.extui %0 : i1 to i32
    %c0_i32_0 = arith.constant 0 : i32
    %2 = arith.cmpi ne, %1, %c0_i32_0 : i32
    scf.if %2 {
      %cst_9 = arith.constant 0.000000e+00 : f32
      %12 = vector.broadcast %cst_9 : f32 to vector<16x128xf32>
      %c0_10 = arith.constant 0 : index
      %c0_11 = arith.constant 0 : index
      %13 = vector.load %arg9[%c0_10, %c0_11] : memref<16x128xf32, #tpu.memory_space<vmem>>, vector<16x128xf32>
      tpu.vector_store %arg9[%c0_10, %c0_11], %12 {strides = array<i32>} : memref<16x128xf32, #tpu.memory_space<vmem>>, vector<16x128xf32>,
    } else {
    }
    %c0 = arith.constant 0 : index
    %c0_1 = arith.constant 0 : index
    %3 = vector.load %arg9[%c0, %c0_1] : memref<16x128xf32, #tpu.memory_space<vmem>>, vector<16x128xf32>
    %c0_2 = arith.constant 0 : index
    %c0_3 = arith.constant 0 : index
    %4 = vector.load %arg3[%c0_2, %c0_3] : memref<16x256xbf16, #tpu.memory_space<vmem>>, vector<16x256xbf16>
    %c0_4 = arith.constant 0 : index
    %c0_5 = arith.constant 0 : index
    %5 = vector.load %arg4[%c0_4, %c0_5] : memref<256x128xbf16, #tpu.memory_space<vmem>>, vector<256x128xbf16>
    %cst = arith.constant dense<0.000000e+00> : vector<16x128xf32>
    %6 = tpu.matmul %4, %5, %cst {dimension_numbers = #tpu.dot_dimension_numbers<[1], [0], [0], [1], [0, 0, 1, 1], [], []>} : vector<16x256xbf16>, vector<256x128xbf16>, vector<16x128xf32> -> vector<16x128xf32>
    %7 = arith.addf %3, %6 : vector<16x128xf32>
    %c0_6 = arith.constant 0 : index
    %c0_7 = arith.constant 0 : index
    %8 = vector.load %arg9[%c0_6, %c0_7] : memref<16x128xf32, #tpu.memory_space<vmem>>, vector<16x128xf32>
    tpu.vector_store %arg9[%c0_6, %c0_7], %7 {strides = array<i32>} : memref<16x128xf32, #tpu.memory_space<vmem>>, vector<16x128xf32>,
    %c1_i32 = arith.constant 1 : i32
    %9 = arith.cmpi eq, %arg2, %c1_i32 : i32
    %10 = arith.extui %9 : i1 to i32
    %c0_i32_8 = arith.constant 0 : i32
    %11 = arith.cmpi ne, %10, %c0_i32_8 : i32
    scf.if %11 {
      %c0_9 = arith.constant 0 : index
      %c0_10 = arith.constant 0 : index
      %12 = vector.load %arg9[%c0_9, %c0_10] : memref<16x128xf32, #tpu.memory_space<vmem>>, vector<16x128xf32>
      %c0_11 = arith.constant 0 : index
      %c0_12 = arith.constant 0 : index
      %13 = vector.load %arg5[%c0_11, %c0_12] : memref<1x128xf32, #tpu.memory_space<vmem>>, vector<1x128xf32>
      %14 = vector.broadcast %13 : vector<1x128xf32> to vector<16x128xf32>
      %15 = arith.addf %12, %14 : vector<16x128xf32>
      %c0_13 = arith.constant 0 : index
      %c0_14 = arith.constant 0 : index
      %16 = vector.load %arg6[%c0_13, %c0_14] : memref<1x128xf32, #tpu.memory_space<vmem>>, vector<1x128xf32>
      %17 = vector.broadcast %16 : vector<1x128xf32> to vector<16x128xf32>
      %18 = arith.mulf %15, %17 : vector<16x128xf32>
      %c0_15 = arith.constant 0 : index
      %c0_16 = arith.constant 0 : index
      %19 = vector.load %arg7[%c0_15, %c0_16] : memref<1x128xf32, #tpu.memory_space<vmem>>, vector<1x128xf32>
      %20 = vector.broadcast %19 : vector<1x128xf32> to vector<16x128xf32>
      %21 = arith.addf %18, %20 : vector<16x128xf32>
      %c0_17 = arith.constant 0 : index
      %c0_18 = arith.constant 0 : index
      %22 = vector.load %arg8[%c0_17, %c0_18] : memref<16x128xf32, #tpu.memory_space<vmem>>, vector<16x128xf32>
      tpu.vector_store %arg8[%c0_17, %c0_18], %21 {strides = array<i32>} : memref<16x128xf32, #tpu.memory_space<vmem>>, vector<16x128xf32>,
    } else {
    }
    return
  }
  func.func @transform_0(%arg0: i32, %arg1: i32, %arg2: i32) -> (i32, i32) {
    %c0_i32 = arith.constant 0 : i32
    return %arg0, %arg2 : i32, i32
  }
  func.func @transform_1(%arg0: i32, %arg1: i32, %arg2: i32) -> (i32, i32) {
    %c0_i32 = arith.constant 0 : i32
    return %arg2, %arg1 : i32, i32
  }
  func.func @transform_2(%arg0: i32, %arg1: i32, %arg2: i32) -> (i32, i32) {
    %c0_i32 = arith.constant 0 : i32
    %c0_i32_0 = arith.constant 0 : i32
    return %c0_i32, %arg1 : i32, i32
  }
  func.func @transform_3(%arg0: i32, %arg1: i32, %arg2: i32) -> (i32, i32) {
    %c0_i32 = arith.constant 0 : i32
    %c0_i32_0 = arith.constant 0 : i32
    return %c0_i32, %arg1 : i32, i32
  }
  func.func @transform_4(%arg0: i32, %arg1: i32, %arg2: i32) -> (i32, i32) {
    %c0_i32 = arith.constant 0 : i32
    %c0_i32_0 = arith.constant 0 : i32
    return %c0_i32, %arg1 : i32, i32
  }
  func.func @transform_5(%arg0: i32, %arg1: i32, %arg2: i32) -> (i32, i32) {
    %c0_i32 = arith.constant 0 : i32
    return %arg0, %arg1 : i32, i32
  }
}

module attributes {stable_mosaic.version = 11 : i64} {
  func.func @_fused_matmul_kernel(%arg0: i32, %arg1: i32, %arg2: i32, %arg3: memref<16x128xbf16, #tpu.memory_space<vmem>>, %arg4: memref<128x512xbf16, #tpu.memory_space<vmem>>, %arg5: memref<1x512xf32, #tpu.memory_space<vmem>>, %arg6: memref<1x512xf32, #tpu.memory_space<vmem>>, %arg7: memref<1x512xf32, #tpu.memory_space<vmem>>, %arg8: memref<16x512xbf16, #tpu.memory_space<vmem>>, %arg9: memref<16x512xf32, #tpu.memory_space<vmem>>) attributes {dimension_semantics = [#tpu.dimension_semantics<parallel>, #tpu.dimension_semantics<parallel>, #tpu.dimension_semantics<arbitrary>], iteration_bounds = array<i64: 1, 1, 1>, scalar_prefetch = 0 : i64, scratch_operands = 1 : i64, tpu.core_type = #tpu.core_type<tc>, window_params = [{transform_indices = @transform_0, window_bounds = array<i64: 16, 128>}, {transform_indices = @transform_1, window_bounds = array<i64: 128, 512>}, {transform_indices = @transform_2, window_bounds = array<i64: 1, 512>}, {transform_indices = @transform_3, window_bounds = array<i64: 1, 512>}, {transform_indices = @transform_4, window_bounds = array<i64: 1, 512>}, {transform_indices = @transform_5, window_bounds = array<i64: 16, 512>}]} {
    %c0_i32 = arith.constant 0 : i32
    %0 = arith.cmpi eq, %arg2, %c0_i32 : i32
    %1 = arith.extui %0 : i1 to i32
    %c0_i32_0 = arith.constant 0 : i32
    %2 = arith.cmpi ne, %1, %c0_i32_0 : i32
    scf.if %2 {
      %cst_10 = arith.constant 0.000000e+00 : f32
      %12 = vector.broadcast %cst_10 : f32 to vector<16x512xf32>
      %c0_11 = arith.constant 0 : index
      %c0_12 = arith.constant 0 : index
      %13 = vector.load %arg9[%c0_11, %c0_12] : memref<16x512xf32, #tpu.memory_space<vmem>>, vector<16x512xf32>
      tpu.vector_store %arg9[%c0_11, %c0_12], %12 {strides = array<i32>} : memref<16x512xf32, #tpu.memory_space<vmem>>, vector<16x512xf32>,
    } else {
    }
    %c0 = arith.constant 0 : index
    %c0_1 = arith.constant 0 : index
    %3 = vector.load %arg9[%c0, %c0_1] : memref<16x512xf32, #tpu.memory_space<vmem>>, vector<16x512xf32>
    %c0_2 = arith.constant 0 : index
    %c0_3 = arith.constant 0 : index
    %4 = vector.load %arg3[%c0_2, %c0_3] : memref<16x128xbf16, #tpu.memory_space<vmem>>, vector<16x128xbf16>
    %c0_4 = arith.constant 0 : index
    %c0_5 = arith.constant 0 : index
    %5 = vector.load %arg4[%c0_4, %c0_5] : memref<128x512xbf16, #tpu.memory_space<vmem>>, vector<128x512xbf16>
    %cst = arith.constant dense<0.000000e+00> : vector<16x512xf32>
    %6 = tpu.matmul %4, %5, %cst {dimension_numbers = #tpu.dot_dimension_numbers<[1], [0], [0], [1], [0, 0, 1, 1], [], []>} : vector<16x128xbf16>, vector<128x512xbf16>, vector<16x512xf32> -> vector<16x512xf32>
    %7 = arith.addf %3, %6 : vector<16x512xf32>
    %c0_6 = arith.constant 0 : index
    %c0_7 = arith.constant 0 : index
    %8 = vector.load %arg9[%c0_6, %c0_7] : memref<16x512xf32, #tpu.memory_space<vmem>>, vector<16x512xf32>
    tpu.vector_store %arg9[%c0_6, %c0_7], %7 {strides = array<i32>} : memref<16x512xf32, #tpu.memory_space<vmem>>, vector<16x512xf32>,
    %c0_i32_8 = arith.constant 0 : i32
    %9 = arith.cmpi eq, %arg2, %c0_i32_8 : i32
    %10 = arith.extui %9 : i1 to i32
    %c0_i32_9 = arith.constant 0 : i32
    %11 = arith.cmpi ne, %10, %c0_i32_9 : i32
    scf.if %11 {
      %c0_10 = arith.constant 0 : index
      %c0_11 = arith.constant 0 : index
      %12 = vector.load %arg9[%c0_10, %c0_11] : memref<16x512xf32, #tpu.memory_space<vmem>>, vector<16x512xf32>
      %c0_12 = arith.constant 0 : index
      %c0_13 = arith.constant 0 : index
      %13 = vector.load %arg5[%c0_12, %c0_13] : memref<1x512xf32, #tpu.memory_space<vmem>>, vector<1x512xf32>
      %14 = vector.broadcast %13 : vector<1x512xf32> to vector<16x512xf32>
      %15 = arith.addf %12, %14 : vector<16x512xf32>
      %c0_14 = arith.constant 0 : index
      %c0_15 = arith.constant 0 : index
      %16 = vector.load %arg6[%c0_14, %c0_15] : memref<1x512xf32, #tpu.memory_space<vmem>>, vector<1x512xf32>
      %17 = vector.broadcast %16 : vector<1x512xf32> to vector<16x512xf32>
      %18 = arith.mulf %15, %17 : vector<16x512xf32>
      %c0_16 = arith.constant 0 : index
      %c0_17 = arith.constant 0 : index
      %19 = vector.load %arg7[%c0_16, %c0_17] : memref<1x512xf32, #tpu.memory_space<vmem>>, vector<1x512xf32>
      %20 = vector.broadcast %19 : vector<1x512xf32> to vector<16x512xf32>
      %21 = arith.addf %18, %20 : vector<16x512xf32>
      %22 = arith.truncf %21 : vector<16x512xf32> to vector<16x512xbf16>
      %c0_18 = arith.constant 0 : index
      %c0_19 = arith.constant 0 : index
      %23 = vector.load %arg8[%c0_18, %c0_19] : memref<16x512xbf16, #tpu.memory_space<vmem>>, vector<16x512xbf16>
      tpu.vector_store %arg8[%c0_18, %c0_19], %22 {strides = array<i32>} : memref<16x512xbf16, #tpu.memory_space<vmem>>, vector<16x512xbf16>,
    } else {
    }
    return
  }
  func.func @transform_0(%arg0: i32, %arg1: i32, %arg2: i32) -> (i32, i32) {
    %c0_i32 = arith.constant 0 : i32
    return %arg0, %arg2 : i32, i32
  }
  func.func @transform_1(%arg0: i32, %arg1: i32, %arg2: i32) -> (i32, i32) {
    %c0_i32 = arith.constant 0 : i32
    return %arg2, %arg1 : i32, i32
  }
  func.func @transform_2(%arg0: i32, %arg1: i32, %arg2: i32) -> (i32, i32) {
    %c0_i32 = arith.constant 0 : i32
    %c0_i32_0 = arith.constant 0 : i32
    return %c0_i32, %arg1 : i32, i32
  }
  func.func @transform_3(%arg0: i32, %arg1: i32, %arg2: i32) -> (i32, i32) {
    %c0_i32 = arith.constant 0 : i32
    %c0_i32_0 = arith.constant 0 : i32
    return %c0_i32, %arg1 : i32, i32
  }
  func.func @transform_4(%arg0: i32, %arg1: i32, %arg2: i32) -> (i32, i32) {
    %c0_i32 = arith.constant 0 : i32
    %c0_i32_0 = arith.constant 0 : i32
    return %c0_i32, %arg1 : i32, i32
  }
  func.func @transform_5(%arg0: i32, %arg1: i32, %arg2: i32) -> (i32, i32) {
    %c0_i32 = arith.constant 0 : i32
    return %arg0, %arg1 : i32, i32
  }
}

module attributes {stable_mosaic.version = 11 : i64} {
  func.func @_fused_matmul_kernel(%arg0: i32, %arg1: i32, %arg2: i32, %arg3: memref<256x128xbf16, #tpu.memory_space<vmem>>, %arg4: memref<128x128xbf16, #tpu.memory_space<vmem>>, %arg5: memref<1x128xf32, #tpu.memory_space<vmem>>, %arg6: memref<1x128xf32, #tpu.memory_space<vmem>>, %arg7: memref<1x128xf32, #tpu.memory_space<vmem>>, %arg8: memref<256x128xf32, #tpu.memory_space<vmem>>, %arg9: memref<256x128xf32, #tpu.memory_space<vmem>>) attributes {dimension_semantics = [#tpu.dimension_semantics<parallel>, #tpu.dimension_semantics<parallel>, #tpu.dimension_semantics<arbitrary>], iteration_bounds = array<i64: 2, 1, 1>, scalar_prefetch = 0 : i64, scratch_operands = 1 : i64, tpu.core_type = #tpu.core_type<tc>, window_params = [{transform_indices = @transform_0, window_bounds = array<i64: 256, 128>}, {transform_indices = @transform_1, window_bounds = array<i64: 128, 128>}, {transform_indices = @transform_2, window_bounds = array<i64: 1, 128>}, {transform_indices = @transform_3, window_bounds = array<i64: 1, 128>}, {transform_indices = @transform_4, window_bounds = array<i64: 1, 128>}, {transform_indices = @transform_5, window_bounds = array<i64: 256, 128>}]} {
    %c0_i32 = arith.constant 0 : i32
    %0 = arith.cmpi eq, %arg2, %c0_i32 : i32
    %1 = arith.extui %0 : i1 to i32
    %c0_i32_0 = arith.constant 0 : i32
    %2 = arith.cmpi ne, %1, %c0_i32_0 : i32
    scf.if %2 {
      %cst_10 = arith.constant 0.000000e+00 : f32
      %12 = vector.broadcast %cst_10 : f32 to vector<256x128xf32>
      %c0_11 = arith.constant 0 : index
      %c0_12 = arith.constant 0 : index
      %13 = vector.load %arg9[%c0_11, %c0_12] : memref<256x128xf32, #tpu.memory_space<vmem>>, vector<256x128xf32>
      tpu.vector_store %arg9[%c0_11, %c0_12], %12 {strides = array<i32>} : memref<256x128xf32, #tpu.memory_space<vmem>>, vector<256x128xf32>,
    } else {
    }
    %c0 = arith.constant 0 : index
    %c0_1 = arith.constant 0 : index
    %3 = vector.load %arg9[%c0, %c0_1] : memref<256x128xf32, #tpu.memory_space<vmem>>, vector<256x128xf32>
    %c0_2 = arith.constant 0 : index
    %c0_3 = arith.constant 0 : index
    %4 = vector.load %arg3[%c0_2, %c0_3] : memref<256x128xbf16, #tpu.memory_space<vmem>>, vector<256x128xbf16>
    %c0_4 = arith.constant 0 : index
    %c0_5 = arith.constant 0 : index
    %5 = vector.load %arg4[%c0_4, %c0_5] : memref<128x128xbf16, #tpu.memory_space<vmem>>, vector<128x128xbf16>
    %cst = arith.constant dense<0.000000e+00> : vector<256x128xf32>
    %6 = tpu.matmul %4, %5, %cst {dimension_numbers = #tpu.dot_dimension_numbers<[1], [0], [0], [1], [0, 0, 1, 1], [], []>} : vector<256x128xbf16>, vector<128x128xbf16>, vector<256x128xf32> -> vector<256x128xf32>
    %7 = arith.addf %3, %6 : vector<256x128xf32>
    %c0_6 = arith.constant 0 : index
    %c0_7 = arith.constant 0 : index
    %8 = vector.load %arg9[%c0_6, %c0_7] : memref<256x128xf32, #tpu.memory_space<vmem>>, vector<256x128xf32>
    tpu.vector_store %arg9[%c0_6, %c0_7], %7 {strides = array<i32>} : memref<256x128xf32, #tpu.memory_space<vmem>>, vector<256x128xf32>,
    %c0_i32_8 = arith.constant 0 : i32
    %9 = arith.cmpi eq, %arg2, %c0_i32_8 : i32
    %10 = arith.extui %9 : i1 to i32
    %c0_i32_9 = arith.constant 0 : i32
    %11 = arith.cmpi ne, %10, %c0_i32_9 : i32
    scf.if %11 {
      %c0_10 = arith.constant 0 : index
      %c0_11 = arith.constant 0 : index
      %12 = vector.load %arg9[%c0_10, %c0_11] : memref<256x128xf32, #tpu.memory_space<vmem>>, vector<256x128xf32>
      %c0_12 = arith.constant 0 : index
      %c0_13 = arith.constant 0 : index
      %13 = vector.load %arg5[%c0_12, %c0_13] : memref<1x128xf32, #tpu.memory_space<vmem>>, vector<1x128xf32>
      %14 = vector.broadcast %13 : vector<1x128xf32> to vector<256x128xf32>
      %15 = arith.addf %12, %14 : vector<256x128xf32>
      %c0_14 = arith.constant 0 : index
      %c0_15 = arith.constant 0 : index
      %16 = vector.load %arg6[%c0_14, %c0_15] : memref<1x128xf32, #tpu.memory_space<vmem>>, vector<1x128xf32>
      %17 = vector.broadcast %16 : vector<1x128xf32> to vector<256x128xf32>
      %18 = arith.mulf %15, %17 : vector<256x128xf32>
      %c0_16 = arith.constant 0 : index
      %c0_17 = arith.constant 0 : index
      %19 = vector.load %arg7[%c0_16, %c0_17] : memref<1x128xf32, #tpu.memory_space<vmem>>, vector<1x128xf32>
      %20 = vector.broadcast %19 : vector<1x128xf32> to vector<256x128xf32>
      %21 = arith.addf %18, %20 : vector<256x128xf32>
      %22 = arith.negf %21 : vector<256x128xf32>
      %23 = math.exp %22 : vector<256x128xf32>
      %cst_18 = arith.constant 1.000000e+00 : f32
      %24 = vector.broadcast %cst_18 : f32 to vector<256x128xf32>
      %25 = arith.addf %24, %23 : vector<256x128xf32>
      %26 = arith.divf %24, %25 : vector<256x128xf32>
      %c0_19 = arith.constant 0 : index
      %c0_20 = arith.constant 0 : index
      %27 = vector.load %arg8[%c0_19, %c0_20] : memref<256x128xf32, #tpu.memory_space<vmem>>, vector<256x128xf32>
      tpu.vector_store %arg8[%c0_19, %c0_20], %26 {strides = array<i32>} : memref<256x128xf32, #tpu.memory_space<vmem>>, vector<256x128xf32>,
    } else {
    }
    return
  }
  func.func @transform_0(%arg0: i32, %arg1: i32, %arg2: i32) -> (i32, i32) {
    %c0_i32 = arith.constant 0 : i32
    return %arg0, %arg2 : i32, i32
  }
  func.func @transform_1(%arg0: i32, %arg1: i32, %arg2: i32) -> (i32, i32) {
    %c0_i32 = arith.constant 0 : i32
    return %arg2, %arg1 : i32, i32
  }
  func.func @transform_2(%arg0: i32, %arg1: i32, %arg2: i32) -> (i32, i32) {
    %c0_i32 = arith.constant 0 : i32
    %c0_i32_0 = arith.constant 0 : i32
    return %c0_i32, %arg1 : i32, i32
  }
  func.func @transform_3(%arg0: i32, %arg1: i32, %arg2: i32) -> (i32, i32) {
    %c0_i32 = arith.constant 0 : i32
    %c0_i32_0 = arith.constant 0 : i32
    return %c0_i32, %arg1 : i32, i32
  }
  func.func @transform_4(%arg0: i32, %arg1: i32, %arg2: i32) -> (i32, i32) {
    %c0_i32 = arith.constant 0 : i32
    %c0_i32_0 = arith.constant 0 : i32
    return %c0_i32, %arg1 : i32, i32
  }
  func.func @transform_5(%arg0: i32, %arg1: i32, %arg2: i32) -> (i32, i32) {
    %c0_i32 = arith.constant 0 : i32
    return %arg0, %arg1 : i32, i32
  }
}

</mosaic_0001>

<bundles_post_ra>
// kernel: vae_forward.6
= control target key start
LH: loop header
LB: loop body
LE: loop exit
PB: predicated region body
PF: predicated region fallthrough
CT: control target
= control target key end

     0   :  { %s1463_s18 = smov 0   ;;  %s1465_s19 = smov 0   ;;  %s1677_s0 = inlined_call_operand.vmem [shape: bf16[512,128], index: 0, kind: input, shape index: {}]   ;;  %s1678_s1 = inlined_call_operand.vmem [shape: bf16[128,128], index: 1, kind: input, shape index: {}]   ;;  %s1679_s2 = inlined_call_operand.vmem [shape: f32[1,128], index: 2, kind: input, shape index: {}]   ;;  %s1680_s3 = inlined_call_operand.vmem [shape: f32[1,128], index: 3, kind: input, shape index: {}]   ;;  %s1681_s4 = inlined_call_operand.vmem [shape: f32[1,128], index: 4, kind: input, shape index: {}]   ;;  %s1682_s5 = inlined_call_operand.vmem [shape: bf16[512,128], index: 5, kind: output, shape index: {}]  }
   0x1   :  { %s1467_s20 = smov 0  }
   0x2 LB: > { %s34_s21 = sadd.s32 1, %s1427_s19  ;;  %p1136_p0 = scmp.ge.s32.totalorder %s1431_s20, 1  ;;  %s1431_s20 = sphi %s1467_s20, %s15_s20   ;;  %s1427_s19 = sphi %s1465_s19, %s1684_s19   ;;  %s1423_s18 = sphi %s1463_s18, %s1683_s18  }
   0x3   : > { %p36_p1 = scmp.ge.s32.totalorder %s34_s21, 2  ;;  %p254_p2 = scmp.lt.s32.totalorder %s1431_s20, 3 }
   0x5   : > { %s1686_s21 = smov (%p36_p1, %s34_s21), 0  ;;  %p255_p3 = pnand %p1136_p0, %p254_p2 }
   0x6   : > { %s1137_s30 = sshll.u32 (!%p255_p3), %s1423_s18, 5 }
   0x7   : > { %258 = sbr.rel (%p255_p3) target bundleno = 245 (0xf5), region = 40  ;;  %p306_p4 = scmp.lt.s32.totalorder (!%p255_p3), %s1137_s30, 63 }
   0xc   : > { %v1262_v0 = vld [vmem:[%s1678_s1 + $0x38] sm:$0xff]  ;;  %v1261_v1 = vld [vmem:[%s1678_s1 + $0x30] sm:$0xff]  ;;  %v1260_v2 = vld [vmem:[%s1678_s1 + $0x28] sm:$0xff]  ;;  %s1688_s30 = smov (!%p306_p4, %s1137_s30), 63 }
   0xd   : > { %601 = vmatpush.bf16.msra.mxu0 %v1262_v0  ;;  %1358 = vmatpush.bf16.msra.mxu1 %v1262_v0  ;;  %v1259_v3 = vld [vmem:[%s1678_s1 + $0x20] sm:$0xff]  ;;  %v1258_v4 = vld [vmem:[%s1678_s1 + $0x18] sm:$0xff]  ;;  %v1257_v5 = vld [vmem:[%s1678_s1 + $0x10] sm:$0xff]  ;;  %s1138_s12 = sshll.u32 %s1688_s30, 2 }
   0xe   : > { %1359 = vmatpush.bf16.msra.mxu2 %v1262_v0  ;;  %1360 = vmatpush.bf16.msra.mxu3 %v1262_v0  ;;  %v1256_v6 = vld [vmem:[%s1678_s1 + $0x8] sm:$0xff]  ;;  %v1255_v7 = vld [vmem:[%s1678_s1] sm:$0xff]  ;;  %s1516_s17 = scalar_lea.vmem %s1677_s0, %s1138_s12  ;;  %s1568_s29 = scalar_lea.vmem %s1682_s5, %s1138_s12 }
   0xf   : > { %v1239_v8 = vld [vmem:[%s1516_s17] sm:$0xff]  ;;  %v1240_v12 = vld [vmem:[%s1516_s17 + $0x8] sm:$0xff]  ;;  %v1241_v16 = vld [vmem:[%s1516_s17 + $0x10] sm:$0xff] }
  0x10   : > { %v1243_v9 = vld [vmem:[%s1516_s17 + $0x20] sm:$0xff]  ;;  %v1244_v13 = vld [vmem:[%s1516_s17 + $0x28] sm:$0xff]  ;;  %v1245_v17 = vld [vmem:[%s1516_s17 + $0x30] sm:$0xff] }
  0x11   : > { %602 = vmatpush.bf16.msra.mxu0 %v1261_v1  ;;  %1361 = vmatpush.bf16.msra.mxu1 %v1261_v1  ;;  %v1247_v10 = vld [vmem:[%s1516_s17 + $0x40] sm:$0xff]  ;;  %v1248_v14 = vld [vmem:[%s1516_s17 + $0x48] sm:$0xff]  ;;  %v1249_v18 = vld [vmem:[%s1516_s17 + $0x50] sm:$0xff] }
  0x12   : > { %1362 = vmatpush.bf16.msra.mxu2 %v1261_v1  ;;  %1363 = vmatpush.bf16.msra.mxu3 %v1261_v1  ;;  %v1251_v11 = vld [vmem:[%s1516_s17 + $0x60] sm:$0xff]  ;;  %v1252_v15 = vld [vmem:[%s1516_s17 + $0x68] sm:$0xff]  ;;  %v1253_v19 = vld [vmem:[%s1516_s17 + $0x70] sm:$0xff] }
  0x13   : > { %v1242_v20 = vld [vmem:[%s1516_s17 + $0x18] sm:$0xff]  ;;  %v1537_v24 = vld [vmem:[%s1679_s2] ss:$0 sm:$0xff] }
  0x14   : > { %v1246_v21 = vld [vmem:[%s1516_s17 + $0x38] sm:$0xff]  ;;  %v1544_v30 = vld [vmem:[%s1680_s3] ss:$0 sm:$0xff] }
  0x15   : > { %603 = vmatpush.bf16.msra.mxu0 %v1260_v2  ;;  %1364 = vmatpush.bf16.msra.mxu1 %v1260_v2  ;;  %v1250_v22 = vld [vmem:[%s1516_s17 + $0x58] sm:$0xff]  ;;  %v1554_v41 = vld [vmem:[%s1681_s4] ss:$0 sm:$0xff] }
  0x16   : > { %1365 = vmatpush.bf16.msra.mxu2 %v1260_v2  ;;  %1366 = vmatpush.bf16.msra.mxu3 %v1260_v2  ;;  %v1254_v23 = vld [vmem:[%s1516_s17 + $0x78] sm:$0xff] }
  0x19   : > { %604 = vmatpush.bf16.msra.mxu0 %v1259_v3  ;;  %1367 = vmatpush.bf16.msra.mxu1 %v1259_v3 }
  0x1a   : > { %1368 = vmatpush.bf16.msra.mxu2 %v1259_v3  ;;  %1369 = vmatpush.bf16.msra.mxu3 %v1259_v3 }
  0x1d   : > { %605 = vmatpush.bf16.msra.mxu0 %v1258_v4  ;;  %1370 = vmatpush.bf16.msra.mxu1 %v1258_v4 }
  0x1e   : > { %1371 = vmatpush.bf16.msra.mxu2 %v1258_v4  ;;  %1372 = vmatpush.bf16.msra.mxu3 %v1258_v4 }
  0x21   : > { %606 = vmatpush.bf16.msra.mxu0 %v1257_v5  ;;  %1373 = vmatpush.bf16.msra.mxu1 %v1257_v5 }
  0x22   : > { %1374 = vmatpush.bf16.msra.mxu2 %v1257_v5  ;;  %1375 = vmatpush.bf16.msra.mxu3 %v1257_v5 }
  0x25   : > { %607 = vmatpush.bf16.msra.mxu0 %v1256_v6  ;;  %1376 = vmatpush.bf16.msra.mxu1 %v1256_v6 }
  0x26   : > { %1377 = vmatpush.bf16.msra.mxu2 %v1256_v6  ;;  %1378 = vmatpush.bf16.msra.mxu3 %v1256_v6 }
  0x29   : > { %608 = vmatpush.bf16.msra.mxu0 %v1255_v7  ;;  %1379 = vmatpush.bf16.msra.mxu1 %v1255_v7 }
  0x2a   : > { %1380 = vmatpush.bf16.msra.mxu2 %v1255_v7  ;;  %1381 = vmatpush.bf16.msra.mxu3 %v1255_v7 }
  0x2c   : > { %609 = vmatmul.bf16.vlgmr.msra.gmra.mxu0 %v1239_v8  ;;  %629 = vmatmul.bf16.vlgmr.msra.gmra.mxu1 %v1243_v9 }
  0x2d   : > { %649 = vmatmul.bf16.vlgmr.msra.gmra.mxu2 %v1247_v10  ;;  %669 = vmatmul.bf16.vlgmr.msra.gmra.mxu3 %v1251_v11 }
  0x3c   : > { %614 = vmatmul.bf16.gmra.mxu0 %v1240_v12  ;;  %634 = vmatmul.bf16.gmra.mxu1 %v1244_v13 }
  0x3d   : > { %654 = vmatmul.bf16.gmra.mxu2 %v1248_v14  ;;  %674 = vmatmul.bf16.gmra.mxu3 %v1252_v15 }
  0x4c   : > { %619 = vmatmul.bf16.gmra.mxu0 %v1241_v16  ;;  %639 = vmatmul.bf16.gmra.mxu1 %v1245_v17 }
  0x4d   : > { %659 = vmatmul.bf16.gmra.mxu2 %v1249_v18  ;;  %679 = vmatmul.bf16.gmra.mxu3 %v1253_v19 }
  0x5c   : > { %624 = vmatmul.bf16.gmra.mxu0 %v1242_v20  ;;  %644 = vmatmul.bf16.gmra.mxu1 %v1246_v21 }
  0x5d   : > { %664 = vmatmul.bf16.gmra.mxu2 %v1250_v22  ;;  %684 = vmatmul.bf16.gmra.mxu3 %v1254_v23 }
  0xa9   : > { %v610_v25 = vpop.f32.mrf.mxu0  ;;  %v630_v26 = vpop.f32.mrf.mxu1 }
  0xaa   : > { %v793_v27 = vadd.f32 %v1537_v24, %v610_v25  ;;  %v801_v28 = vadd.f32 %v1537_v24, %v630_v26 }
  0xac   : > { %v825_v29 = vmax.f32 %v793_v27, 0.0  ;;  %v833_v31 = vmax.f32 %v801_v28, 0.0 }
  0xae   : > { %v861_v40 = vmul.f32 %v1544_v30, %v825_v29  ;;  %v869_v42 = vmul.f32 %v1544_v30, %v833_v31 }
  0xb0   : > { %v650_v32 = vpop.f32.mrf.mxu2  ;;  %v670_v33 = vpop.f32.mrf.mxu3  ;;  %v897_v49 = vadd.f32 %v1554_v41, %v861_v40  ;;  %v905_v50 = vadd.f32 %v1554_v41, %v869_v42 }
  0xb1   : > { %v612_v34 = vpop.f32.mrf.mxu0  ;;  %v632_v35 = vpop.f32.mrf.mxu1  ;;  %v809_v38 = vadd.f32 %v1537_v24, %v650_v32  ;;  %v817_v39 = vadd.f32 %v1537_v24, %v670_v33 }
  0xb2   : > { %v794_v36 = vadd.f32 %v1537_v24, %v612_v34  ;;  %v802_v37 = vadd.f32 %v1537_v24, %v632_v35 }
  0xb3   : > { %v841_v47 = vmax.f32 %v809_v38, 0.0  ;;  %v849_v48 = vmax.f32 %v817_v39, 0.0 }
  0xb4   : > { %v826_v43 = vmax.f32 %v794_v36, 0.0  ;;  %v834_v44 = vmax.f32 %v802_v37, 0.0 }
  0xb5   : > { %v877_v61 = vmul.f32 %v1544_v30, %v841_v47  ;;  %v885_v62 = vmul.f32 %v1544_v30, %v849_v48 }
  0xb6   : > { %v862_v45 = vmul.f32 %v1544_v30, %v826_v43  ;;  %v870_v46 = vmul.f32 %v1544_v30, %v834_v44 }
  0xb7   : > { %v913_v5 = vadd.f32 %v1554_v41, %v877_v61  ;;  %v921_v6 = vadd.f32 %v1554_v41, %v885_v62 }
  0xb8   : > { %v898_v51 = vadd.f32 %v1554_v41, %v862_v45  ;;  %v906_v52 = vadd.f32 %v1554_v41, %v870_v46  ;;  %v652_v53 = vpop.f32.mrf.mxu2  ;;  %v672_v54 = vpop.f32.mrf.mxu3 }
  0xb9   : > { %v810_v55 = vadd.f32 %v1537_v24, %v652_v53  ;;  %v818_v56 = vadd.f32 %v1537_v24, %v672_v54  ;;  %v615_v57 = vpop.f32.mrf.mxu0  ;;  %v635_v58 = vpop.f32.mrf.mxu1 }
  0xba   : > { %v1266_v59 = vpack.c.bf16 %v898_v51, %v897_v49  ;;  %v1286_v60 = vpack.c.bf16 %v906_v52, %v905_v50  ;;  %v795_v1 = vadd.f32 %v1537_v24, %v615_v57  ;;  %v803_v2 = vadd.f32 %v1537_v24, %v635_v58 }
  0xbb   : > { %v842_v63 = vmax.f32 %v810_v55, 0.0  ;;  %v850_v0 = vmax.f32 %v818_v56, 0.0 }
  0xbc   : > { %1267 = vst [vmem:[%s1568_s29] sm:$0xff] %v1266_v59   ;;  %v827_v9 = vmax.f32 %v795_v1, 0.0  ;;  %v835_v10 = vmax.f32 %v803_v2, 0.0 }
  0xbd   : > { %1346 = vst [vmem:[%s1568_s29 + $0x20] sm:$0xff] %v1286_v60   ;;  %v878_v3 = vmul.f32 %v1544_v30, %v842_v63  ;;  %v886_v4 = vmul.f32 %v1544_v30, %v850_v0 }
  0xbe   : > { %v863_v21 = vmul.f32 %v1544_v30, %v827_v9  ;;  %v871_v22 = vmul.f32 %v1544_v30, %v835_v10 }
  0xbf   : > { %v914_v7 = vadd.f32 %v1554_v41, %v878_v3  ;;  %v922_v8 = vadd.f32 %v1554_v41, %v886_v4 }
  0xc0   : > { %v655_v11 = vpop.f32.mrf.mxu2  ;;  %v675_v12 = vpop.f32.mrf.mxu3  ;;  %v899_v31 = vadd.f32 %v1554_v41, %v863_v21  ;;  %v907_v32 = vadd.f32 %v1554_v41, %v871_v22 }
  0xc1   : > { %v1306_v13 = vpack.c.bf16 %v914_v7, %v913_v5  ;;  %v1326_v14 = vpack.c.bf16 %v922_v8, %v921_v6  ;;  %v617_v15 = vpop.f32.mrf.mxu0  ;;  %v637_v16 = vpop.f32.mrf.mxu1  ;;  %v811_v19 = vadd.f32 %v1537_v24, %v655_v11  ;;  %v819_v20 = vadd.f32 %v1537_v24, %v675_v12 }
  0xc2   : > { %v796_v17 = vadd.f32 %v1537_v24, %v617_v15  ;;  %v804_v18 = vadd.f32 %v1537_v24, %v637_v16 }
  0xc3   : > { %1350 = vst [vmem:[%s1568_s29 + $0x40] sm:$0xff] %v1306_v13   ;;  %v843_v28 = vmax.f32 %v811_v19, 0.0  ;;  %v851_v29 = vmax.f32 %v819_v20, 0.0 }
  0xc4   : > { %1354 = vst [vmem:[%s1568_s29 + $0x60] sm:$0xff] %v1326_v14   ;;  %v828_v23 = vmax.f32 %v796_v17, 0.0  ;;  %v836_v25 = vmax.f32 %v804_v18, 0.0 }
  0xc5   : > { %v879_v44 = vmul.f32 %v1544_v30, %v843_v28  ;;  %v887_v45 = vmul.f32 %v1544_v30, %v851_v29 }
  0xc6   : > { %v864_v26 = vmul.f32 %v1544_v30, %v828_v23  ;;  %v872_v27 = vmul.f32 %v1544_v30, %v836_v25 }
  0xc7   : > { %v915_v52 = vadd.f32 %v1554_v41, %v879_v44  ;;  %v923_v53 = vadd.f32 %v1554_v41, %v887_v45 }
  0xc8   : > { %v900_v33 = vadd.f32 %v1554_v41, %v864_v26  ;;  %v908_v34 = vadd.f32 %v1554_v41, %v872_v27  ;;  %v657_v35 = vpop.f32.mrf.mxu2  ;;  %v677_v36 = vpop.f32.mrf.mxu3 }
  0xc9   : > { %v812_v37 = vadd.f32 %v1537_v24, %v657_v35  ;;  %v820_v38 = vadd.f32 %v1537_v24, %v677_v36  ;;  %v620_v39 = vpop.f32.mrf.mxu0  ;;  %v640_v40 = vpop.f32.mrf.mxu1 }
  0xca   : > { %v1271_v42 = vpack.c.bf16 %v900_v33, %v899_v31  ;;  %v1291_v43 = vpack.c.bf16 %v908_v34, %v907_v32  ;;  %v797_v48 = vadd.f32 %v1537_v24, %v620_v39  ;;  %v805_v49 = vadd.f32 %v1537_v24, %v640_v40 }
  0xcb   : > { %v844_v46 = vmax.f32 %v812_v37, 0.0  ;;  %v852_v47 = vmax.f32 %v820_v38, 0.0 }
  0xcc   : > { %1343 = vst [vmem:[%s1568_s29 + $0x8] sm:$0xff] %v1271_v42   ;;  %v829_v56 = vmax.f32 %v797_v48, 0.0  ;;  %v837_v57 = vmax.f32 %v805_v49, 0.0 }
  0xcd   : > { %1347 = vst [vmem:[%s1568_s29 + $0x28] sm:$0xff] %v1291_v43   ;;  %v880_v50 = vmul.f32 %v1544_v30, %v844_v46  ;;  %v888_v51 = vmul.f32 %v1544_v30, %v852_v47 }
  0xce   : > { %v865_v4 = vmul.f32 %v1544_v30, %v829_v56  ;;  %v873_v5 = vmul.f32 %v1544_v30, %v837_v57 }
  0xcf   : > { %v916_v54 = vadd.f32 %v1554_v41, %v880_v50  ;;  %v924_v55 = vadd.f32 %v1554_v41, %v888_v51 }
  0xd0   : > { %v660_v58 = vpop.f32.mrf.mxu2  ;;  %v680_v59 = vpop.f32.mrf.mxu3  ;;  %v901_v12 = vadd.f32 %v1554_v41, %v865_v4  ;;  %v909_v13 = vadd.f32 %v1554_v41, %v873_v5 }
  0xd1   : > { %v1311_v60 = vpack.c.bf16 %v916_v54, %v915_v52  ;;  %v1331_v61 = vpack.c.bf16 %v924_v55, %v923_v53  ;;  %v622_v62 = vpop.f32.mrf.mxu0  ;;  %v642_v63 = vpop.f32.mrf.mxu1  ;;  %v813_v2 = vadd.f32 %v1537_v24, %v660_v58  ;;  %v821_v3 = vadd.f32 %v1537_v24, %v680_v59 }
  0xd2   : > { %v798_v0 = vadd.f32 %v1537_v24, %v622_v62  ;;  %v806_v1 = vadd.f32 %v1537_v24, %v642_v63 }
  0xd3   : > { %1351 = vst [vmem:[%s1568_s29 + $0x48] sm:$0xff] %v1311_v60   ;;  %v845_v10 = vmax.f32 %v813_v2, 0.0  ;;  %v853_v11 = vmax.f32 %v821_v3, 0.0 }
  0xd4   : > { %1355 = vst [vmem:[%s1568_s29 + $0x68] sm:$0xff] %v1331_v61   ;;  %v830_v6 = vmax.f32 %v798_v0, 0.0  ;;  %v838_v7 = vmax.f32 %v806_v1, 0.0 }
  0xd5   : > { %v881_v25 = vmul.f32 %v1544_v30, %v845_v10  ;;  %v889_v26 = vmul.f32 %v1544_v30, %v853_v11 }
  0xd6   : > { %v866_v8 = vmul.f32 %v1544_v30, %v830_v6  ;;  %v874_v9 = vmul.f32 %v1544_v30, %v838_v7 }
  0xd7   : > { %v917_v34 = vadd.f32 %v1554_v41, %v881_v25  ;;  %v925_v35 = vadd.f32 %v1554_v41, %v889_v26 }
  0xd8   : > { %v902_v14 = vadd.f32 %v1554_v41, %v866_v8  ;;  %v910_v15 = vadd.f32 %v1554_v41, %v874_v9  ;;  %v662_v16 = vpop.f32.mrf.mxu2  ;;  %v682_v17 = vpop.f32.mrf.mxu3 }
  0xd9   : > { %v814_v18 = vadd.f32 %v1537_v24, %v662_v16  ;;  %v822_v19 = vadd.f32 %v1537_v24, %v682_v17  ;;  %v625_v20 = vpop.f32.mrf.mxu0  ;;  %v645_v21 = vpop.f32.mrf.mxu1 }
  0xda   : > { %v1276_v22 = vpack.c.bf16 %v902_v14, %v901_v12  ;;  %v1296_v23 = vpack.c.bf16 %v910_v15, %v909_v13  ;;  %v799_v29 = vadd.f32 %v1537_v24, %v625_v20  ;;  %v807_v31 = vadd.f32 %v1537_v24, %v645_v21 }
  0xdb   : > { %v846_v27 = vmax.f32 %v814_v18, 0.0  ;;  %v854_v28 = vmax.f32 %v822_v19, 0.0 }
  0xdc   : > { %1344 = vst [vmem:[%s1568_s29 + $0x10] sm:$0xff] %v1276_v22   ;;  %v831_v38 = vmax.f32 %v799_v29, 0.0  ;;  %v839_v39 = vmax.f32 %v807_v31, 0.0 }
  0xdd   : > { %1348 = vst [vmem:[%s1568_s29 + $0x30] sm:$0xff] %v1296_v23   ;;  %v882_v32 = vmul.f32 %v1544_v30, %v846_v27  ;;  %v890_v33 = vmul.f32 %v1544_v30, %v854_v28 }
  0xde   : > { %v867_v51 = vmul.f32 %v1544_v30, %v831_v38  ;;  %v875_v52 = vmul.f32 %v1544_v30, %v839_v39 }
  0xdf   : > { %v918_v36 = vadd.f32 %v1554_v41, %v882_v32  ;;  %v926_v37 = vadd.f32 %v1554_v41, %v890_v33 }
  0xe0   : > { %v665_v40 = vpop.f32.mrf.mxu2  ;;  %v685_v42 = vpop.f32.mrf.mxu3  ;;  %v903_v59 = vadd.f32 %v1554_v41, %v867_v51  ;;  %v911_v60 = vadd.f32 %v1554_v41, %v875_v52 }
  0xe1   : > { %v1316_v43 = vpack.c.bf16 %v918_v36, %v917_v34  ;;  %v1336_v44 = vpack.c.bf16 %v926_v37, %v925_v35  ;;  %v627_v45 = vpop.f32.mrf.mxu0  ;;  %v647_v46 = vpop.f32.mrf.mxu1  ;;  %v815_v49 = vadd.f32 %v1537_v24, %v665_v40  ;;  %v823_v50 = vadd.f32 %v1537_v24, %v685_v42 }
  0xe2   : > { %v800_v47 = vadd.f32 %v1537_v24, %v627_v45  ;;  %v808_v48 = vadd.f32 %v1537_v24, %v647_v46 }
  0xe3   : > { %1352 = vst [vmem:[%s1568_s29 + $0x50] sm:$0xff] %v1316_v43   ;;  %v847_v57 = vmax.f32 %v815_v49, 0.0  ;;  %v855_v58 = vmax.f32 %v823_v50, 0.0 }
  0xe4   : > { %1356 = vst [vmem:[%s1568_s29 + $0x70] sm:$0xff] %v1336_v44   ;;  %v832_v53 = vmax.f32 %v800_v47, 0.0  ;;  %v840_v54 = vmax.f32 %v808_v48, 0.0 }
  0xe5   : > { %v883_v5 = vmul.f32 %v1544_v30, %v847_v57  ;;  %v891_v6 = vmul.f32 %v1544_v30, %v855_v58 }
  0xe6   : > { %v868_v55 = vmul.f32 %v1544_v30, %v832_v53  ;;  %v876_v56 = vmul.f32 %v1544_v30, %v840_v54 }
  0xe7   : > { %v919_v11 = vadd.f32 %v1554_v41, %v883_v5 }
  0xe8   : > { %v904_v61 = vadd.f32 %v1554_v41, %v868_v55  ;;  %v912_v62 = vadd.f32 %v1554_v41, %v876_v56  ;;  %v667_v63 = vpop.f32.mrf.mxu2  ;;  %v687_v0 = vpop.f32.mrf.mxu3 }
  0xe9   : > { %v816_v1 = vadd.f32 %v1537_v24, %v667_v63  ;;  %v824_v2 = vadd.f32 %v1537_v24, %v687_v0  ;;  %v927_v24 = vadd.f32 %v1554_v41, %v891_v6 }
  0xea   : > { %v1281_v3 = vpack.c.bf16 %v904_v61, %v903_v59  ;;  %v1301_v4 = vpack.c.bf16 %v912_v62, %v911_v60 }
  0xeb   : > { %v848_v7 = vmax.f32 %v816_v1, 0.0  ;;  %v856_v8 = vmax.f32 %v824_v2, 0.0 }
  0xec   : > { %1345 = vst [vmem:[%s1568_s29 + $0x18] sm:$0xff] %v1281_v3  }
  0xed   : > { %1349 = vst [vmem:[%s1568_s29 + $0x38] sm:$0xff] %v1301_v4   ;;  %v884_v9 = vmul.f32 %v1544_v30, %v848_v7  ;;  %v892_v10 = vmul.f32 %v1544_v30, %v856_v8 }
  0xef   : > { %v920_v12 = vadd.f32 %v1554_v41, %v884_v9  ;;  %v928_v13 = vadd.f32 %v1554_v41, %v892_v10 }
  0xf1   : > { %v1321_v14 = vpack.c.bf16 %v920_v12, %v919_v11  ;;  %v1341_v15 = vpack.c.bf16 %v928_v13, %v927_v24 }
  0xf3   : > { %1353 = vst [vmem:[%s1568_s29 + $0x58] sm:$0xff] %v1321_v14  }
  0xf4   : > { %1357 = vst [vmem:[%s1568_s29 + $0x78] sm:$0xff] %v1341_v15  }
  0xf5 PF: > { %s15_s20 = sadd.s32 1, %s1431_s20   ;;  %s1683_s18 = smov %s1427_s19 }
  0xf6   : > { %p12_p5 = scmp.ge.s32.totalorder %s15_s20, 4   ;;  %s1684_s19 = smov %s1686_s21 }
  0xf8   :  { %14 = sbr.rel (!%p12_p5) target bundleno = 2 (0x2), region = 90 }

// kernel: tile.27
= control target key start
LH: loop header
LB: loop body
LE: loop exit
PB: predicated region body
PF: predicated region fallthrough
CT: control target
= control target key end

     0   :  { %s64_s0 = inlined_call_operand.vmem [shape: f32[8], index: 0, kind: input, shape index: {}]   ;;  %s65_s1 = inlined_call_operand.vmem [shape: f32[64,8], index: 1, kind: output, shape index: {}]  }
   0x1   :  { %v4_v0 = vld [vmem:[%s64_s0] ss:$0 sm:$0xff] }
   0x2   :  { %5 = vst [vmem:[%s65_s1] sm:$0xff] %v4_v0 }
   0x3   :  { %20 = vst [vmem:[%s65_s1 + $0x8] sm:$0xff] %v4_v0 }
   0x4   :  { %21 = vst [vmem:[%s65_s1 + $0x10] sm:$0xff] %v4_v0 }
   0x5   :  { %22 = vst [vmem:[%s65_s1 + $0x18] sm:$0xff] %v4_v0 }
   0x6   :  { %23 = vst [vmem:[%s65_s1 + $0x20] sm:$0xff] %v4_v0 }
   0x7   :  { %24 = vst [vmem:[%s65_s1 + $0x28] sm:$0xff] %v4_v0 }
   0x8   :  { %25 = vst [vmem:[%s65_s1 + $0x30] sm:$0xff] %v4_v0 }
   0x9   :  { %26 = vst [vmem:[%s65_s1 + $0x38] sm:$0xff] %v4_v0 }

// kernel: mul.6
= control target key start
LH: loop header
LB: loop body
LE: loop exit
PB: predicated region body
PF: predicated region fallthrough
CT: control target
= control target key end

     0   :  { %vm6_vm0 = vcmask 1043458   ;;  %s11_s6 = smov 3  ;;  %s14_s7 = smov 12  ;;  %vm8_vm1 = vcmask 64512   ;;  %vm20_vm2 = vcmask 1048512   ;;  %vm32_vm3 = vcmask 982912   ;;  %s381_s0 = inlined_call_operand.vmem [shape: f32[64,8], index: 0, kind: input, shape index: {}]   ;;  %s382_s1 = inlined_call_operand.vmem [shape: f32[512], index: 1, kind: output, shape index: {}]  }
   0x1   :  { %v196_v0 = vld [vmem:[%s381_s0 + $0xf] ss:$16 sm:%s11_s6]   ;;  %s35_s12 = smov 3  ;;  %s38_s15 = smov 12  ;;  %vm44_vm4 = vcmask 917312   ;;  %vm56_vm5 = vcmask 851712  }
   0x2   :  { %v197_v1 = vld [vmem:[%s381_s0 + $0xf] ss:$16 sm:%s14_s7]   ;;  %v200_v3 = vld [vmem:[%s381_s0 + $0xd] ss:$16 sm:%s35_s12]   ;;  %s241_s16 = smov 120   ;;  %s23_s19 = smov 3 }
   0x3   :  { %v17_v2 = vsel %vm6_vm0, %v197_v1, %v196_v0  ;;  %v201_v4 = vld [vmem:[%s381_s0 + $0xd] ss:$16 sm:%s38_s15]   ;;  %s26_s20 = smov 12  ;;  %v198_v6 = vld [vmem:[%s381_s0 + $0xe] ss:$16 sm:%s23_s19]   ;;  %s47_s23 = smov 3 }
   0x4   :  { %18 = vrot.lane.b32.xlu0 %v17_v2, %s241_s16  ;;  %v41_v5 = vsel %vm6_vm0, %v201_v4, %v200_v3  ;;  %s242_s24 = smov 104   ;;  %v199_v7 = vld [vmem:[%s381_s0 + $0xe] ss:$16 sm:%s26_s20]   ;;  %s50_s27 = smov 12  ;;  %vm68_vm6 = vcmask 786112   ;;  %vm80_vm7 = vcmask 720512  }
   0x5   :  { %42 = vrot.lane.b32.xlu1 %v41_v5, %s242_s24  ;;  %v202_v8 = vld [vmem:[%s381_s0 + $0xc] ss:$16 sm:%s47_s23]   ;;  %v29_v10 = vsel %vm6_vm0, %v199_v7, %v198_v6  ;;  %s83_s3 = smov 3  ;;  %s86_s4 = smov 12  ;;  %vm92_vm8 = vcmask 654912   ;;  %vm104_vm9 = vcmask 589312  }
   0x6   :  { %v203_v9 = vld [vmem:[%s381_s0 + $0xc] ss:$16 sm:%s50_s27]   ;;  %s243_s5 = smov 112   ;;  %s95_s6 = smov 3  ;;  %v208_v12 = vld [vmem:[%s381_s0 + $0x9] ss:$16 sm:%s83_s3]  }
   0x7   :  { %v53_v11 = vsel %vm6_vm0, %v203_v9, %v202_v8  ;;  %s98_s7 = smov 12  ;;  %v209_v13 = vld [vmem:[%s381_s0 + $0x9] ss:$16 sm:%s86_s4]   ;;  %s59_s12 = smov 3  ;;  %v210_v16 = vld [vmem:[%s381_s0 + $0x8] ss:$16 sm:%s95_s6]  }
   0x8   :  { %s62_s13 = smov 12  ;;  %s244_s14 = smov 96   ;;  %v204_v14 = vld [vmem:[%s381_s0 + $0xb] ss:$16 sm:%s59_s12]   ;;  %v211_v17 = vld [vmem:[%s381_s0 + $0x8] ss:$16 sm:%s98_s7]   ;;  %v89_v19 = vsel %vm6_vm0, %v209_v13, %v208_v12 }
   0x9   :  { %v205_v15 = vld [vmem:[%s381_s0 + $0xb] ss:$16 sm:%s62_s13]   ;;  %s245_s23 = smov 88   ;;  %s71_s24 = smov 3  ;;  %v101_v20 = vsel %vm6_vm0, %v211_v17, %v210_v16  ;;  %vm116_vm10 = vcmask 523712   ;;  %vm128_vm11 = vcmask 458112  }
   0xa   :  { %v65_v18 = vsel %vm6_vm0, %v205_v15, %v204_v14  ;;  %s119_s25 = smov 3  ;;  %s74_s26 = smov 12  ;;  %v206_v21 = vld [vmem:[%s381_s0 + $0xa] ss:$16 sm:%s71_s24]   ;;  %vm140_vm12 = vcmask 392512   ;;  %vm152_vm13 = vcmask 326912  }
   0xb   :  { %66 = vrot.lane.b32.xlu2 %v65_v18, %s245_s23  ;;  %s122_s27 = smov 12  ;;  %v207_v22 = vld [vmem:[%s381_s0 + $0xa] ss:$16 sm:%s74_s26]   ;;  %s246_s3 = smov 72   ;;  %vm164_vm14 = vcmask 261312   ;;  %vm176_vm15 = vcmask 195712  }
   0xc   :  { %30 = vrot.lane.b32.xlu0 %v29_v10, %s243_s5  ;;  %v214_v23 = vld [vmem:[%s381_s0 + $0x6] ss:$16 sm:%s119_s25]   ;;  %s131_s6 = smov 3  ;;  %s134_s7 = smov 12  ;;  %v77_v25 = vsel %vm6_vm0, %v207_v22, %v206_v21 }
   0xd   :  { %54 = vrot.lane.b32.xlu1 %v53_v11, %s244_s14  ;;  %s247_s8 = smov 64   ;;  %v215_v24 = vld [vmem:[%s381_s0 + $0x6] ss:$16 sm:%s122_s27]   ;;  %s107_s15 = smov 3 }
   0xe   :  { %v216_v26 = vld [vmem:[%s381_s0 + $0x5] ss:$16 sm:%s131_s6]   ;;  %s110_s16 = smov 12  ;;  %v125_v28 = vsel %vm6_vm0, %v215_v24, %v214_v23  ;;  %s248_s17 = smov 80   ;;  %v212_v30 = vld [vmem:[%s381_s0 + $0x7] ss:$16 sm:%s107_s15]  }
   0xf   :  { %v217_v27 = vld [vmem:[%s381_s0 + $0x5] ss:$16 sm:%s134_s7]   ;;  %s155_s18 = smov 3  ;;  %s158_s19 = smov 12  ;;  %v213_v31 = vld [vmem:[%s381_s0 + $0x7] ss:$16 sm:%s110_s16]  }
  0x10   :  { %v137_v29 = vsel %vm6_vm0, %v217_v27, %v216_v26  ;;  %s249_s24 = smov 48   ;;  %v220_v32 = vld [vmem:[%s381_s0 + $0x3] ss:$16 sm:%s155_s18]   ;;  %s167_s27 = smov 3  ;;  %v113_v34 = vsel %vm6_vm0, %v213_v31, %v212_v30 }
  0x11   :  { %s170_s28 = smov 12  ;;  %s250_s29 = smov 40   ;;  %v221_v33 = vld [vmem:[%s381_s0 + $0x3] ss:$16 sm:%s158_s19]   ;;  %v222_v35 = vld [vmem:[%s381_s0 + $0x2] ss:$16 sm:%s167_s27]  }
  0x12   :  { %v223_v36 = vld [vmem:[%s381_s0 + $0x2] ss:$16 sm:%s170_s28]   ;;  %s143_s7 = smov 3  ;;  %v161_v37 = vsel %vm6_vm0, %v221_v33, %v220_v32  ;;  %s251_s9 = smov 56  }
  0x13   :  { %78 = vrot.lane.b32.xlu2 %v77_v25, %s248_s17  ;;  %v173_v38 = vsel %vm6_vm0, %v223_v36, %v222_v35  ;;  %v218_v39 = vld [vmem:[%s381_s0 + $0x4] ss:$16 sm:%s143_s7]   ;;  %s252_s14 = smov 24   ;;  %s253_s15 = smov 16  }
  0x14   :  { %90 = vrot.lane.b32.xlu0 %v89_v19, %s246_s3  ;;  %s179_s16 = smov 3  ;;  %s182_s17 = smov 12 }
  0x15   :  { %102 = vrot.lane.b32.xlu1 %v101_v20, %s247_s8  ;;  %s146_s8 = smov 12  ;;  %s254_s18 = smov 32   ;;  %v224_v42 = vld [vmem:[%s381_s0 + $0x1] ss:$16 sm:%s179_s16]  }
  0x16   :  { %v219_v40 = vld [vmem:[%s381_s0 + $0x4] ss:$16 sm:%s146_s8]   ;;  %v225_v43 = vld [vmem:[%s381_s0 + $0x1] ss:$16 sm:%s182_s17]   ;;  %s255_s23 = smov 8   ;;  %s4_s25 = smov 12 }
  0x17   :  { %v149_v41 = vsel %vm6_vm0, %v219_v40, %v218_v39  ;;  %v185_v44 = vsel %vm6_vm0, %v225_v43, %v224_v42  ;;  %v5_v46 = vld [vmem:[%s381_s0] ss:$16 sm:%s4_s25]  }
  0x1b   :  { %114 = vrot.lane.b32.xlu2 %v113_v34, %s251_s9 }
  0x1c   :  { %126 = vrot.lane.b32.xlu0 %v125_v28, %s249_s24  ;;  %s2_s24 = smov 3 }
  0x1d   :  { %138 = vrot.lane.b32.xlu1 %v137_v29, %s250_s29  ;;  %v3_v45 = vld [vmem:[%s381_s0] ss:$16 sm:%s2_s24]  }
  0x1e   :  { %v7_v47 = vsel %vm6_vm0, %v5_v46, %v3_v45  ;;  %vm188_vm0 = vcmask 130112  }
  0x1f   :  { %9 = vst.msk [vmem:[#allocation0] sm:$0xf] %vm8_vm1, %v7_v47  }
  0x23   :  { %150 = vrot.lane.b32.xlu2 %v149_v41, %s254_s18 }
  0x24   :  { %162 = vrot.lane.b32.xlu0 %v161_v37, %s252_s14 }
  0x25   :  { %174 = vrot.lane.b32.xlu1 %v173_v38, %s253_s15 }
  0x2b   :  { %186 = vrot.lane.b32.xlu2 %v185_v44, %s255_s23 }
  0x65   :  { %v67_v48 = vpop.permute.xlu2 %66  }
  0x6d   :  { %v79_v49 = vpop.permute.xlu2 %78  }
  0x75   :  { %v115_v52 = vpop.permute.xlu2 %114  }
  0x76   :  { %v19_v50 = vpop.permute.xlu0 %18  }
  0x77   :  { %21 = vst.msk [vmem:[#allocation0] sm:$0xf] %vm20_vm2, %v19_v50   ;;  %v43_v51 = vpop.permute.xlu1 %42  }
  0x7d   :  { %v151_v55 = vpop.permute.xlu2 %150  }
  0x7e   :  { %v31_v53 = vpop.permute.xlu0 %30  }
  0x7f   :  { %33 = vst.msk [vmem:[#allocation0] sm:$0xf] %vm32_vm3, %v31_v53   ;;  %v55_v54 = vpop.permute.xlu1 %54  }
  0x80   :  { %45 = vst.msk [vmem:[#allocation0] sm:$0xf] %vm44_vm4, %v43_v51  }
  0x81   :  { %57 = vst.msk [vmem:[#allocation0] sm:$0xf] %vm56_vm5, %v55_v54  }
  0x82   :  { %69 = vst.msk [vmem:[#allocation0] sm:$0xf] %vm68_vm6, %v67_v48  }
  0x83   :  { %81 = vst.msk [vmem:[#allocation0] sm:$0xf] %vm80_vm7, %v79_v49  }
  0x85   :  { %v187_v58 = vpop.permute.xlu2 %186  }
  0x86   :  { %v91_v56 = vpop.permute.xlu0 %90  }
  0x87   :  { %93 = vst.msk [vmem:[#allocation0] sm:$0xf] %vm92_vm8, %v91_v56   ;;  %v103_v57 = vpop.permute.xlu1 %102  }
  0x88   :  { %105 = vst.msk [vmem:[#allocation0] sm:$0xf] %vm104_vm9, %v103_v57  }
  0x89   :  { %117 = vst.msk [vmem:[#allocation0] sm:$0xf] %vm116_vm10, %v115_v52  }
  0x8e   :  { %v127_v59 = vpop.permute.xlu0 %126  }
  0x8f   :  { %129 = vst.msk [vmem:[#allocation0] sm:$0xf] %vm128_vm11, %v127_v59   ;;  %v139_v60 = vpop.permute.xlu1 %138  }
  0x90   :  { %141 = vst.msk [vmem:[#allocation0] sm:$0xf] %vm140_vm12, %v139_v60  }
  0x91   :  { %153 = vst.msk [vmem:[#allocation0] sm:$0xf] %vm152_vm13, %v151_v55  }
  0x96   :  { %v163_v61 = vpop.permute.xlu0 %162  }
  0x97   :  { %165 = vst.msk [vmem:[#allocation0] sm:$0xf] %vm164_vm14, %v163_v61   ;;  %v175_v62 = vpop.permute.xlu1 %174  }
  0x98   :  { %177 = vst.msk [vmem:[#allocation0] sm:$0xf] %vm176_vm15, %v175_v62  }
  0x99   :  { %189 = vst.msk [vmem:[#allocation0] sm:$0xf] %vm188_vm0, %v187_v58  }
  0xa0   :  { %v192_v63 = vld [vmem:[#allocation0] sm:$0xf] }
  0xa1   :  { %195 = vst [vmem:[%s382_s1] sm:$0xf] %v192_v63 }

// kernel: vae_forward.8
= control target key start
LH: loop header
LB: loop body
LE: loop exit
PB: predicated region body
PF: predicated region fallthrough
CT: control target
= control target key end

     0   :  { %s941_s18 = smov 0   ;;  %s943_s19 = smov 0   ;;  %s1047_s0 = inlined_call_operand.vmem [shape: bf16[16,512], index: 0, kind: input, shape index: {}]   ;;  %s1048_s1 = inlined_call_operand.vmem [shape: bf16[512,128], index: 1, kind: input, shape index: {}]   ;;  %s1049_s2 = inlined_call_operand.vmem [shape: f32[1,128], index: 2, kind: input, shape index: {}]   ;;  %s1050_s3 = inlined_call_operand.vmem [shape: f32[1,128], index: 3, kind: input, shape index: {}]   ;;  %s1051_s4 = inlined_call_operand.vmem [shape: f32[1,128], index: 4, kind: input, shape index: {}]   ;;  %s1052_s5 = inlined_call_operand.vmem [shape: f32[16,128], index: 5, kind: output, shape index: {}]  }
   0x1   :  { %s945_s20 = smov 0   ;;  %s947_s21 = smov 0  }
   0x2   :  { %s949_s22 = smov 0  }
   0x3 LB: > { %s27_s23 = sadd.s32 1, %s904_s21  ;;  %p50_p1 = scmp.ne.s32.totalorder %s896_s19, %s892_s18  ;;  %s908_s22 = sphi %s949_s22, %s15_s22   ;;  %s904_s21 = sphi %s947_s21, %s1056_s21   ;;  %s900_s20 = sphi %s945_s20, %s1055_s20   ;;  %s896_s19 = sphi %s943_s19, %s1054_s19   ;;  %s892_s18 = sphi %s941_s18, %s1053_s18  }
   0x4   : > { %p28_p0 = scmp.ge.s32.totalorder %s27_s23, 2  ;;  %p51_p2 = scmp.eq.s32.totalorder %s908_s22, 0 }
   0x5   : > { %s43_s25 = sadd.s32 1, %s896_s19  ;;  %p721_p5 = scmp.ge.s32.totalorder %s908_s22, 2 }
   0x6   : > { %s1058_s23 = smov (%p28_p0, %s27_s23), 0  ;;  %p52_p3 = por %p51_p2, %p50_p1 }
   0x7   : > { %s39_s24 = ssub.s32 %s904_s21, %s1058_s23  ;;  %228 = sbr.rel (%p721_p5) target bundleno = 18 (0x12), region = 28 }
   0x8   : > { %p41_p4 = scmp.eq.s32.totalorder %s39_s24, 0 }
   0xa   : > { %s976_s26 = scalar_select %p41_p4, %s896_s19, %s43_s25  }
   0xc   : > { %231 = sbr.rel (!%p52_p3) target bundleno = 18 (0x12), region = 32  ;;  %s233_s27 = sand.u32 (%p52_p3), 1, %s896_s19  }
   0xd   : > { %s807_s28 = sshll.u32 (%p52_p3), %s904_s21, 3  ;;  %s722_s29 = sshll.u32 (%p52_p3), %s233_s27, 4 }
   0xe   : > { %s241_s7 = scalar_lea.vmem (%p52_p3), %s1047_s0, %s807_s28  ;;  %s235_s8 = scalar_lea.vmem (%p52_p3), [#allocation3], %s722_s29 }
   0xf   : > { %v272_v0 = vld [vmem:[%s241_s7] sm:$0xff] (%p52_p3)  ;;  %v274_v1 = vld [vmem:[%s241_s7 + $0x10] sm:$0xff] (%p52_p3) }
  0x10   : > { %273 = vst [vmem:[%s235_s8] sm:$0xff] (%p52_p3), %v272_v0 }
  0x11   : > { %275 = vst [vmem:[%s235_s8 + $0x8] sm:$0xff] %v274_v1 }
  0x12 PF: > { %p725_p6 = scmp.ge.s32.totalorder %s908_s22, 1  ;;  %p292_p7 = scmp.lt.s32.totalorder %s908_s22, 3 }
  0x14   : > { %p293_p8 = pnand %p725_p6, %p292_p7 }
  0x15   : > { %s299_s9 = sand.u32 (!%p293_p8), 1, %s892_s18   ;;  %s727_s10 = sshll.u32 (!%p293_p8), %s900_s20, 5 }
  0x16   : > { %296 = sbr.rel (%p293_p8) target bundleno = 221 (0xdd), region = 74  ;;  %s726_s11 = sshll.u32 (!%p293_p8), %s299_s9, 4 }
  0x17   : > { %p349_p9 = scmp.lt.s32.totalorder (!%p293_p8), %s727_s10, 63  ;;  %s993_s16 = scalar_lea.vmem (!%p293_p8), [#allocation3], %s726_s11 }
  0x18   : > { %p729_p10 = scmp.ne.s32.totalorder (!%p293_p8), %s900_s20, 0 }
  0x1b   : > { %s1060_s10 = smov (!%p349_p9, %s727_s10), 63  ;;  %378 = sbr.rel (%p729_p10) target bundleno = 35 (0x23), region = 82 }
  0x1c   : > { %s728_s12 = sshll.u32 %s1060_s10, 2 }
  0x1d   : > { %s991_s15 = scalar_lea.vmem %s1048_s1, %s728_s12 }
  0x20   : > { %v910_v2 = vmov 0.0  }
  0x21   : > { %379 = vst [vmem:[#allocation2] sm:$0xff] %v910_v2 }
  0x22   : > { %380 = vst [vmem:[#allocation2 + $0x8] sm:$0xff] %v910_v2 }
  0x23 PF: > { %v817_v3 = vld [vmem:[%s991_s15 + $0x38] sm:$0xff]  ;;  %v816_v5 = vld [vmem:[%s991_s15 + $0x30] sm:$0xff]  ;;  %v815_v7 = vld [vmem:[%s991_s15 + $0x28] sm:$0xff]  ;;  %p802_p11 = scmp.ne.s32.totalorder %s900_s20, 1 }
  0x24   : > { %v825_v4 = vld [vmem:[%s991_s15 + $0x78] sm:$0xff]  ;;  %523 = vmatpush.bf16.msra.mxu0 %v817_v3  ;;  %v824_v6 = vld [vmem:[%s991_s15 + $0x70] sm:$0xff]  ;;  %v823_v8 = vld [vmem:[%s991_s15 + $0x68] sm:$0xff] }
  0x25   : > { %537 = vmatpush.bf16.msra.mxu1 %v825_v4  ;;  %v814_v9 = vld [vmem:[%s991_s15 + $0x20] sm:$0xff]  ;;  %v813_v11 = vld [vmem:[%s991_s15 + $0x18] sm:$0xff]  ;;  %v812_v13 = vld [vmem:[%s991_s15 + $0x10] sm:$0xff] }
  0x26   : > { %v822_v10 = vld [vmem:[%s991_s15 + $0x60] sm:$0xff]  ;;  %v821_v12 = vld [vmem:[%s991_s15 + $0x58] sm:$0xff]  ;;  %v820_v14 = vld [vmem:[%s991_s15 + $0x50] sm:$0xff] }
  0x27   : > { %v811_v15 = vld [vmem:[%s991_s15 + $0x8] sm:$0xff]  ;;  %v810_v17 = vld [vmem:[%s991_s15] sm:$0xff] }
  0x28   : > { %524 = vmatpush.bf16.msra.mxu0 %v816_v5  ;;  %v819_v16 = vld [vmem:[%s991_s15 + $0x48] sm:$0xff]  ;;  %v818_v18 = vld [vmem:[%s991_s15 + $0x40] sm:$0xff] }
  0x29   : > { %538 = vmatpush.bf16.msra.mxu1 %v824_v6  ;;  %v732_v19 = vld [vmem:[%s993_s16] sm:$0xf]  ;;  %v809_v20 = vld [vmem:[%s993_s16 + $0x4] sm:$0xf0]  ;;  %v808_v21 = vld [vmem:[%s993_s16 + $0x4] sm:$0xf] }
  0x2a   : > { %v734_v22 = vld [vmem:[%s993_s16 + $0x8] sm:$0xf0]  ;;  %v733_v23 = vor.u32 %v809_v20, %v732_v19  ;;  %v381_v26 = vld [vmem:[#allocation2] sm:$0xff] }
  0x2b   : > { %v737_v24 = vor.u32 %v808_v21, %v734_v22  ;;  %v382_v31 = vld [vmem:[#allocation2 + $0x8] sm:$0xff] }
  0x2c   : > { %525 = vmatpush.bf16.msra.mxu0 %v815_v7 }
  0x2d   : > { %539 = vmatpush.bf16.msra.mxu1 %v823_v8 }
  0x30   : > { %526 = vmatpush.bf16.msra.mxu0 %v814_v9 }
  0x31   : > { %540 = vmatpush.bf16.msra.mxu1 %v822_v10 }
  0x34   : > { %527 = vmatpush.bf16.msra.mxu0 %v813_v11 }
  0x35   : > { %541 = vmatpush.bf16.msra.mxu1 %v821_v12 }
  0x38   : > { %528 = vmatpush.bf16.msra.mxu0 %v812_v13 }
  0x39   : > { %542 = vmatpush.bf16.msra.mxu1 %v820_v14 }
  0x3c   : > { %529 = vmatpush.bf16.msra.mxu0 %v811_v15 }
  0x3d   : > { %543 = vmatpush.bf16.msra.mxu1 %v819_v16 }
  0x40   : > { %530 = vmatpush.bf16.msra.mxu0 %v810_v17 }
  0x41   : > { %544 = vmatpush.bf16.msra.mxu1 %v818_v18 }
  0x43   : > { %531 = vmatmul.bf16.vlgmr.msra.gmra.mxu0 %v733_v23 }
  0x44   : > { %545 = vmatmul.bf16.vlgmr.msra.gmra.mxu1 %v737_v24 }
  0xc0   : > { %v532_v25 = vpop.f32.mrf.mxu0 }
  0xc1   : > { %v546_v27 = vpop.f32.mrf.mxu1 }
  0xc2   : > { %v547_v28 = vadd.f32 %v546_v27, %v532_v25 }
  0xc4   : > { %v551_v29 = vadd.f32 %v547_v28, %v381_v26 }
  0xc6   : > { %553 = vst [vmem:[#allocation2] sm:$0xff] %v551_v29 }
  0xc8   : > { %v534_v30 = vpop.f32.mrf.mxu0 }
  0xc9   : > { %v548_v32 = vpop.f32.mrf.mxu1 }
  0xca   : > { %v549_v33 = vadd.f32 %v548_v32, %v534_v30  ;;  %558 = sbr.rel (%p802_p11) target bundleno = 221 (0xdd), region = 86 }
  0xcc   : > { %v552_v34 = vadd.f32 %v549_v33, %v382_v31 }
  0xce   : > { %554 = vst [vmem:[#allocation2 + $0x8] sm:$0xff] %v552_v34 }
  0xcf   : > { %v559_v35 = vld [vmem:[#allocation2] sm:$0xff] }
  0xd0   : > { %v867_v36 = vld [vmem:[%s1049_s2] ss:$0 sm:$0xff] }
  0xd1   : > { %v868_v37 = vld [vmem:[%s1050_s3] ss:$0 sm:$0xff]  ;;  %v565_v38 = vadd.f32 %v867_v36, %v559_v35 }
  0xd2   : > { %v869_v39 = vld [vmem:[%s1051_s4] ss:$0 sm:$0xff] }
  0xd3   : > { %v571_v42 = vmul.f32 %v868_v37, %v565_v38 }
  0xd5   : > { %v560_v40 = vld [vmem:[#allocation2 + $0x8] sm:$0xff]  ;;  %v577_v44 = vadd.f32 %v869_v39, %v571_v42 }
  0xd6   : > { %v566_v41 = vadd.f32 %v867_v36, %v560_v40 }
  0xd7   : > { %579 = vst [vmem:[%s1052_s5] sm:$0xff] %v577_v44 }
  0xd8   : > { %v572_v43 = vmul.f32 %v868_v37, %v566_v41 }
  0xda   : > { %v578_v45 = vadd.f32 %v869_v39, %v572_v43 }
  0xdc   : > { %580 = vst [vmem:[%s1052_s5 + $0x8] sm:$0xff] %v578_v45 }
  0xdd PF: > { %s15_s22 = sadd.s32 1, %s908_s22   ;;  %s1053_s18 = smov %s896_s19 }
  0xde   : > { %p12_p12 = scmp.ge.s32.totalorder %s15_s22, 4   ;;  %s1054_s19 = smov %s976_s26 }
  0xdf   : > { %s1055_s20 = smov %s904_s21  ;;  %s1056_s21 = smov %s1058_s23 }
  0xe0   :  { %14 = sbr.rel (!%p12_p12) target bundleno = 3 (0x3), region = 133 }

// kernel: vae_forward.7
= control target key start
LH: loop header
LB: loop body
LE: loop exit
PB: predicated region body
PF: predicated region fallthrough
CT: control target
= control target key end

     0   :  { %s715_s1 = inlined_call_operand.vmem [shape: bf16[128,128], index: 1, kind: input, shape index: {}]   ;;  %s716_s2 = inlined_call_operand.vmem [shape: f32[1,128], index: 2, kind: input, shape index: {}]   ;;  %s717_s3 = inlined_call_operand.vmem [shape: f32[1,128], index: 3, kind: input, shape index: {}]   ;;  %s718_s4 = inlined_call_operand.vmem [shape: f32[1,128], index: 4, kind: input, shape index: {}]   ;;  %s719_s0 = inlined_call_operand.vmem [shape: bf16[128,128], index: 0, kind: input, shape index: {}]   ;;  %s720_s5 = inlined_call_operand.vmem [shape: bf16[128,128], index: 5, kind: output, shape index: {}]  }
   0x1   :  { %v475_v0 = vld [vmem:[%s715_s1 + $0x38] sm:$0xff]  ;;  %v474_v1 = vld [vmem:[%s715_s1 + $0x30] sm:$0xff]  ;;  %v473_v2 = vld [vmem:[%s715_s1 + $0x28] sm:$0xff] }
   0x2   :  { %184 = vmatpush.bf16.msra.mxu0 %v475_v0  ;;  %523 = vmatpush.bf16.msra.mxu1 %v475_v0  ;;  %v472_v3 = vld [vmem:[%s715_s1 + $0x20] sm:$0xff]  ;;  %v471_v4 = vld [vmem:[%s715_s1 + $0x18] sm:$0xff]  ;;  %v470_v5 = vld [vmem:[%s715_s1 + $0x10] sm:$0xff] }
   0x3   :  { %524 = vmatpush.bf16.msra.mxu2 %v475_v0  ;;  %525 = vmatpush.bf16.msra.mxu3 %v475_v0  ;;  %v469_v6 = vld [vmem:[%s715_s1 + $0x8] sm:$0xff]  ;;  %v468_v7 = vld [vmem:[%s715_s1] sm:$0xff]  ;;  %v462_v9 = vld [vmem:[%s719_s0 + $0x10] sm:$0xff] }
   0x4   :  { %v460_v8 = vld [vmem:[%s719_s0] sm:$0xff]  ;;  %v466_v11 = vld [vmem:[%s719_s0 + $0x30] sm:$0xff]  ;;  %v461_v12 = vld [vmem:[%s719_s0 + $0x8] sm:$0xff] }
   0x5   :  { %v464_v10 = vld [vmem:[%s719_s0 + $0x20] sm:$0xff]  ;;  %v463_v13 = vld [vmem:[%s719_s0 + $0x18] sm:$0xff]  ;;  %v465_v14 = vld [vmem:[%s719_s0 + $0x28] sm:$0xff] }
   0x6   :  { %185 = vmatpush.bf16.msra.mxu0 %v474_v1  ;;  %526 = vmatpush.bf16.msra.mxu1 %v474_v1  ;;  %v467_v15 = vld [vmem:[%s719_s0 + $0x38] sm:$0xff]  ;;  %v631_v16 = vld [vmem:[%s716_s2] ss:$0 sm:$0xff] }
   0x7   :  { %527 = vmatpush.bf16.msra.mxu2 %v474_v1  ;;  %528 = vmatpush.bf16.msra.mxu3 %v474_v1  ;;  %v638_v22 = vld [vmem:[%s717_s3] ss:$0 sm:$0xff] }
   0x8   :  { %v648_v33 = vld [vmem:[%s718_s4] ss:$0 sm:$0xff] }
   0xa   :  { %186 = vmatpush.bf16.msra.mxu0 %v473_v2  ;;  %529 = vmatpush.bf16.msra.mxu1 %v473_v2 }
   0xb   :  { %530 = vmatpush.bf16.msra.mxu2 %v473_v2  ;;  %531 = vmatpush.bf16.msra.mxu3 %v473_v2 }
   0xe   :  { %187 = vmatpush.bf16.msra.mxu0 %v472_v3  ;;  %532 = vmatpush.bf16.msra.mxu1 %v472_v3 }
   0xf   :  { %533 = vmatpush.bf16.msra.mxu2 %v472_v3  ;;  %534 = vmatpush.bf16.msra.mxu3 %v472_v3 }
  0x12   :  { %188 = vmatpush.bf16.msra.mxu0 %v471_v4  ;;  %535 = vmatpush.bf16.msra.mxu1 %v471_v4 }
  0x13   :  { %536 = vmatpush.bf16.msra.mxu2 %v471_v4  ;;  %537 = vmatpush.bf16.msra.mxu3 %v471_v4 }
  0x16   :  { %189 = vmatpush.bf16.msra.mxu0 %v470_v5  ;;  %538 = vmatpush.bf16.msra.mxu1 %v470_v5 }
  0x17   :  { %539 = vmatpush.bf16.msra.mxu2 %v470_v5  ;;  %540 = vmatpush.bf16.msra.mxu3 %v470_v5 }
  0x1a   :  { %190 = vmatpush.bf16.msra.mxu0 %v469_v6  ;;  %541 = vmatpush.bf16.msra.mxu1 %v469_v6 }
  0x1b   :  { %542 = vmatpush.bf16.msra.mxu2 %v469_v6  ;;  %543 = vmatpush.bf16.msra.mxu3 %v469_v6 }
  0x1e   :  { %191 = vmatpush.bf16.msra.mxu0 %v468_v7  ;;  %544 = vmatpush.bf16.msra.mxu1 %v468_v7 }
  0x1f   :  { %545 = vmatpush.bf16.msra.mxu2 %v468_v7  ;;  %546 = vmatpush.bf16.msra.mxu3 %v468_v7 }
  0x21   :  { %192 = vmatmul.bf16.vlgmr.msra.gmra.mxu0 %v460_v8  ;;  %202 = vmatmul.bf16.vlgmr.msra.gmra.mxu1 %v462_v9 }
  0x22   :  { %212 = vmatmul.bf16.vlgmr.msra.gmra.mxu2 %v464_v10  ;;  %222 = vmatmul.bf16.vlgmr.msra.gmra.mxu3 %v466_v11 }
  0x31   :  { %197 = vmatmul.bf16.gmra.mxu0 %v461_v12  ;;  %207 = vmatmul.bf16.gmra.mxu1 %v463_v13 }
  0x32   :  { %217 = vmatmul.bf16.gmra.mxu2 %v465_v14  ;;  %227 = vmatmul.bf16.gmra.mxu3 %v467_v15 }
  0x9e   :  { %v193_v17 = vpop.f32.mrf.mxu0  ;;  %v203_v18 = vpop.f32.mrf.mxu1 }
  0x9f   :  { %v288_v19 = vadd.f32 %v631_v16, %v193_v17  ;;  %v292_v20 = vadd.f32 %v631_v16, %v203_v18 }
  0xa1   :  { %v304_v21 = vmax.f32 %v288_v19, 0.0  ;;  %v308_v23 = vmax.f32 %v292_v20, 0.0 }
  0xa3   :  { %v324_v32 = vmul.f32 %v638_v22, %v304_v21  ;;  %v328_v34 = vmul.f32 %v638_v22, %v308_v23 }
  0xa5   :  { %v213_v24 = vpop.f32.mrf.mxu2  ;;  %v223_v25 = vpop.f32.mrf.mxu3  ;;  %v344_v41 = vadd.f32 %v648_v33, %v324_v32  ;;  %v348_v42 = vadd.f32 %v648_v33, %v328_v34 }
  0xa6   :  { %v195_v26 = vpop.f32.mrf.mxu0  ;;  %v205_v27 = vpop.f32.mrf.mxu1  ;;  %v296_v30 = vadd.f32 %v631_v16, %v213_v24  ;;  %v300_v31 = vadd.f32 %v631_v16, %v223_v25 }
  0xa7   :  { %v289_v28 = vadd.f32 %v631_v16, %v195_v26  ;;  %v293_v29 = vadd.f32 %v631_v16, %v205_v27 }
  0xa8   :  { %v312_v39 = vmax.f32 %v296_v30, 0.0  ;;  %v316_v40 = vmax.f32 %v300_v31, 0.0 }
  0xa9   :  { %v305_v35 = vmax.f32 %v289_v28, 0.0  ;;  %v309_v36 = vmax.f32 %v293_v29, 0.0 }
  0xaa   :  { %v332_v53 = vmul.f32 %v638_v22, %v312_v39  ;;  %v336_v54 = vmul.f32 %v638_v22, %v316_v40 }
  0xab   :  { %v325_v37 = vmul.f32 %v638_v22, %v305_v35  ;;  %v329_v38 = vmul.f32 %v638_v22, %v309_v36 }
  0xac   :  { %v352_v61 = vadd.f32 %v648_v33, %v332_v53  ;;  %v356_v62 = vadd.f32 %v648_v33, %v336_v54 }
  0xad   :  { %v345_v43 = vadd.f32 %v648_v33, %v325_v37  ;;  %v349_v44 = vadd.f32 %v648_v33, %v329_v38  ;;  %v215_v45 = vpop.f32.mrf.mxu2  ;;  %v225_v46 = vpop.f32.mrf.mxu3 }
  0xae   :  { %v297_v47 = vadd.f32 %v631_v16, %v215_v45  ;;  %v301_v48 = vadd.f32 %v631_v16, %v225_v46  ;;  %v198_v49 = vpop.f32.mrf.mxu0  ;;  %v208_v50 = vpop.f32.mrf.mxu1 }
  0xaf   :  { %v479_v51 = vpack.c.bf16 %v345_v43, %v344_v41  ;;  %v489_v52 = vpack.c.bf16 %v349_v44, %v348_v42  ;;  %v290_v57 = vadd.f32 %v631_v16, %v198_v49  ;;  %v294_v58 = vadd.f32 %v631_v16, %v208_v50 }
  0xb0   :  { %v313_v55 = vmax.f32 %v297_v47, 0.0  ;;  %v317_v56 = vmax.f32 %v301_v48, 0.0 }
  0xb1   :  { %480 = vst [vmem:[%s720_s5] sm:$0xff] %v479_v51   ;;  %v306_v1 = vmax.f32 %v290_v57, 0.0  ;;  %v310_v2 = vmax.f32 %v294_v58, 0.0 }
  0xb2   :  { %517 = vst [vmem:[%s720_s5 + $0x10] sm:$0xff] %v489_v52   ;;  %v333_v59 = vmul.f32 %v638_v22, %v313_v55  ;;  %v337_v60 = vmul.f32 %v638_v22, %v317_v56 }
  0xb3   :  { %v326_v13 = vmul.f32 %v638_v22, %v306_v1  ;;  %v330_v14 = vmul.f32 %v638_v22, %v310_v2 }
  0xb4   :  { %v353_v63 = vadd.f32 %v648_v33, %v333_v59  ;;  %v357_v0 = vadd.f32 %v648_v33, %v337_v60 }
  0xb5   :  { %v218_v3 = vpop.f32.mrf.mxu2  ;;  %v228_v4 = vpop.f32.mrf.mxu3  ;;  %v346_v23 = vadd.f32 %v648_v33, %v326_v13  ;;  %v350_v24 = vadd.f32 %v648_v33, %v330_v14 }
  0xb6   :  { %v499_v5 = vpack.c.bf16 %v353_v63, %v352_v61  ;;  %v509_v6 = vpack.c.bf16 %v357_v0, %v356_v62  ;;  %v200_v7 = vpop.f32.mrf.mxu0  ;;  %v210_v8 = vpop.f32.mrf.mxu1  ;;  %v298_v11 = vadd.f32 %v631_v16, %v218_v3  ;;  %v302_v12 = vadd.f32 %v631_v16, %v228_v4 }
  0xb7   :  { %v291_v9 = vadd.f32 %v631_v16, %v200_v7  ;;  %v295_v10 = vadd.f32 %v631_v16, %v210_v8 }
  0xb8   :  { %519 = vst [vmem:[%s720_s5 + $0x20] sm:$0xff] %v499_v5   ;;  %v314_v20 = vmax.f32 %v298_v11, 0.0  ;;  %v318_v21 = vmax.f32 %v302_v12, 0.0 }
  0xb9   :  { %521 = vst [vmem:[%s720_s5 + $0x30] sm:$0xff] %v509_v6   ;;  %v307_v15 = vmax.f32 %v291_v9, 0.0  ;;  %v311_v17 = vmax.f32 %v295_v10, 0.0 }
  0xba   :  { %v334_v34 = vmul.f32 %v638_v22, %v314_v20  ;;  %v338_v35 = vmul.f32 %v638_v22, %v318_v21 }
  0xbb   :  { %v327_v18 = vmul.f32 %v638_v22, %v307_v15  ;;  %v331_v19 = vmul.f32 %v638_v22, %v311_v17 }
  0xbc   :  { %v354_v39 = vadd.f32 %v648_v33, %v334_v34  ;;  %v358_v40 = vadd.f32 %v648_v33, %v338_v35 }
  0xbd   :  { %v347_v25 = vadd.f32 %v648_v33, %v327_v18  ;;  %v351_v26 = vadd.f32 %v648_v33, %v331_v19  ;;  %v220_v27 = vpop.f32.mrf.mxu2  ;;  %v230_v28 = vpop.f32.mrf.mxu3 }
  0xbe   :  { %v299_v29 = vadd.f32 %v631_v16, %v220_v27  ;;  %v303_v30 = vadd.f32 %v631_v16, %v230_v28 }
  0xbf   :  { %v484_v31 = vpack.c.bf16 %v347_v25, %v346_v23  ;;  %v494_v32 = vpack.c.bf16 %v351_v26, %v350_v24 }
  0xc0   :  { %v315_v36 = vmax.f32 %v299_v29, 0.0  ;;  %v319_v37 = vmax.f32 %v303_v30, 0.0 }
  0xc1   :  { %516 = vst [vmem:[%s720_s5 + $0x8] sm:$0xff] %v484_v31  }
  0xc2   :  { %518 = vst [vmem:[%s720_s5 + $0x18] sm:$0xff] %v494_v32   ;;  %v335_v38 = vmul.f32 %v638_v22, %v315_v36  ;;  %v339_v16 = vmul.f32 %v638_v22, %v319_v37 }
  0xc4   :  { %v355_v41 = vadd.f32 %v648_v33, %v335_v38  ;;  %v359_v42 = vadd.f32 %v648_v33, %v339_v16 }
  0xc6   :  { %v504_v43 = vpack.c.bf16 %v355_v41, %v354_v39  ;;  %v514_v44 = vpack.c.bf16 %v359_v42, %v358_v40 }
  0xc8   :  { %520 = vst [vmem:[%s720_s5 + $0x28] sm:$0xff] %v504_v43  }
  0xc9   :  { %522 = vst [vmem:[%s720_s5 + $0x38] sm:$0xff] %v514_v44  }

// kernel: tile.36
= control target key start
LH: loop header
LB: loop body
LE: loop exit
PB: predicated region body
PF: predicated region fallthrough
CT: control target
= control target key end

     0   :  { %s22_s0 = inlined_call_operand.vmem [shape: f32[4], index: 0, kind: input, shape index: {}]   ;;  %s23_s1 = inlined_call_operand.vmem [shape: f32[4,4], index: 1, kind: output, shape index: {}]  }
   0x1   :  { %v4_v0 = vld [vmem:[%s22_s0] ss:$0 sm:$0xff] }
   0x2   :  { %5 = vst [vmem:[%s23_s1] sm:$0xf] %v4_v0 }

// kernel: tile.43
= control target key start
LH: loop header
LB: loop body
LE: loop exit
PB: predicated region body
PF: predicated region fallthrough
CT: control target
= control target key end

     0   :  { %s37_s8 = smov 4   ;;  %s38_s9 = smov 8   ;;  %vm7_vm0 = vcmask 31744   ;;  %vm13_vm1 = vcmask 130144   ;;  %vm19_vm2 = vcmask 97344   ;;  %vm25_vm3 = vcmask 64544   ;;  %s55_s0 = inlined_call_operand.vmem [shape: f32[4,4], index: 0, kind: input, shape index: {}]   ;;  %s56_s1 = inlined_call_operand.vmem [shape: f32[1,16], index: 1, kind: output, shape index: {}]  }
   0x1   :  { %v4_v0 = vld [vmem:[%s55_s0] sm:$0xf]  ;;  %s36_s0 = smov 12  }
   0x2   :  { %5 = vst [vmem:[#allocation1] sm:$0xf] %v4_v0 }
   0x9   :  { %v10_v1 = vld [vmem:[#allocation1 + $0x3] sm:$0x1]   ;;  %v22_v2 = vld [vmem:[#allocation1 + $0x1] sm:$0x1]   ;;  %v16_v3 = vld [vmem:[#allocation1 + $0x2] sm:$0x1]  }
   0xa   :  { %11 = vrot.lane.b32.xlu0 %v10_v1, %s36_s0  ;;  %23 = vrot.lane.b32.xlu1 %v22_v2, %s37_s8  ;;  %v6_v4 = vld [vmem:[#allocation1] sm:$0x1]  }
   0xb   :  { %8 = vst.msk [vmem:[#allocation0] sm:$0x1] %vm7_vm0, %v6_v4  }
  0x12   :  { %17 = vrot.lane.b32.xlu0 %v16_v3, %s38_s9 }
  0x7c   :  { %v12_v5 = vpop.permute.xlu0 %11   ;;  %v24_v6 = vpop.permute.xlu1 %23  }
  0x7d   :  { %14 = vst.msk [vmem:[#allocation0] sm:$0x1] %vm13_vm1, %v12_v5  }
  0x84   :  { %v18_v7 = vpop.permute.xlu0 %17  }
  0x85   :  { %20 = vst.msk [vmem:[#allocation0] sm:$0x1] %vm19_vm2, %v18_v7  }
  0x86   :  { %26 = vst.msk [vmem:[#allocation0] sm:$0x1] %vm25_vm3, %v24_v6  }
  0x8d   :  { %v29_v8 = vld [vmem:[#allocation0] sm:$0x1] }
  0x8e   :  { %32 = vst [vmem:[%s56_s1] sm:$0x1] %v29_v8 }

// kernel: vae_forward.9
= control target key start
LH: loop header
LB: loop body
LE: loop exit
PB: predicated region body
PF: predicated region fallthrough
CT: control target
= control target key end

     0   :  { %s800_s1 = inlined_call_operand.vmem [shape: bf16[128,512], index: 1, kind: input, shape index: {}]   ;;  %s801_s0 = inlined_call_operand.vmem [shape: bf16[16,128], index: 0, kind: input, shape index: {}]   ;;  %s802_s2 = inlined_call_operand.vmem [shape: f32[1,512], index: 2, kind: input, shape index: {}]   ;;  %s803_s3 = inlined_call_operand.vmem [shape: f32[1,512], index: 3, kind: input, shape index: {}]   ;;  %s804_s4 = inlined_call_operand.vmem [shape: f32[1,512], index: 4, kind: input, shape index: {}]   ;;  %s805_s5 = inlined_call_operand.vmem [shape: bf16[16,512], index: 5, kind: output, shape index: {}]  }
   0x1   :  { %v507_v0 = vld [vmem:[%s800_s1 + $0xe0] sm:$0xf]  ;;  %v552_v1 = vld [vmem:[%s800_s1 + $0xec] sm:$0xf0]  ;;  %v550_v2 = vld [vmem:[%s800_s1 + $0xe4] sm:$0xf] }
   0x2   :  { %v508_v3 = vor.u32 %v552_v1, %v507_v0  ;;  %v509_v4 = vld [vmem:[%s800_s1 + $0xf0] sm:$0xf0]  ;;  %v515_v5 = vld [vmem:[%s800_s1 + $0xe8] sm:$0xf]  ;;  %v553_v6 = vld [vmem:[%s800_s1 + $0xf4] sm:$0xf0] }
   0x3   :  { %v512_v7 = vor.u32 %v550_v2, %v509_v4  ;;  %v516_v8 = vor.u32 %v553_v6, %v515_v5  ;;  %v551_v9 = vld [vmem:[%s800_s1 + $0xec] sm:$0xf]  ;;  %v517_v10 = vld [vmem:[%s800_s1 + $0xf8] sm:$0xf0]  ;;  %v491_v11 = vld [vmem:[%s800_s1 + $0xc0] sm:$0xf] }
   0x4   :  { %240 = vmatpush.bf16.msra.mxu0 %v508_v3  ;;  %v520_v12 = vor.u32 %v551_v9, %v517_v10  ;;  %v548_v13 = vld [vmem:[%s800_s1 + $0xcc] sm:$0xf0]  ;;  %v546_v14 = vld [vmem:[%s800_s1 + $0xc4] sm:$0xf]  ;;  %v493_v15 = vld [vmem:[%s800_s1 + $0xd0] sm:$0xf0] }
   0x5   :  { %254 = vmatpush.bf16.msra.mxu1 %v512_v7  ;;  %268 = vmatpush.bf16.msra.mxu2 %v516_v8  ;;  %v492_v16 = vor.u32 %v548_v13, %v491_v11  ;;  %v496_v17 = vor.u32 %v546_v14, %v493_v15  ;;  %v499_v18 = vld [vmem:[%s800_s1 + $0xc8] sm:$0xf]  ;;  %v549_v19 = vld [vmem:[%s800_s1 + $0xd4] sm:$0xf0]  ;;  %v547_v20 = vld [vmem:[%s800_s1 + $0xcc] sm:$0xf] }
   0x6   :  { %282 = vmatpush.bf16.msra.mxu3 %v520_v12  ;;  %v500_v21 = vor.u32 %v549_v19, %v499_v18  ;;  %v501_v22 = vld [vmem:[%s800_s1 + $0xd8] sm:$0xf0]  ;;  %v475_v23 = vld [vmem:[%s800_s1 + $0xa0] sm:$0xf]  ;;  %v544_v24 = vld [vmem:[%s800_s1 + $0xac] sm:$0xf0] }
   0x7   :  { %v504_v25 = vor.u32 %v547_v20, %v501_v22  ;;  %v542_v26 = vld [vmem:[%s800_s1 + $0xa4] sm:$0xf]  ;;  %v477_v27 = vld [vmem:[%s800_s1 + $0xb0] sm:$0xf0]  ;;  %v483_v28 = vld [vmem:[%s800_s1 + $0xa8] sm:$0xf]  ;;  %v476_v29 = vor.u32 %v544_v24, %v475_v23 }
   0x8   :  { %241 = vmatpush.bf16.msra.mxu0 %v492_v16  ;;  %v545_v30 = vld [vmem:[%s800_s1 + $0xb4] sm:$0xf0]  ;;  %v543_v31 = vld [vmem:[%s800_s1 + $0xac] sm:$0xf]  ;;  %v485_v32 = vld [vmem:[%s800_s1 + $0xb8] sm:$0xf0]  ;;  %v480_v33 = vor.u32 %v542_v26, %v477_v27 }
   0x9   :  { %255 = vmatpush.bf16.msra.mxu1 %v496_v17  ;;  %269 = vmatpush.bf16.msra.mxu2 %v500_v21  ;;  %v484_v34 = vor.u32 %v545_v30, %v483_v28  ;;  %v459_v35 = vld [vmem:[%s800_s1 + $0x80] sm:$0xf]  ;;  %v540_v36 = vld [vmem:[%s800_s1 + $0x8c] sm:$0xf0]  ;;  %v538_v37 = vld [vmem:[%s800_s1 + $0x84] sm:$0xf]  ;;  %v488_v38 = vor.u32 %v543_v31, %v485_v32 }
   0xa   :  { %283 = vmatpush.bf16.msra.mxu3 %v504_v25  ;;  %v461_v39 = vld [vmem:[%s800_s1 + $0x90] sm:$0xf0]  ;;  %v467_v40 = vld [vmem:[%s800_s1 + $0x88] sm:$0xf]  ;;  %v541_v41 = vld [vmem:[%s800_s1 + $0x94] sm:$0xf0]  ;;  %v460_v44 = vor.u32 %v540_v36, %v459_v35 }
   0xb   :  { %v539_v42 = vld [vmem:[%s800_s1 + $0x8c] sm:$0xf]  ;;  %v469_v43 = vld [vmem:[%s800_s1 + $0x98] sm:$0xf0]  ;;  %v464_v45 = vor.u32 %v538_v37, %v461_v39  ;;  %v468_v46 = vor.u32 %v541_v41, %v467_v40  ;;  %v443_v47 = vld [vmem:[%s800_s1 + $0x60] sm:$0xf] }
   0xc   :  { %242 = vmatpush.bf16.msra.mxu0 %v476_v29  ;;  %v536_v48 = vld [vmem:[%s800_s1 + $0x6c] sm:$0xf0]  ;;  %v534_v49 = vld [vmem:[%s800_s1 + $0x64] sm:$0xf]  ;;  %v472_v50 = vor.u32 %v539_v42, %v469_v43  ;;  %v445_v51 = vld [vmem:[%s800_s1 + $0x70] sm:$0xf0] }
   0xd   :  { %256 = vmatpush.bf16.msra.mxu1 %v480_v33  ;;  %270 = vmatpush.bf16.msra.mxu2 %v484_v34  ;;  %v451_v52 = vld [vmem:[%s800_s1 + $0x68] sm:$0xf]  ;;  %v537_v53 = vld [vmem:[%s800_s1 + $0x74] sm:$0xf0]  ;;  %v535_v54 = vld [vmem:[%s800_s1 + $0x6c] sm:$0xf]  ;;  %v444_v56 = vor.u32 %v536_v48, %v443_v47  ;;  %v448_v57 = vor.u32 %v534_v49, %v445_v51 }
   0xe   :  { %284 = vmatpush.bf16.msra.mxu3 %v488_v38  ;;  %v453_v55 = vld [vmem:[%s800_s1 + $0x78] sm:$0xf0]  ;;  %v452_v58 = vor.u32 %v537_v53, %v451_v52  ;;  %v427_v59 = vld [vmem:[%s800_s1 + $0x40] sm:$0xf]  ;;  %v532_v60 = vld [vmem:[%s800_s1 + $0x4c] sm:$0xf0] }
   0xf   :  { %v530_v61 = vld [vmem:[%s800_s1 + $0x44] sm:$0xf]  ;;  %v456_v62 = vor.u32 %v535_v54, %v453_v55  ;;  %v429_v63 = vld [vmem:[%s800_s1 + $0x50] sm:$0xf0]  ;;  %v435_v0 = vld [vmem:[%s800_s1 + $0x48] sm:$0xf]  ;;  %v428_v4 = vor.u32 %v532_v60, %v427_v59 }
  0x10   :  { %243 = vmatpush.bf16.msra.mxu0 %v460_v44  ;;  %v533_v1 = vld [vmem:[%s800_s1 + $0x54] sm:$0xf0]  ;;  %v531_v2 = vld [vmem:[%s800_s1 + $0x4c] sm:$0xf]  ;;  %v437_v3 = vld [vmem:[%s800_s1 + $0x58] sm:$0xf0]  ;;  %v432_v5 = vor.u32 %v530_v61, %v429_v63 }
  0x11   :  { %257 = vmatpush.bf16.msra.mxu1 %v464_v45  ;;  %271 = vmatpush.bf16.msra.mxu2 %v468_v46  ;;  %v436_v6 = vor.u32 %v533_v1, %v435_v0  ;;  %v411_v7 = vld [vmem:[%s800_s1 + $0x20] sm:$0xf]  ;;  %v528_v8 = vld [vmem:[%s800_s1 + $0x2c] sm:$0xf0]  ;;  %v526_v9 = vld [vmem:[%s800_s1 + $0x24] sm:$0xf]  ;;  %v440_v10 = vor.u32 %v531_v2, %v437_v3 }
  0x12   :  { %285 = vmatpush.bf16.msra.mxu3 %v472_v50  ;;  %v413_v11 = vld [vmem:[%s800_s1 + $0x30] sm:$0xf0]  ;;  %v419_v12 = vld [vmem:[%s800_s1 + $0x28] sm:$0xf]  ;;  %v529_v13 = vld [vmem:[%s800_s1 + $0x34] sm:$0xf0]  ;;  %v412_v16 = vor.u32 %v528_v8, %v411_v7 }
  0x13   :  { %v527_v14 = vld [vmem:[%s800_s1 + $0x2c] sm:$0xf]  ;;  %v421_v15 = vld [vmem:[%s800_s1 + $0x38] sm:$0xf0]  ;;  %v416_v17 = vor.u32 %v526_v9, %v413_v11  ;;  %v420_v18 = vor.u32 %v529_v13, %v419_v12  ;;  %v395_v19 = vld [vmem:[%s800_s1] sm:$0xf] }
  0x14   :  { %244 = vmatpush.bf16.msra.mxu0 %v444_v56  ;;  %v524_v20 = vld [vmem:[%s800_s1 + $0xc] sm:$0xf0]  ;;  %v522_v21 = vld [vmem:[%s800_s1 + $0x4] sm:$0xf]  ;;  %v424_v22 = vor.u32 %v527_v14, %v421_v15  ;;  %v397_v23 = vld [vmem:[%s800_s1 + $0x10] sm:$0xf0] }
  0x15   :  { %258 = vmatpush.bf16.msra.mxu1 %v448_v57  ;;  %272 = vmatpush.bf16.msra.mxu2 %v452_v58  ;;  %v403_v24 = vld [vmem:[%s800_s1 + $0x8] sm:$0xf]  ;;  %v525_v25 = vld [vmem:[%s800_s1 + $0x14] sm:$0xf0]  ;;  %v523_v26 = vld [vmem:[%s800_s1 + $0xc] sm:$0xf]  ;;  %v396_v28 = vor.u32 %v524_v20, %v395_v19  ;;  %v400_v29 = vor.u32 %v522_v21, %v397_v23 }
  0x16   :  { %286 = vmatpush.bf16.msra.mxu3 %v456_v62  ;;  %v405_v27 = vld [vmem:[%s800_s1 + $0x18] sm:$0xf0]  ;;  %v404_v30 = vor.u32 %v525_v25, %v403_v24  ;;  %v521_v32 = vld [vmem:[%s801_s0] sm:$0xff] }
  0x17   :  { %v408_v31 = vor.u32 %v523_v26, %v405_v27  ;;  %v323_v33 = vld [vmem:[%s802_s2] sm:$0xf] }
  0x18   :  { %245 = vmatpush.bf16.msra.mxu0 %v428_v4  ;;  %v341_v34 = vld [vmem:[%s803_s3] sm:$0xf]  ;;  %v325_v35 = vperm.slane %v323_v33, 0  ;;  %v326_v37 = vperm.slane %v323_v33, 1  ;;  %v327_v48 = vperm.slane %v323_v33, 2  ;;  %v328_v50 = vperm.slane %v323_v33, 3 }
  0x19   :  { %259 = vmatpush.bf16.msra.mxu1 %v432_v5  ;;  %273 = vmatpush.bf16.msra.mxu2 %v436_v6  ;;  %v359_v36 = vld [vmem:[%s804_s4] sm:$0xf]  ;;  %v343_v38 = vperm.slane %v341_v34, 0  ;;  %v344_v40 = vperm.slane %v341_v34, 1  ;;  %v345_v52 = vperm.slane %v341_v34, 2  ;;  %v346_v54 = vperm.slane %v341_v34, 3 }
  0x1a   :  { %287 = vmatpush.bf16.msra.mxu3 %v440_v10  ;;  %v361_v42 = vperm.slane %v359_v36, 0  ;;  %v362_v45 = vperm.slane %v359_v36, 1  ;;  %v363_v57 = vperm.slane %v359_v36, 2  ;;  %v364_v61 = vperm.slane %v359_v36, 3 }
  0x1c   :  { %246 = vmatpush.bf16.msra.mxu0 %v412_v16 }
  0x1d   :  { %260 = vmatpush.bf16.msra.mxu1 %v416_v17  ;;  %274 = vmatpush.bf16.msra.mxu2 %v420_v18 }
  0x1e   :  { %288 = vmatpush.bf16.msra.mxu3 %v424_v22 }
  0x20   :  { %247 = vmatpush.bf16.msra.mxu0 %v396_v28 }
  0x21   :  { %261 = vmatpush.bf16.msra.mxu1 %v400_v29  ;;  %275 = vmatpush.bf16.msra.mxu2 %v404_v30 }
  0x22   :  { %289 = vmatpush.bf16.msra.mxu3 %v408_v31 }
  0x23   :  { %248 = vmatmul.bf16.vlgmr.msra.gmra.mxu0 %v521_v32 }
  0x24   :  { %262 = vmatmul.bf16.vlgmr.msra.gmra.mxu1 %v521_v32  ;;  %276 = vmatmul.bf16.vlgmr.msra.gmra.mxu2 %v521_v32 }
  0x25   :  { %290 = vmatmul.bf16.vlgmr.msra.gmra.mxu3 %v521_v32 }
  0xa0   :  { %v249_v39 = vpop.f32.mrf.mxu0 }
  0xa1   :  { %v333_v41 = vadd.f32 %v325_v35, %v249_v39  ;;  %v263_v43 = vpop.f32.mrf.mxu1 }
  0xa2   :  { %v334_v44 = vadd.f32 %v326_v37, %v263_v43 }
  0xa3   :  { %v351_v46 = vmul.f32 %v343_v38, %v333_v41 }
  0xa4   :  { %v352_v47 = vmul.f32 %v344_v40, %v334_v44 }
  0xa5   :  { %v369_v49 = vadd.f32 %v361_v42, %v351_v46 }
  0xa6   :  { %v370_v51 = vadd.f32 %v362_v45, %v352_v47 }
  0xa7   :  { %v277_v53 = vpop.f32.mrf.mxu2 }
  0xa8   :  { %v377_v55 = vpack.c.bf16 %v370_v51, %v369_v49  ;;  %v335_v56 = vadd.f32 %v327_v48, %v277_v53  ;;  %v291_v58 = vpop.f32.mrf.mxu3  ;;  %v251_v59 = vpop.f32.mrf.mxu0 }
  0xa9   :  { %v336_v60 = vadd.f32 %v328_v50, %v291_v58  ;;  %v337_v62 = vadd.f32 %v325_v35, %v251_v59  ;;  %v265_v63 = vpop.f32.mrf.mxu1 }
  0xaa   :  { %381 = vst [vmem:[%s805_s5] sm:$0xff] %v377_v55  ;;  %v353_v0 = vmul.f32 %v345_v52, %v335_v56  ;;  %v338_v1 = vadd.f32 %v326_v37, %v265_v63 }
  0xab   :  { %v354_v2 = vmul.f32 %v346_v54, %v336_v60  ;;  %v355_v3 = vmul.f32 %v343_v38, %v337_v62 }
  0xac   :  { %v371_v4 = vadd.f32 %v363_v57, %v353_v0  ;;  %v356_v5 = vmul.f32 %v344_v40, %v338_v1 }
  0xad   :  { %v372_v6 = vadd.f32 %v364_v61, %v354_v2  ;;  %v373_v7 = vadd.f32 %v361_v42, %v355_v3 }
  0xae   :  { %v374_v8 = vadd.f32 %v362_v45, %v356_v5 }
  0xaf   :  { %v378_v9 = vpack.c.bf16 %v372_v6, %v371_v4  ;;  %v279_v10 = vpop.f32.mrf.mxu2 }
  0xb0   :  { %v379_v11 = vpack.c.bf16 %v374_v8, %v373_v7  ;;  %v339_v12 = vadd.f32 %v327_v48, %v279_v10  ;;  %v293_v13 = vpop.f32.mrf.mxu3 }
  0xb1   :  { %382 = vst [vmem:[%s805_s5 + $0x8] sm:$0xff] %v378_v9  ;;  %v340_v14 = vadd.f32 %v328_v50, %v293_v13 }
  0xb2   :  { %383 = vst [vmem:[%s805_s5 + $0x10] sm:$0xff] %v379_v11  ;;  %v357_v15 = vmul.f32 %v345_v52, %v339_v12 }
  0xb3   :  { %v358_v16 = vmul.f32 %v346_v54, %v340_v14 }
  0xb4   :  { %v375_v17 = vadd.f32 %v363_v57, %v357_v15 }
  0xb5   :  { %v376_v18 = vadd.f32 %v364_v61, %v358_v16 }
  0xb7   :  { %v380_v19 = vpack.c.bf16 %v376_v18, %v375_v17 }
  0xb9   :  { %384 = vst [vmem:[%s805_s5 + $0x18] sm:$0xff] %v380_v19 }

// kernel: vae_forward.11
= control target key start
LH: loop header
LB: loop body
LE: loop exit
PB: predicated region body
PF: predicated region fallthrough
CT: control target
= control target key end

     0   :  { %s2075_s18 = smov 0   ;;  %s2077_s19 = smov 0   ;;  %s2724_s0 = inlined_call_operand.vmem [shape: bf16[512,128], index: 0, kind: input, shape index: {}]   ;;  %s2725_s1 = inlined_call_operand.vmem [shape: bf16[128,128], index: 1, kind: input, shape index: {}]   ;;  %s2726_s2 = inlined_call_operand.vmem [shape: f32[1,128], index: 2, kind: input, shape index: {}]   ;;  %s2727_s3 = inlined_call_operand.vmem [shape: f32[1,128], index: 3, kind: input, shape index: {}]   ;;  %s2728_s4 = inlined_call_operand.vmem [shape: f32[1,128], index: 4, kind: input, shape index: {}]   ;;  %s2729_s5 = inlined_call_operand.vmem [shape: f32[512,128], index: 5, kind: output, shape index: {}]  }
   0x1   :  { %s2079_s20 = smov 0  }
   0x2 LB: > { %s34_s21 = sadd.s32 1, %s2039_s19  ;;  %p1680_p0 = scmp.ge.s32.totalorder %s2043_s20, 1  ;;  %s2043_s20 = sphi %s2079_s20, %s15_s20   ;;  %s2039_s19 = sphi %s2077_s19, %s2775_s19   ;;  %s2035_s18 = sphi %s2075_s18, %s2774_s18  }
   0x3   : > { %p36_p1 = scmp.ge.s32.totalorder %s34_s21, 2  ;;  %p254_p2 = scmp.lt.s32.totalorder %s2043_s20, 3 }
   0x5   : > { %s2777_s21 = smov (%p36_p1, %s34_s21), 0  ;;  %p255_p3 = pnand %p1680_p0, %p254_p2 }
   0x6   : > { %s1681_s30 = sshll.u32 (!%p255_p3), %s2035_s18, 5 }
   0x7   : > { %258 = sbr.rel (%p255_p3) target bundleno = 340 (0x154), region = 40  ;;  %p306_p4 = scmp.lt.s32.totalorder (!%p255_p3), %s1681_s30, 63 }
   0xc   : > { %v1838_v0 = vld [vmem:[%s2725_s1 + $0x38] sm:$0xff]  ;;  %v1837_v1 = vld [vmem:[%s2725_s1 + $0x30] sm:$0xff]  ;;  %v1836_v2 = vld [vmem:[%s2725_s1 + $0x28] sm:$0xff]  ;;  %s2779_s30 = smov (!%p306_p4, %s1681_s30), 63 }
   0xd   : > { %601 = vmatpush.bf16.msra.mxu0 %v1838_v0  ;;  %1839 = vmatpush.bf16.msra.mxu1 %v1838_v0  ;;  %v1835_v3 = vld [vmem:[%s2725_s1 + $0x20] sm:$0xff]  ;;  %v1834_v4 = vld [vmem:[%s2725_s1 + $0x18] sm:$0xff]  ;;  %v1833_v5 = vld [vmem:[%s2725_s1 + $0x10] sm:$0xff]  ;;  %s1682_s12 = sshll.u32 %s2779_s30, 2  ;;  %s1684_s27 = sshll.u32 %s2779_s30, 3 }
   0xe   : > { %1840 = vmatpush.bf16.msra.mxu2 %v1838_v0  ;;  %1841 = vmatpush.bf16.msra.mxu3 %v1838_v0  ;;  %v1832_v6 = vld [vmem:[%s2725_s1 + $0x8] sm:$0xff]  ;;  %v1831_v7 = vld [vmem:[%s2725_s1] sm:$0xff]  ;;  %s2126_s17 = scalar_lea.vmem %s2724_s0, %s1682_s12  ;;  %s2231_s30 = scalar_lea.vmem %s2729_s5, %s1684_s27 }
   0xf   : > { %v1815_v8 = vld [vmem:[%s2126_s17] sm:$0xff]  ;;  %v1816_v12 = vld [vmem:[%s2126_s17 + $0x8] sm:$0xff]  ;;  %v1817_v16 = vld [vmem:[%s2126_s17 + $0x10] sm:$0xff] }
  0x10   : > { %v1819_v9 = vld [vmem:[%s2126_s17 + $0x20] sm:$0xff]  ;;  %v1820_v13 = vld [vmem:[%s2126_s17 + $0x28] sm:$0xff]  ;;  %v1821_v17 = vld [vmem:[%s2126_s17 + $0x30] sm:$0xff] }
  0x11   : > { %602 = vmatpush.bf16.msra.mxu0 %v1837_v1  ;;  %1842 = vmatpush.bf16.msra.mxu1 %v1837_v1  ;;  %v1823_v10 = vld [vmem:[%s2126_s17 + $0x40] sm:$0xff]  ;;  %v1824_v14 = vld [vmem:[%s2126_s17 + $0x48] sm:$0xff]  ;;  %v1825_v18 = vld [vmem:[%s2126_s17 + $0x50] sm:$0xff] }
  0x12   : > { %1843 = vmatpush.bf16.msra.mxu2 %v1837_v1  ;;  %1844 = vmatpush.bf16.msra.mxu3 %v1837_v1  ;;  %v1827_v11 = vld [vmem:[%s2126_s17 + $0x60] sm:$0xff]  ;;  %v1828_v15 = vld [vmem:[%s2126_s17 + $0x68] sm:$0xff]  ;;  %v1829_v19 = vld [vmem:[%s2126_s17 + $0x70] sm:$0xff] }
  0x13   : > { %v1818_v20 = vld [vmem:[%s2126_s17 + $0x18] sm:$0xff]  ;;  %v2147_v24 = vld [vmem:[%s2726_s2] ss:$0 sm:$0xff] }
  0x14   : > { %v1822_v21 = vld [vmem:[%s2126_s17 + $0x38] sm:$0xff]  ;;  %v2152_v25 = vld [vmem:[%s2727_s3] ss:$0 sm:$0xff] }
  0x15   : > { %603 = vmatpush.bf16.msra.mxu0 %v1836_v2  ;;  %1845 = vmatpush.bf16.msra.mxu1 %v1836_v2  ;;  %v1826_v22 = vld [vmem:[%s2126_s17 + $0x58] sm:$0xff]  ;;  %v2158_v29 = vld [vmem:[%s2728_s4] ss:$0 sm:$0xff] }
  0x16   : > { %1846 = vmatpush.bf16.msra.mxu2 %v1836_v2  ;;  %1847 = vmatpush.bf16.msra.mxu3 %v1836_v2  ;;  %v1830_v23 = vld [vmem:[%s2126_s17 + $0x78] sm:$0xff] }
  0x19   : > { %604 = vmatpush.bf16.msra.mxu0 %v1835_v3  ;;  %1848 = vmatpush.bf16.msra.mxu1 %v1835_v3 }
  0x1a   : > { %1849 = vmatpush.bf16.msra.mxu2 %v1835_v3  ;;  %1850 = vmatpush.bf16.msra.mxu3 %v1835_v3 }
  0x1d   : > { %605 = vmatpush.bf16.msra.mxu0 %v1834_v4  ;;  %1851 = vmatpush.bf16.msra.mxu1 %v1834_v4 }
  0x1e   : > { %1852 = vmatpush.bf16.msra.mxu2 %v1834_v4  ;;  %1853 = vmatpush.bf16.msra.mxu3 %v1834_v4 }
  0x21   : > { %606 = vmatpush.bf16.msra.mxu0 %v1833_v5  ;;  %1854 = vmatpush.bf16.msra.mxu1 %v1833_v5 }
  0x22   : > { %1855 = vmatpush.bf16.msra.mxu2 %v1833_v5  ;;  %1856 = vmatpush.bf16.msra.mxu3 %v1833_v5 }
  0x25   : > { %607 = vmatpush.bf16.msra.mxu0 %v1832_v6  ;;  %1857 = vmatpush.bf16.msra.mxu1 %v1832_v6 }
  0x26   : > { %1858 = vmatpush.bf16.msra.mxu2 %v1832_v6  ;;  %1859 = vmatpush.bf16.msra.mxu3 %v1832_v6 }
  0x29   : > { %608 = vmatpush.bf16.msra.mxu0 %v1831_v7  ;;  %1860 = vmatpush.bf16.msra.mxu1 %v1831_v7 }
  0x2a   : > { %1861 = vmatpush.bf16.msra.mxu2 %v1831_v7  ;;  %1862 = vmatpush.bf16.msra.mxu3 %v1831_v7 }
  0x2c   : > { %609 = vmatmul.bf16.vlgmr.msra.gmra.mxu0 %v1815_v8  ;;  %629 = vmatmul.bf16.vlgmr.msra.gmra.mxu1 %v1819_v9 }
  0x2d   : > { %649 = vmatmul.bf16.vlgmr.msra.gmra.mxu2 %v1823_v10  ;;  %669 = vmatmul.bf16.vlgmr.msra.gmra.mxu3 %v1827_v11 }
  0x3c   : > { %614 = vmatmul.bf16.gmra.mxu0 %v1816_v12  ;;  %634 = vmatmul.bf16.gmra.mxu1 %v1820_v13 }
  0x3d   : > { %654 = vmatmul.bf16.gmra.mxu2 %v1824_v14  ;;  %674 = vmatmul.bf16.gmra.mxu3 %v1828_v15 }
  0x4c   : > { %619 = vmatmul.bf16.gmra.mxu0 %v1817_v16  ;;  %639 = vmatmul.bf16.gmra.mxu1 %v1821_v17 }
  0x4d   : > { %659 = vmatmul.bf16.gmra.mxu2 %v1825_v18  ;;  %679 = vmatmul.bf16.gmra.mxu3 %v1829_v19 }
  0x5c   : > { %624 = vmatmul.bf16.gmra.mxu0 %v1818_v20  ;;  %644 = vmatmul.bf16.gmra.mxu1 %v1822_v21 }
  0x5d   : > { %664 = vmatmul.bf16.gmra.mxu2 %v1826_v22  ;;  %684 = vmatmul.bf16.gmra.mxu3 %v1830_v23 }
  0xa9   : > { %v610_v26 = vpop.f32.mrf.mxu0  ;;  %v630_v27 = vpop.f32.mrf.mxu1 }
  0xaa   : > { %v793_v28 = vadd.f32 %v2147_v24, %v610_v26  ;;  %v801_v30 = vadd.f32 %v2147_v24, %v630_v27 }
  0xac   : > { %v829_v31 = vmul.f32 %v2152_v25, %v793_v28  ;;  %v837_v32 = vmul.f32 %v2152_v25, %v801_v30 }
  0xae   : > { %v865_v33 = vadd.f32 %v2158_v29, %v829_v31  ;;  %v873_v34 = vadd.f32 %v2158_v29, %v837_v32 }
  0xb0   : > { %v1781_v35 = vmul.f32 -1.442695, %v865_v33  ;;  %v1789_v36 = vmul.f32 -1.442695, %v873_v34  ;;  %v650_v37 = vpop.f32.mrf.mxu2  ;;  %v670_v38 = vpop.f32.mrf.mxu3 }
  0xb1   : > { %v809_v39 = vadd.f32 %v2147_v24, %v650_v37  ;;  %v817_v40 = vadd.f32 %v2147_v24, %v670_v38  ;;  %v612_v41 = vpop.f32.mrf.mxu0  ;;  %v632_v42 = vpop.f32.mrf.mxu1 }
  0xb2   : > { %1890 = vpow2.f32 %v1781_v35  ;;  %v794_v43 = vadd.f32 %v2147_v24, %v612_v41  ;;  %v802_v44 = vadd.f32 %v2147_v24, %v632_v42 }
  0xb3   : > { %1892 = vpow2.f32 %v1789_v36  ;;  %v845_v45 = vmul.f32 %v2152_v25, %v809_v39  ;;  %v853_v46 = vmul.f32 %v2152_v25, %v817_v40 }
  0xb4   : > { %v830_v47 = vmul.f32 %v2152_v25, %v794_v43  ;;  %v838_v48 = vmul.f32 %v2152_v25, %v802_v44 }
  0xb5   : > { %v881_v49 = vadd.f32 %v2158_v29, %v845_v45  ;;  %v889_v50 = vadd.f32 %v2158_v29, %v853_v46 }
  0xb6   : > { %v866_v51 = vadd.f32 %v2158_v29, %v830_v47  ;;  %v874_v52 = vadd.f32 %v2158_v29, %v838_v48 }
  0xb7   : > { %v1797_v53 = vmul.f32 -1.442695, %v881_v49  ;;  %v1805_v54 = vmul.f32 -1.442695, %v889_v50 }
  0xb8   : > { %v1891_v55 = vpop.eup %1890  ;;  %v652_v56 = vpop.f32.mrf.mxu2  ;;  %v1782_v59 = vmul.f32 -1.442695, %v866_v51  ;;  %v1790_v0 = vmul.f32 -1.442695, %v874_v52 }
  0xb9   : > { %v1893_v57 = vpop.eup %1892  ;;  %v2177_v58 = vadd.f32 1.0, %v1891_v55  ;;  %1894 = vpow2.f32 %v1797_v53  ;;  %v810_v60 = vadd.f32 %v2147_v24, %v652_v56  ;;  %v672_v61 = vpop.f32.mrf.mxu3 }
  0xba   : > { %v615_v62 = vpop.f32.mrf.mxu0  ;;  %v2180_v63 = vadd.f32 1.0, %v1893_v57  ;;  %1896 = vpow2.f32 %v1805_v54  ;;  %v635_v1 = vpop.f32.mrf.mxu1  ;;  %v818_v2 = vadd.f32 %v2147_v24, %v672_v61 }
  0xbb   : > { %1898 = vrcp.f32 %v2177_v58  ;;  %v795_v3 = vadd.f32 %v2147_v24, %v615_v62  ;;  %v846_v4 = vmul.f32 %v2152_v25, %v810_v60  ;;  %v803_v5 = vadd.f32 %v2147_v24, %v635_v1 }
  0xbc   : > { %1900 = vrcp.f32 %v2180_v63  ;;  %v1034_v6 = vand.u32 2147483647, %v2177_v58  ;;  %v1036_v7 = vand.u32 2147483648, %v2177_v58  ;;  %v1154_v9 = vand.u32 2147483647, %v2180_v63 }
  0xbd   : > { %1902 = vpow2.f32 %v1782_v59  ;;  %v1156_v10 = vand.u32 2147483648, %v2180_v63  ;;  %v882_v11 = vadd.f32 %v2158_v29, %v846_v4  ;;  %v854_v14 = vmul.f32 %v2152_v25, %v818_v2 }
  0xbe   : > { %1904 = vpow2.f32 %v1790_v0  ;;  %v831_v15 = vmul.f32 %v2152_v25, %v795_v3  ;;  %vm1030_vm0 = vweird.f32 %v2177_v58  ;;  %vm1150_vm1 = vweird.f32 %v2180_v63 }
  0xbf   : > { %v1895_v8 = vpop.eup %1894  ;;  %v839_v18 = vmul.f32 %v2152_v25, %v803_v5  ;;  %vm2203_vm2 = vcmp.eq.f32.partialorder %v1034_v6, 8.507059e+37  ;;  %v1037_v22 = vor.u32 1.1754944e-38, %v1036_v7  ;;  %vm2209_vm3 = vcmp.eq.f32.partialorder %v1154_v9, 8.507059e+37 }
  0xc0   : > { %v1897_v12 = vpop.eup %1896  ;;  %v2193_v13 = vadd.f32 1.0, %v1895_v8  ;;  %v1157_v28 = vor.u32 1.1754944e-38, %v1156_v10  ;;  %v1798_v30 = vmul.f32 -1.442695, %v882_v11  ;;  %v890_v33 = vadd.f32 %v2158_v29, %v854_v14 }
  0xc1   : > { %v1899_v16 = vpop.eup %1898  ;;  %v2199_v17 = vadd.f32 1.0, %v1897_v12  ;;  %v867_v34 = vadd.f32 %v2158_v29, %v831_v15  ;;  %v875_v37 = vadd.f32 %v2158_v29, %v839_v18 }
  0xc2   : > { %v1901_v19 = vpop.eup %1900  ;;  %v1026_v20 = vmul.f32 %v1899_v16, %v2177_v58  ;;  %1906 = vrcp.f32 %v2193_v13  ;;  %vm1031_vm4 = vweird.f32 %v1899_v16  ;;  %v1274_v36 = vand.u32 2147483647, %v2193_v13 }
  0xc3   : > { %v1903_v23 = vpop.eup %1902  ;;  %v1146_v26 = vmul.f32 %v1901_v19, %v2180_v63  ;;  %1908 = vrcp.f32 %v2199_v17  ;;  %v1276_v39 = vand.u32 2147483648, %v2193_v13  ;;  %vm1151_vm5 = vweird.f32 %v1901_v19  ;;  %vm1032_vm7 = vmor %vm1030_vm0, %vm1031_vm4 }
  0xc4   : > { %v1905_v31 = vpop.eup %1904  ;;  %v1027_v32 = vsub.f32 1.0, %v1026_v20  ;;  %v2220_v40 = vadd.f32 1.0, %v1903_v23  ;;  %vm1270_vm6 = vweird.f32 %v2193_v13  ;;  %1910 = vpow2.f32 %v1798_v30  ;;  %vm1152_vm9 = vmor %vm1150_vm1, %vm1151_vm5  ;;  %v675_v20 = vpop.f32.mrf.mxu3 }
  0xc5   : > { %v1147_v35 = vsub.f32 1.0, %v1146_v26  ;;  %v2222_v41 = vadd.f32 1.0, %v1905_v31  ;;  %v1394_v45 = vand.u32 2147483647, %v2199_v17  ;;  %v1396_v46 = vand.u32 2147483648, %v2199_v17 }
  0xc6   : > { %v1028_v38 = vmul.f32 %v1899_v16, %v1027_v32  ;;  %1912 = vrcp.f32 %v2220_v40  ;;  %vm1390_vm8 = vweird.f32 %v2199_v17  ;;  %v1806_v49 = vmul.f32 -1.442695, %v890_v33 }
  0xc7   : > { %v1148_v42 = vmul.f32 %v1901_v19, %v1147_v35  ;;  %vm2241_vm10 = vcmp.eq.f32.partialorder %v1274_v36, 8.507059e+37  ;;  %v1277_v53 = vor.u32 1.1754944e-38, %v1276_v39  ;;  %1914 = vrcp.f32 %v2222_v41 }
  0xc8   : > { %v1907_v43 = vpop.eup %1906  ;;  %v1029_v44 = vadd.f32 %v1899_v16, %v1028_v38  ;;  %vm2252_vm11 = vcmp.eq.f32.partialorder %v1394_v45, 8.507059e+37  ;;  %v1397_v60 = vor.u32 1.1754944e-38, %v1396_v46  ;;  %v1049_v61 = vand.u32 2147483647, %v2220_v40 }
  0xc9   : > { %v1149_v47 = vadd.f32 %v1901_v19, %v1148_v42  ;;  %v1266_v48 = vmul.f32 %v1907_v43, %v2193_v13  ;;  %v1909_v50 = vpop.eup %1908  ;;  %vm1271_vm12 = vweird.f32 %v1907_v43  ;;  %1916 = vpow2.f32 %v1806_v49 }
  0xca   : > { %v1033_v51 = vsel %vm1032_vm7, %v1899_v16, %v1029_v44  ;;  %v1386_v57 = vmul.f32 %v1909_v50, %v2199_v17  ;;  %v1911_v62 = vpop.eup %1910  ;;  %vm1391_vm13 = vweird.f32 %v1909_v50  ;;  %vm1045_vm14 = vweird.f32 %v2220_v40  ;;  %vm1272_vm15 = vmor %vm1270_vm6, %vm1271_vm12 }
  0xcb   : > { %v1038_v54 = vsel %vm2203_vm2, %v1037_v22, %v1033_v51  ;;  %v1153_v55 = vsel %vm1152_vm9, %v1901_v19, %v1149_v47  ;;  %v1267_v56 = vsub.f32 1.0, %v1266_v48  ;;  %v1051_v2 = vand.u32 2147483648, %v2220_v40  ;;  %vm1392_vm2 = vmor %vm1390_vm8, %vm1391_vm13  ;;  %v655_v19 = vpop.f32.mrf.mxu2 }
  0xcc   : > { %1505 = vst [vmem:[%s2231_s30] sm:$0xff] %v1038_v54  ;;  %v1158_v58 = vsel %vm2209_vm3, %v1157_v28, %v1153_v55  ;;  %v1387_v0 = vsub.f32 1.0, %v1386_v57  ;;  %v1913_v1 = vpop.eup %1912  ;;  %v2260_v3 = vadd.f32 1.0, %v1911_v62  ;;  %v1783_v7 = vmul.f32 -1.442695, %v867_v34  ;;  %v637_v55 = vpop.f32.mrf.mxu1 }
  0xcd   : > { %1513 = vst [vmem:[%s2231_s30 + $0x40] sm:$0xff] %v1158_v58  ;;  %v1268_v63 = vmul.f32 %v1907_v43, %v1267_v56  ;;  %v1041_v6 = vmul.f32 %v1913_v1, %v2220_v40  ;;  %v1915_v8 = vpop.eup %1914  ;;  %vm2265_vm0 = vcmp.eq.f32.partialorder %v1049_v61, 8.507059e+37  ;;  %vm1165_vm1 = vweird.f32 %v2222_v41 }
  0xce   : > { %v1388_v5 = vmul.f32 %v1909_v50, %v1387_v0  ;;  %1918 = vrcp.f32 %v2260_v3  ;;  %v1791_v10 = vmul.f32 -1.442695, %v875_v37  ;;  %v1161_v15 = vmul.f32 %v1915_v8, %v2222_v41  ;;  %v617_v37 = vpop.f32.mrf.mxu0 }
  0xcf   : > { %v1269_v4 = vadd.f32 %v1907_v43, %v1268_v63  ;;  %v1042_v14 = vsub.f32 1.0, %v1041_v6  ;;  %vm1046_vm3 = vweird.f32 %v1913_v1  ;;  %v1169_v13 = vand.u32 2147483647, %v2222_v41  ;;  %v1917_v21 = vpop.eup %1916 }
  0xd0   : > { %v1389_v12 = vadd.f32 %v1909_v50, %v1388_v5  ;;  %v1171_v18 = vand.u32 2147483648, %v2222_v41  ;;  %v1162_v26 = vsub.f32 1.0, %v1161_v15  ;;  %1920 = vpow2.f32 %v1783_v7  ;;  %vm1047_vm5 = vmor %vm1045_vm14, %vm1046_vm3 }
  0xd1   : > { %v1273_v11 = vsel %vm1272_vm15, %v1907_v43, %v1269_v4  ;;  %v1043_v23 = vmul.f32 %v1913_v1, %v1042_v14  ;;  %vm1166_vm4 = vweird.f32 %v1915_v8  ;;  %v2282_v17 = vadd.f32 1.0, %v1917_v21  ;;  %v677_v14 = vpop.f32.mrf.mxu3 }
  0xd2   : > { %v1278_v16 = vsel %vm2241_vm10, %v1277_v53, %v1273_v11  ;;  %v1393_v22 = vsel %vm1392_vm2, %v1909_v50, %v1389_v12  ;;  %1922 = vpow2.f32 %v1791_v10  ;;  %v1163_v30 = vmul.f32 %v1915_v8, %v1162_v26  ;;  %vm1167_vm8 = vmor %vm1165_vm1, %vm1166_vm4 }
  0xd3   : > { %1521 = vst [vmem:[%s2231_s30 + $0x80] sm:$0xff] %v1278_v16  ;;  %v1398_v27 = vsel %vm2252_vm11, %v1397_v60, %v1393_v22  ;;  %v1044_v28 = vadd.f32 %v1913_v1, %v1043_v23  ;;  %v811_v31 = vadd.f32 %v2147_v24, %v655_v19  ;;  %v819_v32 = vadd.f32 %v2147_v24, %v675_v20  ;;  %v657_v9 = vpop.f32.mrf.mxu2 }
  0xd4   : > { %1529 = vst [vmem:[%s2231_s30 + $0xc0] sm:$0xff] %v1398_v27  ;;  %v1919_v33 = vpop.eup %1918  ;;  %v1052_v34 = vor.u32 1.1754944e-38, %v1051_v2  ;;  %vm2290_vm6 = vcmp.eq.f32.partialorder %v1169_v13, 8.507059e+37  ;;  %v1172_v36 = vor.u32 1.1754944e-38, %v1171_v18  ;;  %1924 = vrcp.f32 %v2282_v17 }
  0xd5   : > { %v1048_v38 = vsel %vm1047_vm5, %v1913_v1, %v1044_v28  ;;  %v1164_v39 = vadd.f32 %v1915_v8, %v1163_v30  ;;  %v1281_v42 = vmul.f32 %v1919_v33, %v2260_v3  ;;  %vm1285_vm7 = vweird.f32 %v2260_v3 }
  0xd6   : > { %v1053_v40 = vsel %vm2265_vm0, %v1052_v34, %v1048_v38  ;;  %v1289_v43 = vand.u32 2147483647, %v2260_v3  ;;  %v1291_v44 = vand.u32 2147483648, %v2260_v3  ;;  %v847_v45 = vmul.f32 %v2152_v25, %v811_v31  ;;  %v1921_v46 = vpop.eup %1920  ;;  %v620_v31 = vpop.f32.mrf.mxu0 }
  0xd7   : > { %1506 = vst [vmem:[%s2231_s30 + $0x8] sm:$0xff] %v1053_v40  ;;  %v1168_v47 = vsel %vm1167_vm8, %v1915_v8, %v1164_v39  ;;  %v1282_v48 = vsub.f32 1.0, %v1281_v42  ;;  %v855_v49 = vmul.f32 %v2152_v25, %v819_v32  ;;  %v796_v50 = vadd.f32 %v2147_v24, %v617_v37 }
  0xd8   : > { %v1923_v51 = vpop.eup %1922  ;;  %v1173_v41 = vsel %vm2290_vm6, %v1172_v36, %v1168_v47  ;;  %v1409_v52 = vand.u32 2147483647, %v2282_v17  ;;  %v1411_v53 = vand.u32 2147483648, %v2282_v17  ;;  %v2312_v54 = vadd.f32 1.0, %v1921_v46 }
  0xd9   : > { %1514 = vst [vmem:[%s2231_s30 + $0x48] sm:$0xff] %v1173_v41  ;;  %v1283_v56 = vmul.f32 %v1919_v33, %v1282_v48  ;;  %vm1286_vm9 = vweird.f32 %v1919_v33  ;;  %v2315_v57 = vadd.f32 1.0, %v1923_v51  ;;  %v883_v58 = vadd.f32 %v2158_v29, %v847_v45 }
  0xda   : > { %v1925_v59 = vpop.eup %1924  ;;  %vm2318_vm10 = vcmp.eq.f32.partialorder %v1289_v43, 8.507059e+37  ;;  %1926 = vrcp.f32 %v2312_v54  ;;  %v891_v61 = vadd.f32 %v2158_v29, %v855_v49  ;;  %v832_v62 = vmul.f32 %v2152_v25, %v796_v50  ;;  %vm1287_vm11 = vmor %vm1285_vm7, %vm1286_vm9  ;;  %v640_v50 = vpop.f32.mrf.mxu1 }
  0xdb   : > { %v1284_v63 = vadd.f32 %v1919_v33, %v1283_v56  ;;  %v1401_v0 = vmul.f32 %v1925_v59, %v2282_v17  ;;  %1928 = vrcp.f32 %v2315_v57  ;;  %v804_v1 = vadd.f32 %v2147_v24, %v637_v55 }
  0xdc   : > { %v1292_v2 = vor.u32 1.1754944e-38, %v1291_v44  ;;  %vm1405_vm12 = vweird.f32 %v2282_v17  ;;  %vm2331_vm13 = vcmp.eq.f32.partialorder %v1409_v52, 8.507059e+37  ;;  %v1412_v5 = vor.u32 1.1754944e-38, %v1411_v53 }
  0xdd   : > { %v1288_v6 = vsel %vm1287_vm11, %v1919_v33, %v1284_v63  ;;  %v1402_v7 = vsub.f32 1.0, %v1401_v0  ;;  %vm1060_vm14 = vweird.f32 %v2312_v54  ;;  %v1799_v8 = vmul.f32 -1.442695, %v883_v58 }
  0xde   : > { %v1293_v10 = vsel %vm2318_vm10, %v1292_v2, %v1288_v6  ;;  %v1064_v3 = vand.u32 2147483647, %v2312_v54  ;;  %v1807_v11 = vmul.f32 -1.442695, %v891_v61  ;;  %v868_v12 = vadd.f32 %v2158_v29, %v832_v62 }
  0xdf   : > { %1522 = vst [vmem:[%s2231_s30 + $0x88] sm:$0xff] %v1293_v10  ;;  %v1403_v15 = vmul.f32 %v1925_v59, %v1402_v7  ;;  %vm1406_vm15 = vweird.f32 %v1925_v59  ;;  %1930 = vpow2.f32 %v1799_v8  ;;  %v840_v16 = vmul.f32 %v2152_v25, %v804_v1 }
  0xe0   : > { %v1927_v13 = vpop.eup %1926  ;;  %v1066_v18 = vand.u32 2147483648, %v2312_v54  ;;  %1932 = vpow2.f32 %v1807_v11  ;;  %v1784_v19 = vmul.f32 -1.442695, %v868_v12  ;;  %v812_v20 = vadd.f32 %v2147_v24, %v657_v9  ;;  %vm1407_vm0 = vmor %vm1405_vm12, %vm1406_vm15 }
  0xe1   : > { %v1929_v21 = vpop.eup %1928  ;;  %v1404_v22 = vadd.f32 %v1925_v59, %v1403_v15  ;;  %v1056_v23 = vmul.f32 %v1927_v13, %v2312_v54  ;;  %v876_v26 = vadd.f32 %v2158_v29, %v840_v16  ;;  %v820_v27 = vadd.f32 %v2147_v24, %v677_v14 }
  0xe2   : > { %v1176_v28 = vmul.f32 %v1929_v21, %v2315_v57  ;;  %vm1180_vm1 = vweird.f32 %v2315_v57  ;;  %1934 = vpow2.f32 %v1784_v19  ;;  %v848_v30 = vmul.f32 %v2152_v25, %v812_v20 }
  0xe3   : > { %v1408_v32 = vsel %vm1407_vm0, %v1925_v59, %v1404_v22  ;;  %v1057_v33 = vsub.f32 1.0, %v1056_v23  ;;  %v1186_v34 = vand.u32 2147483648, %v2315_v57  ;;  %v1792_v35 = vmul.f32 -1.442695, %v876_v26 }
  0xe4   : > { %v1413_v36 = vsel %vm2331_vm13, %v1412_v5, %v1408_v32  ;;  %vm1061_vm2 = vweird.f32 %v1927_v13  ;;  %v1177_v17 = vsub.f32 1.0, %v1176_v28  ;;  %v884_v37 = vadd.f32 %v2158_v29, %v848_v30 }
  0xe5   : > { %v1931_v38 = vpop.eup %1930  ;;  %1530 = vst [vmem:[%s2231_s30 + $0xc8] sm:$0xff] %v1413_v36  ;;  %v1058_v39 = vmul.f32 %v1927_v13, %v1057_v33  ;;  %1936 = vpow2.f32 %v1792_v35  ;;  %v856_v42 = vmul.f32 %v2152_v25, %v820_v27  ;;  %v797_v40 = vadd.f32 %v2147_v24, %v620_v31  ;;  %vm1062_vm5 = vmor %vm1060_vm14, %vm1061_vm2  ;;  %v660_v31 = vpop.f32.mrf.mxu2 }
  0xe6   : > { %v1933_v43 = vpop.eup %1932  ;;  %v1178_v44 = vmul.f32 %v1929_v21, %v1177_v17  ;;  %vm1181_vm3 = vweird.f32 %v1929_v21  ;;  %v1184_v45 = vand.u32 2147483647, %v2315_v57  ;;  %v2360_v46 = vadd.f32 1.0, %v1931_v38 }
  0xe7   : > { %v1059_v47 = vadd.f32 %v1927_v13, %v1058_v39  ;;  %vm1065_vm4 = vcmp.eq.f32.partialorder %v1064_v3, 8.507059e+37  ;;  %v1067_v48 = vor.u32 1.1754944e-38, %v1066_v18  ;;  %v2362_v49 = vadd.f32 1.0, %v1933_v43  ;;  %vm1182_vm6 = vmor %vm1180_vm1, %vm1181_vm3 }
  0xe8   : > { %v1935_v51 = vpop.eup %1934  ;;  %v1179_v41 = vadd.f32 %v1929_v21, %v1178_v44  ;;  %v1187_v52 = vor.u32 1.1754944e-38, %v1186_v34  ;;  %1938 = vrcp.f32 %v2360_v46  ;;  %v1800_v53 = vmul.f32 -1.442695, %v884_v37  ;;  %v680_v37 = vpop.f32.mrf.mxu3 }
  0xe9   : > { %v1063_v55 = vsel %vm1062_vm5, %v1927_v13, %v1059_v47  ;;  %1940 = vrcp.f32 %v2362_v49  ;;  %v892_v56 = vadd.f32 %v2158_v29, %v856_v42  ;;  %v833_v58 = vmul.f32 %v2152_v25, %v797_v40 }
  0xea   : > { %v1068_v54 = vsel %vm1065_vm4, %v1067_v48, %v1063_v55  ;;  %v1183_v59 = vsel %vm1182_vm6, %v1929_v21, %v1179_v41  ;;  %vm1185_vm7 = vcmp.eq.f32.partialorder %v1184_v45, 8.507059e+37  ;;  %v805_v60 = vadd.f32 %v2147_v24, %v640_v50  ;;  %v622_v41 = vpop.f32.mrf.mxu0 }
  0xeb   : > { %v1937_v61 = vpop.eup %1936  ;;  %1507 = vst [vmem:[%s2231_s30 + $0x10] sm:$0xff] %v1068_v54  ;;  %v1188_v62 = vsel %vm1185_vm7, %v1187_v52, %v1183_v59  ;;  %v1304_v63 = vand.u32 2147483647, %v2360_v46  ;;  %v1306_v0 = vand.u32 2147483648, %v2360_v46  ;;  %v2378_v57 = vadd.f32 1.0, %v1935_v51 }
  0xec   : > { %1515 = vst [vmem:[%s2231_s30 + $0x50] sm:$0xff] %v1188_v62  ;;  %v1424_v1 = vand.u32 2147483647, %v2362_v49  ;;  %v1426_v2 = vand.u32 2147483648, %v2362_v49  ;;  %v2383_v4 = vadd.f32 1.0, %v1937_v61  ;;  %1942 = vpow2.f32 %v1800_v53 }
  0xed   : > { %1944 = vrcp.f32 %v2378_v57  ;;  %v1808_v5 = vmul.f32 -1.442695, %v892_v56  ;;  %v869_v6 = vadd.f32 %v2158_v29, %v833_v58  ;;  %vm1300_vm8 = vweird.f32 %v2360_v46 }
  0xee   : > { %v1939_v7 = vpop.eup %1938  ;;  %1946 = vrcp.f32 %v2383_v4  ;;  %v841_v8 = vmul.f32 %v2152_v25, %v805_v60  ;;  %vm2391_vm9 = vcmp.eq.f32.partialorder %v1304_v63, 8.507059e+37  ;;  %v1307_v11 = vor.u32 1.1754944e-38, %v1306_v0 }
  0xef   : > { %v1941_v9 = vpop.eup %1940  ;;  %v1296_v10 = vmul.f32 %v1939_v7, %v2360_v46  ;;  %vm1420_vm10 = vweird.f32 %v2362_v49  ;;  %vm2397_vm11 = vcmp.eq.f32.partialorder %v1424_v1, 8.507059e+37  ;;  %v1427_v15 = vor.u32 1.1754944e-38, %v1426_v2 }
  0xf0   : > { %v1416_v12 = vmul.f32 %v1941_v9, %v2362_v49  ;;  %v1079_v16 = vand.u32 2147483647, %v2378_v57  ;;  %v1081_v13 = vand.u32 2147483648, %v2378_v57  ;;  %v1199_v19 = vand.u32 2147483647, %v2383_v4 }
  0xf1   : > { %v1297_v18 = vsub.f32 1.0, %v1296_v10  ;;  %1948 = vpow2.f32 %v1808_v5  ;;  %v1785_v20 = vmul.f32 -1.442695, %v869_v6  ;;  %vm1301_vm12 = vweird.f32 %v1939_v7 }
  0xf2   : > { %v1943_v21 = vpop.eup %1942  ;;  %v1417_v22 = vsub.f32 1.0, %v1416_v12  ;;  %vm1075_vm13 = vweird.f32 %v2378_v57  ;;  %v1201_v23 = vand.u32 2147483648, %v2383_v4  ;;  %v877_v26 = vadd.f32 %v2158_v29, %v841_v8  ;;  %vm1302_vm2 = vmor %vm1300_vm8, %vm1301_vm12 }
  0xf3   : > { %v1945_v27 = vpop.eup %1944  ;;  %v1298_v28 = vmul.f32 %v1939_v7, %v1297_v18  ;;  %vm1421_vm14 = vweird.f32 %v1941_v9  ;;  %vm1195_vm15 = vweird.f32 %v2383_v4  ;;  %v2408_v30 = vadd.f32 1.0, %v1943_v21 }
  0xf4   : > { %1950 = vpow2.f32 %v1785_v20  ;;  %v1947_v32 = vpop.eup %1946  ;;  %v1418_v33 = vmul.f32 %v1941_v9, %v1417_v22  ;;  %v1071_v34 = vmul.f32 %v1945_v27, %v2378_v57  ;;  %vm2411_vm0 = vcmp.eq.f32.partialorder %v1079_v16, 8.507059e+37  ;;  %vm1422_vm3 = vmor %vm1420_vm10, %vm1421_vm14  ;;  %v642_v16 = vpop.f32.mrf.mxu1 }
  0xf5   : > { %v1082_v36 = vor.u32 1.1754944e-38, %v1081_v13  ;;  %v1793_v17 = vmul.f32 -1.442695, %v877_v26  ;;  %v1299_v38 = vadd.f32 %v1939_v7, %v1298_v28  ;;  %v1191_v39 = vmul.f32 %v1947_v32, %v2383_v4 }
  0xf6   : > { %vm2416_vm1 = vcmp.eq.f32.partialorder %v1199_v19, 8.507059e+37  ;;  %1952 = vrcp.f32 %v2408_v30  ;;  %v1419_v40 = vadd.f32 %v1941_v9, %v1418_v33  ;;  %v1072_v43 = vsub.f32 1.0, %v1071_v34 }
  0xf7   : > { %v1202_v44 = vor.u32 1.1754944e-38, %v1201_v23  ;;  %v813_v45 = vadd.f32 %v2147_v24, %v660_v31  ;;  %v1949_v47 = vpop.eup %1948  ;;  %v1303_v48 = vsel %vm1302_vm2, %v1939_v7, %v1299_v38  ;;  %v1192_v50 = vsub.f32 1.0, %v1191_v39 }
  0xf8   : > { %1954 = vpow2.f32 %v1793_v17  ;;  %v821_v51 = vadd.f32 %v2147_v24, %v680_v37  ;;  %v1308_v46 = vsel %vm2391_vm9, %v1307_v11, %v1303_v48  ;;  %v1423_v52 = vsel %vm1422_vm3, %v1941_v9, %v1419_v40  ;;  %v662_v17 = vpop.f32.mrf.mxu2  ;;  %v682_v40 = vpop.f32.mrf.mxu3 }
  0xf9   : > { %v1073_v53 = vmul.f32 %v1945_v27, %v1072_v43  ;;  %vm1076_vm4 = vweird.f32 %v1945_v27  ;;  %1523 = vst [vmem:[%s2231_s30 + $0x90] sm:$0xff] %v1308_v46  ;;  %v1428_v56 = vsel %vm2397_vm11, %v1427_v15, %v1423_v52  ;;  %v1193_v58 = vmul.f32 %v1947_v32, %v1192_v50 }
  0xfa   : > { %v1951_v55 = vpop.eup %1950  ;;  %vm1196_vm5 = vweird.f32 %v1947_v32  ;;  %v2434_v49 = vadd.f32 1.0, %v1949_v47  ;;  %1531 = vst [vmem:[%s2231_s30 + $0xd0] sm:$0xff] %v1428_v56  ;;  %v1319_v59 = vand.u32 2147483647, %v2408_v30  ;;  %v798_v61 = vadd.f32 %v2147_v24, %v622_v41  ;;  %vm1077_vm6 = vmor %vm1075_vm13, %vm1076_vm4 }
  0xfb   : > { %v1074_v54 = vadd.f32 %v1945_v27, %v1073_v53  ;;  %v2438_v60 = vadd.f32 1.0, %v1951_v55  ;;  %v1194_v63 = vadd.f32 %v1947_v32, %v1193_v58  ;;  %vm1315_vm7 = vweird.f32 %v2408_v30  ;;  %vm1197_vm8 = vmor %vm1195_vm15, %vm1196_vm5 }
  0xfc   : > { %v1953_v62 = vpop.eup %1952  ;;  %1956 = vrcp.f32 %v2434_v49  ;;  %v849_v0 = vmul.f32 %v2152_v25, %v813_v45  ;;  %v1321_v5 = vand.u32 2147483648, %v2408_v30  ;;  %v857_v57 = vmul.f32 %v2152_v25, %v821_v51 }
  0xfd   : > { %v1078_v1 = vsel %vm1077_vm6, %v1945_v27, %v1074_v54  ;;  %v1311_v2 = vmul.f32 %v1953_v62, %v2408_v30  ;;  %v1198_v8 = vsel %vm1197_vm8, %v1947_v32, %v1194_v63  ;;  %v1441_v9 = vand.u32 2147483648, %v2434_v49  ;;  %v625_v30 = vpop.f32.mrf.mxu0 }
  0xfe   : > { %v1955_v6 = vpop.eup %1954  ;;  %v1083_v7 = vsel %vm2411_vm0, %v1082_v36, %v1078_v1  ;;  %1958 = vrcp.f32 %v2438_v60  ;;  %v1203_v4 = vsel %vm2416_vm1, %v1202_v44, %v1198_v8  ;;  %vm2458_vm9 = vcmp.eq.f32.partialorder %v1319_v59, 8.507059e+37 }
  0xff   : > { %1508 = vst [vmem:[%s2231_s30 + $0x18] sm:$0xff] %v1083_v7  ;;  %v1312_v10 = vsub.f32 1.0, %v1311_v2  ;;  %v1439_v11 = vand.u32 2147483647, %v2434_v49  ;;  %vm1316_vm10 = vweird.f32 %v1953_v62  ;;  %v1096_v12 = vand.u32 2147483648, %v2438_v60 }
 0x100   : > { %1516 = vst [vmem:[%s2231_s30 + $0x58] sm:$0xff] %v1203_v4  ;;  %v2465_v14 = vadd.f32 1.0, %v1955_v6  ;;  %v885_v15 = vadd.f32 %v2158_v29, %v849_v0  ;;  %v1094_v18 = vand.u32 2147483647, %v2438_v60  ;;  %v893_v19 = vadd.f32 %v2158_v29, %v857_v57  ;;  %vm1317_vm14 = vmor %vm1315_vm7, %vm1316_vm10  ;;  %v665_v28 = vpop.f32.mrf.mxu2 }
 0x101   : > { %v1313_v13 = vmul.f32 %v1953_v62, %v1312_v10  ;;  %v834_v20 = vmul.f32 %v2152_v25, %v798_v61  ;;  %v1322_v22 = vor.u32 1.1754944e-38, %v1321_v5  ;;  %vm1435_vm11 = vweird.f32 %v2434_v49 }
 0x102   : > { %v1957_v21 = vpop.eup %1956  ;;  %v1442_v23 = vor.u32 1.1754944e-38, %v1441_v9  ;;  %1960 = vrcp.f32 %v2465_v14  ;;  %vm2474_vm12 = vcmp.eq.f32.partialorder %v1439_v11, 8.507059e+37  ;;  %vm1090_vm13 = vweird.f32 %v2438_v60 }
 0x103   : > { %v1314_v26 = vadd.f32 %v1953_v62, %v1313_v13  ;;  %v1431_v27 = vmul.f32 %v1957_v21, %v2434_v49  ;;  %v806_v31 = vadd.f32 %v2147_v24, %v642_v16  ;;  %v1097_v33 = vor.u32 1.1754944e-38, %v1096_v12 }
 0x104   : > { %v1959_v32 = vpop.eup %1958  ;;  %v1801_v34 = vmul.f32 -1.442695, %v885_v15  ;;  %v1809_v35 = vmul.f32 -1.442695, %v893_v19  ;;  %v870_v36 = vadd.f32 %v2158_v29, %v834_v20  ;;  %vm2485_vm15 = vcmp.eq.f32.partialorder %v1094_v18, 8.507059e+37 }
 0x105   : > { %v1318_v37 = vsel %vm1317_vm14, %v1953_v62, %v1314_v26  ;;  %v1432_v38 = vsub.f32 1.0, %v1431_v27  ;;  %v1086_v39 = vmul.f32 %v1959_v32, %v2438_v60  ;;  %vm1210_vm0 = vweird.f32 %v2465_v14  ;;  %v645_v27 = vpop.f32.mrf.mxu1 }
 0x106   : > { %v1323_v43 = vsel %vm2458_vm9, %v1322_v22, %v1318_v37  ;;  %vm1436_vm1 = vweird.f32 %v1957_v21  ;;  %v1214_v44 = vand.u32 2147483647, %v2465_v14  ;;  %1962 = vpow2.f32 %v1801_v34 }
 0x107   : > { %1524 = vst [vmem:[%s2231_s30 + $0x98] sm:$0xff] %v1323_v43  ;;  %v1433_v45 = vmul.f32 %v1957_v21, %v1432_v38  ;;  %v1087_v47 = vsub.f32 1.0, %v1086_v39  ;;  %1964 = vpow2.f32 %v1809_v35  ;;  %v1786_v48 = vmul.f32 -1.442695, %v870_v36  ;;  %vm1437_vm3 = vmor %vm1435_vm11, %vm1436_vm1  ;;  %v685_v36 = vpop.f32.mrf.mxu3 }
 0x108   : > { %v1961_v50 = vpop.eup %1960  ;;  %v842_v51 = vmul.f32 %v2152_v25, %v806_v31  ;;  %v814_v41 = vadd.f32 %v2147_v24, %v662_v17  ;;  %v822_v46 = vadd.f32 %v2147_v24, %v682_v40  ;;  %v799_v52 = vadd.f32 %v2147_v24, %v625_v30  ;;  %v2555_v30 = vld [vmem:[%s2726_s2] ss:$0 sm:$0xff] }
 0x109   : > { %v1434_v53 = vadd.f32 %v1957_v21, %v1433_v45  ;;  %v1088_v55 = vmul.f32 %v1959_v32, %v1087_v47  ;;  %vm1091_vm2 = vweird.f32 %v1959_v32  ;;  %v1206_v56 = vmul.f32 %v1961_v50, %v2465_v14 }
 0x10a   : > { %v1216_v58 = vand.u32 2147483648, %v2465_v14  ;;  %1966 = vpow2.f32 %v1786_v48  ;;  %v878_v54 = vadd.f32 %v2158_v29, %v842_v51  ;;  %v850_v59 = vmul.f32 %v2152_v25, %v814_v41  ;;  %vm1092_vm4 = vmor %vm1090_vm13, %vm1091_vm2 }
 0x10b   : > { %v1438_v61 = vsel %vm1437_vm3, %v1957_v21, %v1434_v53  ;;  %v1089_v62 = vadd.f32 %v1959_v32, %v1088_v55  ;;  %v1207_v24 = vsub.f32 1.0, %v1206_v56  ;;  %v858_v63 = vmul.f32 %v2152_v25, %v822_v46 }
 0x10c   : > { %v1963_v0 = vpop.eup %1962  ;;  %v1443_v1 = vsel %vm2474_vm12, %v1442_v23, %v1438_v61  ;;  %v1794_v49 = vmul.f32 -1.442695, %v878_v54  ;;  %v886_v2 = vadd.f32 %v2158_v29, %v850_v59  ;;  %v835_v5 = vmul.f32 %v2152_v25, %v799_v52  ;;  %v2576_v61 = vld [vmem:[%s2727_s3] ss:$0 sm:$0xff] }
 0x10d   : > { %v1965_v57 = vpop.eup %1964  ;;  %1532 = vst [vmem:[%s2231_s30 + $0xd8] sm:$0xff] %v1443_v1  ;;  %v1093_v6 = vsel %vm1092_vm4, %v1959_v32, %v1089_v62  ;;  %v1208_v7 = vmul.f32 %v1961_v50, %v1207_v24  ;;  %vm1211_vm5 = vweird.f32 %v1961_v50  ;;  %v2513_v8 = vadd.f32 1.0, %v1963_v0 }
 0x10e   : > { %v1098_v9 = vsel %vm2485_vm15, %v1097_v33, %v1093_v6  ;;  %v2517_v4 = vadd.f32 1.0, %v1965_v57  ;;  %1968 = vpow2.f32 %v1794_v49  ;;  %v1802_v60 = vmul.f32 -1.442695, %v886_v2  ;;  %vm1212_vm6 = vmor %vm1210_vm0, %vm1211_vm5 }
 0x10f   : > { %1509 = vst [vmem:[%s2231_s30 + $0x20] sm:$0xff] %v1098_v9  ;;  %v1209_v10 = vadd.f32 %v1961_v50, %v1208_v7  ;;  %1970 = vrcp.f32 %v2513_v8  ;;  %v1217_v3 = vor.u32 1.1754944e-38, %v1216_v58  ;;  %v894_v11 = vadd.f32 %v2158_v29, %v858_v63 }
 0x110   : > { %v1967_v25 = vpop.eup %1966  ;;  %1972 = vrcp.f32 %v2517_v4  ;;  %v871_v12 = vadd.f32 %v2158_v29, %v835_v5  ;;  %vm1215_vm7 = vcmp.eq.f32.partialorder %v1214_v44, 8.507059e+37  ;;  %v1334_v18 = vand.u32 2147483647, %v2513_v8 }
 0x111   : > { %v1213_v15 = vsel %vm1212_vm6, %v1961_v50, %v1209_v10  ;;  %v2526_v16 = vadd.f32 1.0, %v1967_v25  ;;  %v1336_v19 = vand.u32 2147483648, %v2513_v8  ;;  %1974 = vpow2.f32 %v1802_v60 }
 0x112   : > { %v1218_v13 = vsel %vm1215_vm7, %v1217_v3, %v1213_v15  ;;  %v1454_v14 = vand.u32 2147483647, %v2517_v4  ;;  %v1456_v20 = vand.u32 2147483648, %v2517_v4  ;;  %v1810_v22 = vmul.f32 -1.442695, %v894_v11 }
 0x113   : > { %1517 = vst [vmem:[%s2231_s30 + $0x60] sm:$0xff] %v1218_v13  ;;  %1976 = vrcp.f32 %v2526_v16  ;;  %v1787_v29 = vmul.f32 -1.442695, %v871_v12  ;;  %vm1330_vm8 = vweird.f32 %v2513_v8  ;;  %vm1450_vm9 = vweird.f32 %v2517_v4  ;;  %v2611_v15 = vld [vmem:[%s2728_s4] ss:$0 sm:$0xff] }
 0x114   : > { %v1969_v21 = vpop.eup %1968  ;;  %vm2539_vm10 = vcmp.eq.f32.partialorder %v1334_v18, 8.507059e+37  ;;  %v1337_v34 = vor.u32 1.1754944e-38, %v1336_v19  ;;  %v1109_v35 = vand.u32 2147483647, %v2526_v16  ;;  %1978 = vpow2.f32 %v1810_v22 }
 0x115   : > { %v1971_v23 = vpop.eup %1970  ;;  %v2536_v26 = vadd.f32 1.0, %v1969_v21  ;;  %vm2545_vm11 = vcmp.eq.f32.partialorder %v1454_v14, 8.507059e+37  ;;  %v1457_v38 = vor.u32 1.1754944e-38, %v1456_v20  ;;  %v1111_v39 = vand.u32 2147483648, %v2526_v16 }
 0x116   : > { %v1973_v31 = vpop.eup %1972  ;;  %v1326_v32 = vmul.f32 %v1971_v23, %v2513_v8  ;;  %vm1105_vm12 = vweird.f32 %v2526_v16  ;;  %v807_v43 = vadd.f32 %v2555_v30, %v645_v27  ;;  %v815_v44 = vadd.f32 %v2555_v30, %v665_v28 }
 0x117   : > { %v1446_v17 = vmul.f32 %v1973_v31, %v2517_v4  ;;  %1980 = vrcp.f32 %v2536_v26  ;;  %v1975_v42 = vpop.eup %1974  ;;  %vm1331_vm13 = vweird.f32 %v1971_v23  ;;  %v2562_v50 = vadd.f32 %v2555_v30, %v685_v36 }
 0x118   : > { %v1327_v40 = vsub.f32 1.0, %v1326_v32  ;;  %1982 = vpow2.f32 %v1787_v29  ;;  %v2559_v48 = vadd.f32 1.0, %v1975_v42  ;;  %vm2565_vm14 = vcmp.eq.f32.partialorder %v1109_v35, 8.507059e+37  ;;  %vm1332_vm1 = vmor %vm1330_vm8, %vm1331_vm13  ;;  %v627_v29 = vpop.f32.mrf.mxu0 }
 0x119   : > { %v1977_v45 = vpop.eup %1976  ;;  %v1447_v47 = vsub.f32 1.0, %v1446_v17  ;;  %v1229_v52 = vand.u32 2147483647, %v2536_v26  ;;  %v1231_v53 = vand.u32 2147483648, %v2536_v26  ;;  %vm1451_vm15 = vweird.f32 %v1973_v31 }
 0x11a   : > { %v1328_v51 = vmul.f32 %v1971_v23, %v1327_v40  ;;  %v1101_v41 = vmul.f32 %v1977_v45, %v2526_v16  ;;  %v1112_v56 = vor.u32 1.1754944e-38, %v1111_v39  ;;  %1984 = vrcp.f32 %v2559_v48  ;;  %v1979_v58 = vpop.eup %1978  ;;  %vm1452_vm3 = vmor %vm1450_vm9, %vm1451_vm15  ;;  %v667_v39 = vpop.f32.mrf.mxu2 }
 0x11b   : > { %v1448_v55 = vmul.f32 %v1973_v31, %v1447_v47  ;;  %vm1225_vm0 = vweird.f32 %v2536_v26  ;;  %v843_v62 = vmul.f32 %v2576_v61, %v807_v43  ;;  %vm1106_vm2 = vweird.f32 %v1977_v45 }
 0x11c   : > { %v1329_v54 = vadd.f32 %v1971_v23, %v1328_v51  ;;  %v1102_v59 = vsub.f32 1.0, %v1101_v41  ;;  %v2582_v0 = vadd.f32 1.0, %v1979_v58  ;;  %v851_v1 = vmul.f32 %v2576_v61, %v815_v44  ;;  %vm1107_vm5 = vmor %vm1105_vm12, %vm1106_vm2 }
 0x11d   : > { %v1981_v24 = vpop.eup %1980  ;;  %v1449_v63 = vadd.f32 %v1973_v31, %v1448_v55  ;;  %vm2589_vm4 = vcmp.eq.f32.partialorder %v1229_v52, 8.507059e+37  ;;  %v1232_v7 = vor.u32 1.1754944e-38, %v1231_v53  ;;  %v1349_v60 = vand.u32 2147483647, %v2559_v48  ;;  %v687_v52 = vpop.f32.mrf.mxu3 }
 0x11e   : > { %v1983_v49 = vpop.eup %1982  ;;  %v1333_v2 = vsel %vm1332_vm1, %v1971_v23, %v1329_v54  ;;  %v1103_v5 = vmul.f32 %v1977_v45, %v1102_v59  ;;  %v1221_v57 = vmul.f32 %v1981_v24, %v2536_v26  ;;  %v1351_v10 = vand.u32 2147483648, %v2559_v48 }
 0x11f   : > { %v1338_v8 = vsel %vm2539_vm10, %v1337_v34, %v1333_v2  ;;  %v1453_v9 = vsel %vm1452_vm3, %v1973_v31, %v1449_v63  ;;  %1986 = vrcp.f32 %v2582_v0  ;;  %vm1345_vm6 = vweird.f32 %v2559_v48 }
 0x120   : > { %1525 = vst [vmem:[%s2231_s30 + $0xa0] sm:$0xff] %v1338_v8  ;;  %v1458_v4 = vsel %vm2545_vm11, %v1457_v38, %v1453_v9  ;;  %v1104_v25 = vadd.f32 %v1977_v45, %v1103_v5  ;;  %v1222_v3 = vsub.f32 1.0, %v1221_v57  ;;  %v1985_v11 = vpop.eup %1984  ;;  %v2606_v12 = vadd.f32 1.0, %v1983_v49  ;;  %v647_v38 = vpop.f32.mrf.mxu1 }
 0x121   : > { %1533 = vst [vmem:[%s2231_s30 + $0xe0] sm:$0xff] %v1458_v4  ;;  %v879_v13 = vadd.f32 %v2611_v15, %v843_v62  ;;  %v887_v18 = vadd.f32 %v2611_v15, %v851_v1  ;;  %vm1226_vm7 = vweird.f32 %v1981_v24  ;;  %v1341_v16 = vmul.f32 %v1985_v11, %v2559_v48 }
 0x122   : > { %v1108_v19 = vsel %vm1107_vm5, %v1977_v45, %v1104_v25  ;;  %v1223_v14 = vmul.f32 %v1981_v24, %v1222_v3  ;;  %v1469_v21 = vand.u32 2147483647, %v2582_v0  ;;  %v1471_v22 = vand.u32 2147483648, %v2582_v0  ;;  %vm1227_vm9 = vmor %vm1225_vm0, %vm1226_vm7 }
 0x123   : > { %v1113_v20 = vsel %vm2565_vm14, %v1112_v56, %v1108_v19  ;;  %1988 = vrcp.f32 %v2606_v12  ;;  %v1342_v27 = vsub.f32 1.0, %v1341_v16  ;;  %vm2622_vm8 = vcmp.eq.f32.partialorder %v1349_v60, 8.507059e+37 }
 0x124   : > { %1510 = vst [vmem:[%s2231_s30 + $0x28] sm:$0xff] %v1113_v20  ;;  %v1224_v23 = vadd.f32 %v1981_v24, %v1223_v14  ;;  %v1352_v31 = vor.u32 1.1754944e-38, %v1351_v10  ;;  %vm1465_vm10 = vweird.f32 %v2582_v0  ;;  %v1795_v32 = vmul.f32 -1.442695, %v879_v13 }
 0x125   : > { %v1803_v33 = vmul.f32 -1.442695, %v887_v18  ;;  %v859_v34 = vmul.f32 %v2576_v61, %v2562_v50  ;;  %v1987_v35 = vpop.eup %1986  ;;  %v1343_v17 = vmul.f32 %v1985_v11, %v1342_v27  ;;  %vm1346_vm11 = vweird.f32 %v1985_v11 }
 0x126   : > { %v1228_v36 = vsel %vm1227_vm9, %v1981_v24, %v1224_v23  ;;  %v800_v37 = vadd.f32 %v2555_v30, %v627_v29  ;;  %v1461_v42 = vmul.f32 %v1987_v35, %v2582_v0  ;;  %vm2635_vm12 = vcmp.eq.f32.partialorder %v1469_v21, 8.507059e+37  ;;  %vm1347_vm14 = vmor %vm1345_vm6, %vm1346_vm11 }
 0x127   : > { %v1233_v26 = vsel %vm2589_vm4, %v1232_v7, %v1228_v36  ;;  %v1472_v43 = vor.u32 1.1754944e-38, %v1471_v22  ;;  %vm1120_vm13 = vweird.f32 %v2606_v12  ;;  %v1344_v44 = vadd.f32 %v1985_v11, %v1343_v17 }
 0x128   : > { %1518 = vst [vmem:[%s2231_s30 + $0x68] sm:$0xff] %v1233_v26  ;;  %1990 = vpow2.f32 %v1795_v32  ;;  %v895_v45 = vadd.f32 %v2611_v15, %v859_v34  ;;  %v836_v47 = vmul.f32 %v2576_v61, %v800_v37  ;;  %v1462_v51 = vsub.f32 1.0, %v1461_v42 }
 0x129   : > { %v1989_v50 = vpop.eup %1988  ;;  %1992 = vpow2.f32 %v1803_v33  ;;  %v808_v41 = vadd.f32 %v2555_v30, %v647_v38  ;;  %v816_v46 = vadd.f32 %v2555_v30, %v667_v39  ;;  %v1348_v53 = vsel %vm1347_vm14, %v1985_v11, %v1344_v44 }
 0x12a   : > { %vm1466_vm15 = vweird.f32 %v1987_v35  ;;  %v1116_v55 = vmul.f32 %v1989_v50, %v2606_v12  ;;  %v1811_v56 = vmul.f32 -1.442695, %v895_v45  ;;  %v1353_v58 = vsel %vm2622_vm8, %v1352_v31, %v1348_v53 }
 0x12b   : > { %v1463_v54 = vmul.f32 %v1987_v35, %v1462_v51  ;;  %v872_v59 = vadd.f32 %v2611_v15, %v836_v47  ;;  %v844_v48 = vmul.f32 %v2576_v61, %v808_v41  ;;  %1526 = vst [vmem:[%s2231_s30 + $0xa8] sm:$0xff] %v1353_v58  ;;  %v852_v24 = vmul.f32 %v2576_v61, %v816_v46  ;;  %vm1467_vm0 = vmor %vm1465_vm10, %vm1466_vm15 }
 0x12c   : > { %v1117_v62 = vsub.f32 1.0, %v1116_v55  ;;  %1994 = vpow2.f32 %v1811_v56  ;;  %v824_v63 = vadd.f32 %v2555_v30, %v687_v52  ;;  %v1126_v49 = vand.u32 2147483648, %v2606_v12 }
 0x12d   : > { %v1464_v1 = vadd.f32 %v1987_v35, %v1463_v54  ;;  %v1788_v2 = vmul.f32 -1.442695, %v872_v59  ;;  %v880_v5 = vadd.f32 %v2611_v15, %v844_v48  ;;  %vm1121_vm1 = vweird.f32 %v1989_v50 }
 0x12e   : > { %v1991_v57 = vpop.eup %1990  ;;  %v1118_v6 = vmul.f32 %v1989_v50, %v1117_v62  ;;  %v1124_v7 = vand.u32 2147483647, %v2606_v12  ;;  %v888_v8 = vadd.f32 %v2611_v15, %v852_v24  ;;  %v860_v10 = vmul.f32 %v2576_v61, %v824_v63  ;;  %vm1122_vm2 = vmor %vm1120_vm13, %vm1121_vm1 }
 0x12f   : > { %v1993_v9 = vpop.eup %1992  ;;  %v1468_v30 = vsel %vm1467_vm0, %v1987_v35, %v1464_v1  ;;  %v1007_v60 = vadd.f32 1.0, %v1991_v57  ;;  %1996 = vpow2.f32 %v1788_v2  ;;  %v1796_v0 = vmul.f32 -1.442695, %v880_v5 }
 0x130   : > { %v1473_v4 = vsel %vm2635_vm12, %v1472_v43, %v1468_v30  ;;  %v1119_v25 = vadd.f32 %v1989_v50, %v1118_v6  ;;  %v1015_v3 = vadd.f32 1.0, %v1993_v9  ;;  %v1127_v11 = vor.u32 1.1754944e-38, %v1126_v49 }
 0x131   : > { %1534 = vst [vmem:[%s2231_s30 + $0xe8] sm:$0xff] %v1473_v4  ;;  %1998 = vrcp.f32 %v1007_v60  ;;  %v1804_v13 = vmul.f32 -1.442695, %v888_v8  ;;  %vm1125_vm3 = vcmp.eq.f32.partialorder %v1124_v7, 8.507059e+37  ;;  %v896_v16 = vadd.f32 %v2611_v15, %v860_v10 }
 0x132   : > { %v1995_v18 = vpop.eup %1994  ;;  %v1123_v19 = vsel %vm1122_vm2, %v1989_v50, %v1119_v25  ;;  %2000 = vrcp.f32 %v1015_v3  ;;  %v1244_v27 = vand.u32 2147483647, %v1007_v60  ;;  %v1246_v33 = vand.u32 2147483648, %v1007_v60 }
 0x133   : > { %v1128_v14 = vsel %vm1125_vm3, %v1127_v11, %v1123_v19  ;;  %v2670_v61 = vadd.f32 1.0, %v1995_v18  ;;  %2002 = vpow2.f32 %v1796_v0  ;;  %v1812_v22 = vmul.f32 -1.442695, %v896_v16 }
 0x134   : > { %1511 = vst [vmem:[%s2231_s30 + $0x30] sm:$0xff] %v1128_v14  ;;  %2004 = vpow2.f32 %v1804_v13  ;;  %v1364_v34 = vand.u32 2147483647, %v1015_v3  ;;  %vm1240_vm4 = vweird.f32 %v1007_v60  ;;  %v1366_v36 = vand.u32 2147483648, %v1015_v3 }
 0x135   : > { %v1997_v20 = vpop.eup %1996  ;;  %2006 = vrcp.f32 %v2670_v61  ;;  %vm1360_vm6 = vweird.f32 %v1015_v3  ;;  %vm1245_vm8 = vcmp.eq.f32.partialorder %v1244_v27, 8.507059e+37  ;;  %v1247_v43 = vor.u32 1.1754944e-38, %v1246_v33 }
 0x136   : > { %v2674_v21 = vadd.f32 1.0, %v1997_v20  ;;  %vm2683_vm9 = vcmp.eq.f32.partialorder %v1364_v34, 8.507059e+37  ;;  %v1367_v50 = vor.u32 1.1754944e-38, %v1366_v36  ;;  %v1484_v52 = vand.u32 2147483647, %v2670_v61 }
 0x137   : > { %v1999_v12 = vpop.eup %1998  ;;  %v1486_v53 = vand.u32 2147483648, %v2670_v61  ;;  %vm1480_vm13 = vweird.f32 %v2670_v61 }
 0x138   : > { %v2001_v29 = vpop.eup %2000  ;;  %v1236_v23 = vmul.f32 %v1999_v12, %v1007_v60  ;;  %2008 = vrcp.f32 %v2674_v21  ;;  %vm1241_vm5 = vweird.f32 %v1999_v12  ;;  %v1139_v63 = vand.u32 2147483647, %v2674_v21 }
 0x139   : > { %v1356_v28 = vmul.f32 %v2001_v29, %v1015_v3  ;;  %v2003_v31 = vpop.eup %2002  ;;  %2010 = vpow2.f32 %v1812_v22  ;;  %vm1361_vm7 = vweird.f32 %v2001_v29  ;;  %vm1242_vm10 = vmor %vm1240_vm4, %vm1241_vm5  ;;  %v1141_v1 = vand.u32 2147483648, %v2674_v21 }
 0x13a   : > { %v1237_v32 = vsub.f32 1.0, %v1236_v23  ;;  %v2005_v15 = vpop.eup %2004  ;;  %v2677_v17 = vadd.f32 1.0, %v2003_v31  ;;  %vm1362_vm11 = vmor %vm1360_vm6, %vm1361_vm7  ;;  %v1487_v2 = vor.u32 1.1754944e-38, %v1486_v53  ;;  %vm1485_vm0 = vcmp.eq.f32.partialorder %v1484_v52, 8.507059e+37 }
 0x13b   : > { %v1357_v35 = vsub.f32 1.0, %v1356_v28  ;;  %v2007_v37 = vpop.eup %2006  ;;  %v2679_v39 = vadd.f32 1.0, %v2005_v15  ;;  %vm1135_vm1 = vweird.f32 %v2674_v21  ;;  %vm1140_vm3 = vcmp.eq.f32.partialorder %v1139_v63, 8.507059e+37 }
 0x13c   : > { %v1238_v38 = vmul.f32 %v1999_v12, %v1237_v32  ;;  %v1476_v42 = vmul.f32 %v2007_v37, %v2670_v61  ;;  %2012 = vrcp.f32 %v2677_v17  ;;  %vm1481_vm12 = vweird.f32 %v2007_v37 }
 0x13d   : > { %v1358_v26 = vmul.f32 %v2001_v29, %v1357_v35  ;;  %2014 = vrcp.f32 %v2679_v39  ;;  %vm1482_vm14 = vmor %vm1480_vm13, %vm1481_vm12  ;;  %v1142_v10 = vor.u32 1.1754944e-38, %v1141_v1  ;;  %v1259_v4 = vand.u32 2147483647, %v2677_v17 }
 0x13e   : > { %v1239_v40 = vadd.f32 %v1999_v12, %v1238_v38  ;;  %v2009_v45 = vpop.eup %2008  ;;  %v1477_v51 = vsub.f32 1.0, %v1476_v42  ;;  %v1261_v25 = vand.u32 2147483648, %v2677_v17  ;;  %vm1255_vm5 = vweird.f32 %v2677_v17 }
 0x13f   : > { %v1359_v47 = vadd.f32 %v2001_v29, %v1358_v26  ;;  %v2011_v41 = vpop.eup %2010  ;;  %v1131_v55 = vmul.f32 %v2009_v45, %v2674_v21  ;;  %vm1136_vm15 = vweird.f32 %v2009_v45  ;;  %v1381_v18 = vand.u32 2147483648, %v2679_v39 }
 0x140   : > { %v1243_v46 = vsel %vm1242_vm10, %v1999_v12, %v1239_v40  ;;  %v1478_v54 = vmul.f32 %v2007_v37, %v1477_v51  ;;  %v1024_v49 = vadd.f32 1.0, %v2011_v41  ;;  %vm1137_vm2 = vmor %vm1135_vm1, %vm1136_vm15  ;;  %v1379_v61 = vand.u32 2147483647, %v2679_v39 }
 0x141   : > { %v1248_v56 = vsel %vm1245_vm8, %v1247_v43, %v1243_v46  ;;  %v1363_v58 = vsel %vm1362_vm11, %v2001_v29, %v1359_v47  ;;  %v1132_v48 = vsub.f32 1.0, %v1131_v55  ;;  %v1262_v20 = vor.u32 1.1754944e-38, %v1261_v25 }
 0x142   : > { %1519 = vst [vmem:[%s2231_s30 + $0x70] sm:$0xff] %v1248_v56  ;;  %v1368_v59 = vsel %vm2683_vm9, %v1367_v50, %v1363_v58  ;;  %v2013_v62 = vpop.eup %2012  ;;  %v1479_v24 = vadd.f32 %v2007_v37, %v1478_v54  ;;  %2016 = vrcp.f32 %v1024_v49  ;;  %vm1375_vm8 = vweird.f32 %v2679_v39 }
 0x143   : > { %1527 = vst [vmem:[%s2231_s30 + $0xb0] sm:$0xff] %v1368_v59  ;;  %v1133_v5 = vmul.f32 %v2009_v45, %v1132_v48  ;;  %v1251_v57 = vmul.f32 %v2013_v62, %v2677_v17  ;;  %v2015_v6 = vpop.eup %2014  ;;  %vm1256_vm4 = vweird.f32 %v2013_v62  ;;  %vm1260_vm9 = vcmp.eq.f32.partialorder %v1259_v4, 8.507059e+37 }
 0x144   : > { %v1483_v7 = vsel %vm1482_vm14, %v2007_v37, %v1479_v24  ;;  %v1371_v60 = vmul.f32 %v2015_v6, %v2679_v39  ;;  %vm1376_vm6 = vweird.f32 %v2015_v6  ;;  %vm1257_vm7 = vmor %vm1255_vm5, %vm1256_vm4  ;;  %v1382_v23 = vor.u32 1.1754944e-38, %v1381_v18 }
 0x145   : > { %v1488_v8 = vsel %vm1485_vm0, %v1487_v2, %v1483_v7  ;;  %v1134_v9 = vadd.f32 %v2009_v45, %v1133_v5  ;;  %v1252_v30 = vsub.f32 1.0, %v1251_v57  ;;  %vm1377_vm10 = vmor %vm1375_vm8, %vm1376_vm6  ;;  %vm1380_vm11 = vcmp.eq.f32.partialorder %v1379_v61, 8.507059e+37 }
 0x146   : > { %1535 = vst [vmem:[%s2231_s30 + $0xf0] sm:$0xff] %v1488_v8  ;;  %v1372_v11 = vsub.f32 1.0, %v1371_v60  ;;  %v1501_v32 = vand.u32 2147483648, %v1024_v49  ;;  %v1499_v34 = vand.u32 2147483647, %v1024_v49  ;;  %vm1495_vm13 = vweird.f32 %v1024_v49 }
 0x147   : > { %v1138_v3 = vsel %vm1137_vm2, %v2009_v45, %v1134_v9  ;;  %v1253_v0 = vmul.f32 %v2013_v62, %v1252_v30 }
 0x148   : > { %v1143_v13 = vsel %vm1140_vm3, %v1142_v10, %v1138_v3  ;;  %v1373_v14 = vmul.f32 %v2015_v6, %v1372_v11  ;;  %v2017_v16 = vpop.eup %2016  ;;  %v1502_v35 = vor.u32 1.1754944e-38, %v1501_v32  ;;  %vm1500_vm15 = vcmp.eq.f32.partialorder %v1499_v34, 8.507059e+37 }
 0x149   : > { %1512 = vst [vmem:[%s2231_s30 + $0x38] sm:$0xff] %v1143_v13  ;;  %v1254_v19 = vadd.f32 %v2013_v62, %v1253_v0  ;;  %v1491_v22 = vmul.f32 %v2017_v16, %v1024_v49  ;;  %vm1496_vm12 = vweird.f32 %v2017_v16 }
 0x14a   : > { %v1374_v21 = vadd.f32 %v2015_v6, %v1373_v14  ;;  %vm1497_vm14 = vmor %vm1495_vm13, %vm1496_vm12 }
 0x14b   : > { %v1258_v12 = vsel %vm1257_vm7, %v2013_v62, %v1254_v19  ;;  %v1492_v28 = vsub.f32 1.0, %v1491_v22 }
 0x14c   : > { %v1263_v29 = vsel %vm1260_vm9, %v1262_v20, %v1258_v12  ;;  %v1378_v27 = vsel %vm1377_vm10, %v2015_v6, %v1374_v21 }
 0x14d   : > { %1520 = vst [vmem:[%s2231_s30 + $0x78] sm:$0xff] %v1263_v29  ;;  %v1383_v31 = vsel %vm1380_vm11, %v1382_v23, %v1378_v27  ;;  %v1493_v33 = vmul.f32 %v2017_v16, %v1492_v28 }
 0x14e   : > { %1528 = vst [vmem:[%s2231_s30 + $0xb8] sm:$0xff] %v1383_v31 }
 0x14f   : > { %v1494_v15 = vadd.f32 %v2017_v16, %v1493_v33 }
 0x151   : > { %v1498_v36 = vsel %vm1497_vm14, %v2017_v16, %v1494_v15 }
 0x152   : > { %v1503_v17 = vsel %vm1500_vm15, %v1502_v35, %v1498_v36 }
 0x153   : > { %1536 = vst [vmem:[%s2231_s30 + $0xf8] sm:$0xff] %v1503_v17 }
 0x154 PF: > { %s15_s20 = sadd.s32 1, %s2043_s20   ;;  %s2774_s18 = smov %s2039_s19 }
 0x155   : > { %p12_p5 = scmp.ge.s32.totalorder %s15_s20, 4   ;;  %s2775_s19 = smov %s2777_s21 }
 0x157   :  { %14 = sbr.rel (!%p12_p5) target bundleno = 2 (0x2), region = 90 }

</bundles_post_ra>
